<compile_context>
chip_gen: v7x
topology: tpu7x:2x2x1
jax: 0.10.0
libtpu: 0.0.40
codegen_flags: <defaults>
</compile_context>

<pallas_src>
import functools

import jax
import jax.numpy as jnp
from jax import lax
from jax.experimental import pallas as pl
from jax.experimental.pallas import tpu as pltpu

K = 7                    # conv kernel size
PAD = (K - 1) // 2       # = 3 ("same" padding)
EPS = 1e-5               # BatchNorm eps (PyTorch default used in the module)


# ----------------------------------------------------------------------------
# Fused CBAM kernel (one grid step == Bn batch samples)
# ----------------------------------------------------------------------------
def cbam_kernel(x_ref, w1t_ref, w2_ref, b2_ref,          # VMEM inputs
                b1_ref, convw_ref, bn_ref,                # SMEM inputs
                o_ref,                                     # VMEM output
                fp_ref,                                    # VMEM scratch
                *, H, W):
    # x_ref   : (Bn, C, H*W)  lane-dense block of Bn samples
    # w1t_ref : (C, hidden)   ChannelGate Linear1 weight, transposed (W1.T)
    # w2_ref  : (C, hidden)   ChannelGate Linear2 weight (PyTorch layout)
    # b2_ref  : (C, 1)        ChannelGate Linear2 bias
    # b1_ref  : (hidden,)     ChannelGate Linear1 bias            (SMEM)
    # convw_ref: (2*7*7,)     SpatialGate conv weight, flat [c,kh,kw] (SMEM)
    # bn_ref  : (2,)          folded BN: (scale, bias)             (SMEM)
    # o_ref   : (Bn, C, H*W)
    # fp_ref  : (2*Bn, HW + 2*(3W+3)) flat zero-padded channel-pool planes;
    #           rows [0,Bn) = per-sample max plane, rows [Bn,2Bn) = mean plane
    Bn, C, HW = x_ref.shape
    hidden = w1t_ref.shape[1]
    PADF = PAD * W + PAD                     # flat "same"-padding width (3W+3)

    x = x_ref[...]                           # native dtype; big path stays here

    # ----------------------------- ChannelGate ------------------------------
    # Spatial stats reduced in the input dtype (max is exact; a bf16 mean is
    # dominated by the input quantization); only the tiny (Bn,C,1) results go
    # to f32 for the MLP.
    # TODO(synk): for bf16 inputs that need f32-accumulated means, reduce per
    # C-tile with an f32 accumulator instead of casting the whole block.
    avg = jnp.mean(x, axis=2, keepdims=True).astype(jnp.float32)    # (Bn,C,1)
    mx = jnp.max(x, axis=2, keepdims=True).astype(jnp.float32)      # (Bn,C,1)

    # mlp(avg)+mlp(max) = W2 @ (relu(W1@avg+b1) + relu(W1@max+b1)) + 2*b2.
    # hidden = C // 16 is tiny here, so fully unroll (no MXU needed).
    # TODO(synk): for large C/hidden (C>=256, hidden>=16) replace this with
    # two small jnp.dot's on a lane-dense (2*Bn, C) stack of the pooled stats.
    att = 2.0 * b2_ref[...]                                          # (C,1)
    for j in range(hidden):
        w1j = w1t_ref[:, j:j + 1]                                    # (C,1)
        h_a = jnp.sum(w1j * avg, axis=1, keepdims=True) + b1_ref[j]  # (Bn,1,1)
        h_m = jnp.sum(w1j * mx, axis=1, keepdims=True) + b1_ref[j]
        s_j = jnp.maximum(h_a, 0.0) + jnp.maximum(h_m, 0.0)
        att = att + w2_ref[:, j:j + 1] * s_j                         # (Bn,C,1)
    cg = jax.nn.sigmoid(-att).astype(x.dtype)   # == 1 - sigmoid(att), exact
    x_cg = x * cg                               # (Bn,C,HW), input dtype

    # ----------------------------- SpatialGate ------------------------------
    # Channel pool (f32 planes for the conv), written flat into the padded
    # scratch.  Only the two PADF-wide borders are re-zeroed each step
    # (cheap + megacore-safe, see header comment).
    p_max = jnp.max(x_cg, axis=1).astype(jnp.float32)                # (Bn,HW)
    p_mean = jnp.mean(x_cg, axis=1).astype(jnp.float32)              # (Bn,HW)

    zpad = jnp.zeros((2 * Bn, PADF), jnp.float32)
    fp_ref[:, 0:PADF] = zpad
    fp_ref[:, PADF + HW:PADF + HW + PADF] = zpad
    fp_ref[0:Bn, PADF:PADF + HW] = p_max
    fp_ref[Bn:2 * Bn, PADF:PADF + HW] = p_mean

    # 7x7 "same" conv (2 -> 1, no bias) on the flat layout: the window for tap
    # (kh, kw) starts at flat offset kh*W + kw (static ref slice).  Rows that
    # fall outside [0, H) read the zero borders; columns outside [0, W) are
    # either in the zero borders or killed by the per-kw column mask.
    col = lax.broadcasted_iota(jnp.int32, (1, HW), 1) % W            # (1,HW)
    acc = jnp.zeros((Bn, HW), jnp.float32)
    for kw in range(K):
        dx = kw - PAD
        part = jnp.zeros((Bn, HW), jnp.float32)
        for kh in range(K):
            start = kh * W + kw
            w_mx = convw_ref[kh * K + kw]              # channel 0 = max plane
            w_mn = convw_ref[K * K + kh * K + kw]      # channel 1 = mean plane
            part = (part
                    + fp_ref[0:Bn, start:start + HW] * w_mx
                    + fp_ref[Bn:2 * Bn, start:start + HW] * w_mn)
        if dx == 0:
            acc = acc + part
        else:
            valid = jnp.logical_and(col + dx >= 0, col + dx < W)     # (1,HW)
            acc = acc + jnp.where(valid, part, 0.0)

    y = acc * bn_ref[0] + bn_ref[1]                  # folded BN (eval mode)
    sg = jax.nn.sigmoid(-y).astype(x.dtype)          # (Bn,HW) == 1 - sigmoid(y)

    o_ref[...] = (x_cg * sg.reshape(Bn, 1, HW)).astype(o_ref.dtype)


# ----------------------------------------------------------------------------
# Wrapper
# ----------------------------------------------------------------------------
def cbam_forward(x, w1, b1, w2, b2, conv_w, gamma, beta, r_mean, r_var):
    N, C, H, W = x.shape
    HW = H * W
    hidden = w1.shape[0]
    PADF = PAD * W + PAD
    L = HW + 2 * PADF                       # flat padded plane length

    itemsize = jnp.dtype(x.dtype).itemsize
    per_sample = C * HW * itemsize

    # Batch Bn samples per grid step so each step moves a decent HBM chunk
    # (tiny per-step blocks are dominated by ~0.35us step overhead), but keep
    # >= 2 grid steps whenever N >= 2 so both v7x TensorCores get work.
    target = 1 << 20
    bns = 1
    for cand in range(2, N + 1):
        if N % cand:
            continue
        if N // cand < 2 and N >= 2:
            continue
        if cand * per_sample <= target:
            bns = cand
    # TODO(synk): for very large per-sample blocks (v7x: 64 MiB VMEM/TC),
    # stream C-tiles inside the kernel (or fall back to a two-kernel split)
    # instead of holding the whole (Bn, C, HW) block resident.

    x2 = x.reshape(N, C, HW)                # lane-dense view, contiguous

    # Tiny one-time parameter packing.
    w1t = jnp.transpose(w1).astype(jnp.float32)          # (C, hidden)
    w2v = w2.astype(jnp.float32)                         # (C, hidden)
    b2v = b2.reshape(C, 1).astype(jnp.float32)           # (C, 1)
    b1v = b1.astype(jnp.float32)                         # (hidden,)
    convw = conv_w.reshape(-1).astype(jnp.float32)       # (2*K*K,)
    bn_a = gamma * lax.rsqrt(r_var + EPS)                # folded BN scale
    bn_b = beta - r_mean * bn_a                          # folded BN bias
    bn2 = jnp.stack([bn_a, bn_b]).astype(jnp.float32)    # (2,)

    block_bytes = bns * per_sample
    vmem_limit = (6 * block_bytes                        # dbl-buffered in/out + temps
                  + (2 * bns * L + C * (2 * hidden + 1)) * 4
                  + (4 << 20))
    vmem_limit = int(min(max(vmem_limit, 32 << 20), 128 << 20))

    cost = pl.CostEstimate(
        flops=N * (6 * C * HW + 4 * K * K * HW),
        transcendentals=N * (C + HW),
        bytes_accessed=2 * N * C * HW * itemsize,
    )

    kernel = functools.partial(cbam_kernel, H=H, W=W)
    out2 = pl.pallas_call(
        kernel,
        out_shape=jax.ShapeDtypeStruct((N, C, HW), x.dtype),
        grid=(N // bns,),
        in_specs=[
            pl.BlockSpec((bns, C, HW), lambda n: (n, 0, 0)),
            pl.BlockSpec((C, hidden), lambda n: (0, 0)),
            pl.BlockSpec((C, hidden), lambda n: (0, 0)),
            pl.BlockSpec((C, 1), lambda n: (0, 0)),
            pl.BlockSpec(memory_space=pltpu.MemorySpace.SMEM),
            pl.BlockSpec(memory_space=pltpu.MemorySpace.SMEM),
            pl.BlockSpec(memory_space=pltpu.MemorySpace.SMEM),
        ],
        out_specs=pl.BlockSpec((bns, C, HW), lambda n: (n, 0, 0)),
        scratch_shapes=[pltpu.VMEM((2 * bns, L), jnp.float32)],
        compiler_params=pltpu.CompilerParams(
            dimension_semantics=("parallel",),
            vmem_limit_bytes=vmem_limit,
        ),
        cost_estimate=cost,
    )(x2, w1t, w2v, b2v, b1v, convw, bn2)
    return out2.reshape(N, C, H, W)


# ----------------------------------------------------------------------------
# Pure-JAX reference (mirrors the PyTorch CBAM forward, eval-mode BN)
# ----------------------------------------------------------------------------
def cbam_ref(x, w1, b1, w2, b2, conv_w, gamma, beta, r_mean, r_var):
    N, C, H, W = x.shape
    avg = jnp.mean(x, axis=(2, 3))                        # (N, C)
    mx = jnp.max(x, axis=(2, 3))                          # (N, C)

    def mlp(v):
        h = jnp.maximum(v @ w1.T + b1, 0.0)
        return h @ w2.T + b2

    cg = jax.nn.sigmoid(mlp(avg) + mlp(mx))[:, :, None, None]
    x_cg = x * (1.0 - cg)

    pooled = jnp.stack([jnp.max(x_cg, axis=1), jnp.mean(x_cg, axis=1)], axis=1)
    pp = jnp.pad(pooled, ((0, 0), (0, 0), (PAD, PAD), (PAD, PAD)))
    conv = jnp.zeros((N, H, W), jnp.float32)
    for c in range(2):
        for kh in range(K):
            for kw in range(K):
                conv = conv + pp[:, c, kh:kh + H, kw:kw + W] * conv_w[0, c, kh, kw]
    y = (conv - r_mean) * lax.rsqrt(r_var + EPS) * gamma + beta
    sg = jax.nn.sigmoid(y)[:, None, :, :]
    return x_cg * (1.0 - sg)


if __name__ == "__main__":
    # gate_channels=32 with the default reduction_ratio=16 -> hidden=2.
    # N=4 so the wrapper picks Bn=2 samples per grid step (2 parallel steps).
    N, C, H, W = 4, 32, 16, 16
    hidden = C // 16

    key = jax.random.PRNGKey(0)
    kx, k1, k2, k3, k4, kc = jax.random.split(key, 6)

    x = jax.random.normal(kx, (N, C, H, W), dtype=jnp.float32)
    # ChannelGate MLP: Linear(C, hidden) then Linear(hidden, C) (PyTorch layouts).
    w1 = 0.3 * jax.random.normal(k1, (hidden, C), dtype=jnp.float32)
    b1 = 0.1 * jax.random.normal(k2, (hidden,), dtype=jnp.float32)
    w2 = 0.3 * jax.random.normal(k3, (C, hidden), dtype=jnp.float32)
    b2 = 0.1 * jax.random.normal(k4, (C,), dtype=jnp.float32)
    # SpatialGate: Conv2d(2, 1, 7, padding=3, bias=False) + BatchNorm2d(1) (eval).
    conv_w = 0.05 * jax.random.normal(kc, (1, 2, K, K), dtype=jnp.float32)
    gamma, beta = jnp.float32(0.9), jnp.float32(0.1)
    r_mean, r_var = jnp.float32(0.05), jnp.float32(1.2)

    out = cbam_forward(x, w1, b1, w2, b2, conv_w, gamma, beta, r_mean, r_var)
    out = jax.block_until_ready(out)

    ref = cbam_ref(x, w1, b1, w2, b2, conv_w, gamma, beta, r_mean, r_var)
    assert out.shape == (N, C, H, W)
    err = float(jnp.max(jnp.abs(out - ref)))
    assert err < 1e-4, err

    print("KERNEL_OK")
</pallas_src>

<mosaic_0001>
module attributes {stable_mosaic.version = 11 : i64} {
  func.func @cbam_kernel(%arg0: i32, %arg1: memref<2x32x256xf32, #tpu.memory_space<vmem>>, %arg2: memref<32x2xf32, #tpu.memory_space<vmem>>, %arg3: memref<32x2xf32, #tpu.memory_space<vmem>>, %arg4: memref<32x1xf32, #tpu.memory_space<vmem>>, %arg5: memref<2xf32, #tpu.memory_space<smem>>, %arg6: memref<98xf32, #tpu.memory_space<smem>>, %arg7: memref<2xf32, #tpu.memory_space<smem>>, %arg8: memref<2x32x256xf32, #tpu.memory_space<vmem>>, %arg9: memref<4x358xf32, #tpu.memory_space<vmem>>) attributes {dimension_semantics = [#tpu.dimension_semantics<parallel>], iteration_bounds = array<i64: 2>, scalar_prefetch = 0 : i64, scratch_operands = 1 : i64, tpu.core_type = #tpu.core_type<tc>, window_params = [{transform_indices = @transform_0, window_bounds = array<i64: 2, 32, 256>}, {pipeline_mode = #tpu.pipeline_mode<synchronous>, transform_indices = @transform_1, window_bounds = array<i64: 32, 2>}, {pipeline_mode = #tpu.pipeline_mode<synchronous>, transform_indices = @transform_2, window_bounds = array<i64: 32, 2>}, {pipeline_mode = #tpu.pipeline_mode<synchronous>, transform_indices = @transform_3, window_bounds = array<i64: 32, 1>}, {transform_indices = @transform_4, window_bounds = array<i64: 2>}, {transform_indices = @transform_5, window_bounds = array<i64: 98>}, {transform_indices = @transform_6, window_bounds = array<i64: 2>}, {transform_indices = @transform_7, window_bounds = array<i64: 2, 32, 256>}]} {
    %c0 = arith.constant 0 : index
    %c0_0 = arith.constant 0 : index
    %c0_1 = arith.constant 0 : index
    %0 = vector.load %arg1[%c0, %c0_0, %c0_1] : memref<2x32x256xf32, #tpu.memory_space<vmem>>, vector<2x32x256xf32>
    %cst = arith.constant dense<0.000000e+00> : vector<2x32xf32>
    %1 = vector.multi_reduction <add>, %0, %cst [2] : vector<2x32x256xf32> to vector<2x32xf32>
    %2 = vector.shape_cast %1 : vector<2x32xf32> to vector<2x32x1xf32>
    %cst_2 = arith.constant 2.560000e+02 : f32
    %3 = vector.broadcast %cst_2 : f32 to vector<2x32x1xf32>
    %4 = arith.divf %2, %3 : vector<2x32x1xf32>
    %cst_3 = arith.constant dense<0xFF800000> : vector<2x32xf32>
    %5 = vector.multi_reduction <maximumf>, %0, %cst_3 [2] : vector<2x32x256xf32> to vector<2x32xf32>
    %6 = vector.shape_cast %5 : vector<2x32xf32> to vector<2x32x1xf32>
    %c0_4 = arith.constant 0 : index
    %c0_5 = arith.constant 0 : index
    %7 = vector.load %arg4[%c0_4, %c0_5] : memref<32x1xf32, #tpu.memory_space<vmem>>, vector<32x1xf32>
    %cst_6 = arith.constant 2.000000e+00 : f32
    %8 = vector.broadcast %cst_6 : f32 to vector<32x1xf32>
    %9 = arith.mulf %8, %7 : vector<32x1xf32>
    %c0_7 = arith.constant 0 : index
    %c0_8 = arith.constant 0 : index
    %10 = vector.load %arg2[%c0_7, %c0_8] : memref<32x2xf32, #tpu.memory_space<vmem>>, vector<32x1xf32>
    %11 = vector.shape_cast %10 : vector<32x1xf32> to vector<1x32x1xf32>
    %12 = vector.broadcast %11 : vector<1x32x1xf32> to vector<2x32x1xf32>
    %13 = arith.mulf %12, %4 : vector<2x32x1xf32>
    %cst_9 = arith.constant dense<0.000000e+00> : vector<2x1xf32>
    %14 = vector.multi_reduction <add>, %13, %cst_9 [1] : vector<2x32x1xf32> to vector<2x1xf32>
    %15 = vector.shape_cast %14 : vector<2x1xf32> to vector<2x1x1xf32>
    %c0_10 = arith.constant 0 : index
    %16 = memref.load %arg5[%c0_10] : memref<2xf32, #tpu.memory_space<smem>>
    %17 = vector.broadcast %16 : f32 to vector<2x1x1xf32>
    %18 = arith.addf %15, %17 : vector<2x1x1xf32>
    %19 = vector.shape_cast %10 : vector<32x1xf32> to vector<1x32x1xf32>
    %20 = vector.broadcast %19 : vector<1x32x1xf32> to vector<2x32x1xf32>
    %21 = arith.mulf %20, %6 : vector<2x32x1xf32>
    %cst_11 = arith.constant dense<0.000000e+00> : vector<2x1xf32>
    %22 = vector.multi_reduction <add>, %21, %cst_11 [1] : vector<2x32x1xf32> to vector<2x1xf32>
    %23 = vector.shape_cast %22 : vector<2x1xf32> to vector<2x1x1xf32>
    %c0_12 = arith.constant 0 : index
    %24 = memref.load %arg5[%c0_12] : memref<2xf32, #tpu.memory_space<smem>>
    %25 = vector.broadcast %24 : f32 to vector<2x1x1xf32>
    %26 = arith.addf %23, %25 : vector<2x1x1xf32>
    %cst_13 = arith.constant 0.000000e+00 : f32
    %27 = vector.broadcast %cst_13 : f32 to vector<2x1x1xf32>
    %28 = arith.maximumf %18, %27 : vector<2x1x1xf32>
    %cst_14 = arith.constant 0.000000e+00 : f32
    %29 = vector.broadcast %cst_14 : f32 to vector<2x1x1xf32>
    %30 = arith.maximumf %26, %29 : vector<2x1x1xf32>
    %31 = arith.addf %28, %30 : vector<2x1x1xf32>
    %c0_15 = arith.constant 0 : index
    %c0_16 = arith.constant 0 : index
    %32 = vector.load %arg3[%c0_15, %c0_16] : memref<32x2xf32, #tpu.memory_space<vmem>>, vector<32x1xf32>
    %33 = vector.shape_cast %32 : vector<32x1xf32> to vector<1x32x1xf32>
    %34 = vector.broadcast %33 : vector<1x32x1xf32> to vector<2x32x1xf32>
    %35 = vector.broadcast %31 : vector<2x1x1xf32> to vector<2x32x1xf32>
    %36 = arith.mulf %34, %35 : vector<2x32x1xf32>
    %37 = vector.shape_cast %9 : vector<32x1xf32> to vector<1x32x1xf32>
    %38 = vector.broadcast %37 : vector<1x32x1xf32> to vector<2x32x1xf32>
    %39 = arith.addf %38, %36 : vector<2x32x1xf32>
    %c0_17 = arith.constant 0 : index
    %c1 = arith.constant 1 : index
    %40 = vector.load %arg2[%c0_17, %c1] : memref<32x2xf32, #tpu.memory_space<vmem>>, vector<32x1xf32>
    %41 = vector.shape_cast %40 : vector<32x1xf32> to vector<1x32x1xf32>
    %42 = vector.broadcast %41 : vector<1x32x1xf32> to vector<2x32x1xf32>
    %43 = arith.mulf %42, %4 : vector<2x32x1xf32>
    %cst_18 = arith.constant dense<0.000000e+00> : vector<2x1xf32>
    %44 = vector.multi_reduction <add>, %43, %cst_18 [1] : vector<2x32x1xf32> to vector<2x1xf32>
    %45 = vector.shape_cast %44 : vector<2x1xf32> to vector<2x1x1xf32>
    %c1_19 = arith.constant 1 : index
    %46 = memref.load %arg5[%c1_19] : memref<2xf32, #tpu.memory_space<smem>>
    %47 = vector.broadcast %46 : f32 to vector<2x1x1xf32>
    %48 = arith.addf %45, %47 : vector<2x1x1xf32>
    %49 = vector.shape_cast %40 : vector<32x1xf32> to vector<1x32x1xf32>
    %50 = vector.broadcast %49 : vector<1x32x1xf32> to vector<2x32x1xf32>
    %51 = arith.mulf %50, %6 : vector<2x32x1xf32>
    %cst_20 = arith.constant dense<0.000000e+00> : vector<2x1xf32>
    %52 = vector.multi_reduction <add>, %51, %cst_20 [1] : vector<2x32x1xf32> to vector<2x1xf32>
    %53 = vector.shape_cast %52 : vector<2x1xf32> to vector<2x1x1xf32>
    %c1_21 = arith.constant 1 : index
    %54 = memref.load %arg5[%c1_21] : memref<2xf32, #tpu.memory_space<smem>>
    %55 = vector.broadcast %54 : f32 to vector<2x1x1xf32>
    %56 = arith.addf %53, %55 : vector<2x1x1xf32>
    %cst_22 = arith.constant 0.000000e+00 : f32
    %57 = vector.broadcast %cst_22 : f32 to vector<2x1x1xf32>
    %58 = arith.maximumf %48, %57 : vector<2x1x1xf32>
    %cst_23 = arith.constant 0.000000e+00 : f32
    %59 = vector.broadcast %cst_23 : f32 to vector<2x1x1xf32>
    %60 = arith.maximumf %56, %59 : vector<2x1x1xf32>
    %61 = arith.addf %58, %60 : vector<2x1x1xf32>
    %c0_24 = arith.constant 0 : index
    %c1_25 = arith.constant 1 : index
    %62 = vector.load %arg3[%c0_24, %c1_25] : memref<32x2xf32, #tpu.memory_space<vmem>>, vector<32x1xf32>
    %63 = vector.shape_cast %62 : vector<32x1xf32> to vector<1x32x1xf32>
    %64 = vector.broadcast %63 : vector<1x32x1xf32> to vector<2x32x1xf32>
    %65 = vector.broadcast %61 : vector<2x1x1xf32> to vector<2x32x1xf32>
    %66 = arith.mulf %64, %65 : vector<2x32x1xf32>
    %67 = arith.addf %39, %66 : vector<2x32x1xf32>
    %cst_26 = arith.constant 0.000000e+00 : f32
    %68 = vector.broadcast %cst_26 : f32 to vector<2x32x1xf32>
    %69 = arith.subf %68, %67 : vector<2x32x1xf32>
    %70 = arith.negf %69 : vector<2x32x1xf32>
    %71 = math.exp %70 : vector<2x32x1xf32>
    %cst_27 = arith.constant 1.000000e+00 : f32
    %72 = vector.broadcast %cst_27 : f32 to vector<2x32x1xf32>
    %73 = arith.addf %72, %71 : vector<2x32x1xf32>
    %74 = arith.divf %72, %73 : vector<2x32x1xf32>
    %75 = vector.broadcast %74 : vector<2x32x1xf32> to vector<2x32x256xf32>
    %76 = arith.mulf %0, %75 : vector<2x32x256xf32>
    %cst_28 = arith.constant dense<0xFF800000> : vector<2x256xf32>
    %77 = vector.multi_reduction <maximumf>, %76, %cst_28 [1] : vector<2x32x256xf32> to vector<2x256xf32>
    %cst_29 = arith.constant dense<0.000000e+00> : vector<2x256xf32>
    %78 = vector.multi_reduction <add>, %76, %cst_29 [1] : vector<2x32x256xf32> to vector<2x256xf32>
    %cst_30 = arith.constant 3.200000e+01 : f32
    %79 = vector.broadcast %cst_30 : f32 to vector<2x256xf32>
    %80 = arith.divf %78, %79 : vector<2x256xf32>
    %cst_31 = arith.constant 0.000000e+00 : f32
    %81 = vector.broadcast %cst_31 : f32 to vector<4x51xf32>
    %c0_32 = arith.constant 0 : index
    %c0_33 = arith.constant 0 : index
    %82 = vector.load %arg9[%c0_32, %c0_33] : memref<4x358xf32, #tpu.memory_space<vmem>>, vector<4x51xf32>
    tpu.vector_store %arg9[%c0_32, %c0_33], %81 {strides = array<i32>} : memref<4x358xf32, #tpu.memory_space<vmem>>, vector<4x51xf32>,
    %c0_34 = arith.constant 0 : index
    %c307 = arith.constant 307 : index
    %83 = vector.load %arg9[%c0_34, %c307] : memref<4x358xf32, #tpu.memory_space<vmem>>, vector<4x51xf32>
    tpu.vector_store %arg9[%c0_34, %c307], %81 {strides = array<i32>} : memref<4x358xf32, #tpu.memory_space<vmem>>, vector<4x51xf32>,
    %c0_35 = arith.constant 0 : index
    %c51 = arith.constant 51 : index
    %84 = vector.load %arg9[%c0_35, %c51] : memref<4x358xf32, #tpu.memory_space<vmem>>, vector<2x256xf32>
    tpu.vector_store %arg9[%c0_35, %c51], %77 {strides = array<i32>} : memref<4x358xf32, #tpu.memory_space<vmem>>, vector<2x256xf32>,
    %c2 = arith.constant 2 : index
    %c51_36 = arith.constant 51 : index
    %85 = vector.load %arg9[%c2, %c51_36] : memref<4x358xf32, #tpu.memory_space<vmem>>, vector<2x256xf32>
    tpu.vector_store %arg9[%c2, %c51_36], %80 {strides = array<i32>} : memref<4x358xf32, #tpu.memory_space<vmem>>, vector<2x256xf32>,
    %86 = tpu.iota {dimensions = array<i32: 1>} : vector<1x256xi32>
    %c16_i32 = arith.constant 16 : i32
    %c0_i32 = arith.constant 0 : i32
    %87 = arith.cmpi eq, %c16_i32, %c0_i32 : i32
    %c1_i32 = arith.constant 1 : i32
    %88 = arith.select %87, %c1_i32, %c16_i32 : i32
    %89 = vector.broadcast %88 : i32 to vector<1x256xi32>
    %90 = arith.remsi %86, %89 : vector<1x256xi32>
    %c0_i32_37 = arith.constant 0 : i32
    %91 = vector.broadcast %c0_i32_37 : i32 to vector<1x256xi32>
    %92 = arith.cmpi ne, %90, %91 : vector<1x256xi32>
    %c0_i32_38 = arith.constant 0 : i32
    %93 = vector.broadcast %c0_i32_38 : i32 to vector<1x256xi32>
    %94 = arith.cmpi slt, %90, %93 : vector<1x256xi32>
    %c0_i32_39 = arith.constant 0 : i32
    %95 = arith.cmpi slt, %88, %c0_i32_39 : i32
    %96 = vector.broadcast %95 : i1 to vector<1x256xi1>
    %97 = vector.broadcast %96 : vector<1x256xi1> to vector<1x256xi1>
    %98 = arith.xori %94, %97 : vector<1x256xi1>
    %99 = arith.andi %98, %92 : vector<1x256xi1>
    %100 = vector.broadcast %88 : i32 to vector<1x256xi32>
    %101 = arith.addi %90, %100 : vector<1x256xi32>
    %102 = arith.select %99, %101, %90 : vector<1x256xi1>, vector<1x256xi32>
    %cst_40 = arith.constant 0.000000e+00 : f32
    %103 = vector.broadcast %cst_40 : f32 to vector<2x256xf32>
    %cst_41 = arith.constant 0.000000e+00 : f32
    %104 = vector.broadcast %cst_41 : f32 to vector<2x256xf32>
    %c0_42 = arith.constant 0 : index
    %105 = memref.load %arg6[%c0_42] : memref<98xf32, #tpu.memory_space<smem>>
    %c49 = arith.constant 49 : index
    %106 = memref.load %arg6[%c49] : memref<98xf32, #tpu.memory_space<smem>>
    %c0_43 = arith.constant 0 : index
    %c0_44 = arith.constant 0 : index
    %107 = vector.load %arg9[%c0_43, %c0_44] : memref<4x358xf32, #tpu.memory_space<vmem>>, vector<2x256xf32>
    %108 = vector.broadcast %105 : f32 to vector<2x256xf32>
    %109 = arith.mulf %107, %108 : vector<2x256xf32>
    %110 = arith.addf %104, %109 : vector<2x256xf32>
    %c2_45 = arith.constant 2 : index
    %c0_46 = arith.constant 0 : index
    %111 = vector.load %arg9[%c2_45, %c0_46] : memref<4x358xf32, #tpu.memory_space<vmem>>, vector<2x256xf32>
    %112 = vector.broadcast %106 : f32 to vector<2x256xf32>
    %113 = arith.mulf %111, %112 : vector<2x256xf32>
    %114 = arith.addf %110, %113 : vector<2x256xf32>
    %c7 = arith.constant 7 : index
    %115 = memref.load %arg6[%c7] : memref<98xf32, #tpu.memory_space<smem>>
    %c56 = arith.constant 56 : index
    %116 = memref.load %arg6[%c56] : memref<98xf32, #tpu.memory_space<smem>>
    %c0_47 = arith.constant 0 : index
    %c16 = arith.constant 16 : index
    %117 = vector.load %arg9[%c0_47, %c16] : memref<4x358xf32, #tpu.memory_space<vmem>>, vector<2x256xf32>
    %118 = vector.broadcast %115 : f32 to vector<2x256xf32>
    %119 = arith.mulf %117, %118 : vector<2x256xf32>
    %120 = arith.addf %114, %119 : vector<2x256xf32>
    %c2_48 = arith.constant 2 : index
    %c16_49 = arith.constant 16 : index
    %121 = vector.load %arg9[%c2_48, %c16_49] : memref<4x358xf32, #tpu.memory_space<vmem>>, vector<2x256xf32>
    %122 = vector.broadcast %116 : f32 to vector<2x256xf32>
    %123 = arith.mulf %121, %122 : vector<2x256xf32>
    %124 = arith.addf %120, %123 : vector<2x256xf32>
    %c14 = arith.constant 14 : index
    %125 = memref.load %arg6[%c14] : memref<98xf32, #tpu.memory_space<smem>>
    %c63 = arith.constant 63 : index
    %126 = memref.load %arg6[%c63] : memref<98xf32, #tpu.memory_space<smem>>
    %c0_50 = arith.constant 0 : index
    %c32 = arith.constant 32 : index
    %127 = vector.load %arg9[%c0_50, %c32] : memref<4x358xf32, #tpu.memory_space<vmem>>, vector<2x256xf32>
    %128 = vector.broadcast %125 : f32 to vector<2x256xf32>
    %129 = arith.mulf %127, %128 : vector<2x256xf32>
    %130 = arith.addf %124, %129 : vector<2x256xf32>
    %c2_51 = arith.constant 2 : index
    %c32_52 = arith.constant 32 : index
    %131 = vector.load %arg9[%c2_51, %c32_52] : memref<4x358xf32, #tpu.memory_space<vmem>>, vector<2x256xf32>
    %132 = vector.broadcast %126 : f32 to vector<2x256xf32>
    %133 = arith.mulf %131, %132 : vector<2x256xf32>
    %134 = arith.addf %130, %133 : vector<2x256xf32>
    %c21 = arith.constant 21 : index
    %135 = memref.load %arg6[%c21] : memref<98xf32, #tpu.memory_space<smem>>
    %c70 = arith.constant 70 : index
    %136 = memref.load %arg6[%c70] : memref<98xf32, #tpu.memory_space<smem>>
    %c0_53 = arith.constant 0 : index
    %c48 = arith.constant 48 : index
    %137 = vector.load %arg9[%c0_53, %c48] : memref<4x358xf32, #tpu.memory_space<vmem>>, vector<2x256xf32>
    %138 = vector.broadcast %135 : f32 to vector<2x256xf32>
    %139 = arith.mulf %137, %138 : vector<2x256xf32>
    %140 = arith.addf %134, %139 : vector<2x256xf32>
    %c2_54 = arith.constant 2 : index
    %c48_55 = arith.constant 48 : index
    %141 = vector.load %arg9[%c2_54, %c48_55] : memref<4x358xf32, #tpu.memory_space<vmem>>, vector<2x256xf32>
    %142 = vector.broadcast %136 : f32 to vector<2x256xf32>
    %143 = arith.mulf %141, %142 : vector<2x256xf32>
    %144 = arith.addf %140, %143 : vector<2x256xf32>
    %c28 = arith.constant 28 : index
    %145 = memref.load %arg6[%c28] : memref<98xf32, #tpu.memory_space<smem>>
    %c77 = arith.constant 77 : index
    %146 = memref.load %arg6[%c77] : memref<98xf32, #tpu.memory_space<smem>>
    %c0_56 = arith.constant 0 : index
    %c64 = arith.constant 64 : index
    %147 = vector.load %arg9[%c0_56, %c64] : memref<4x358xf32, #tpu.memory_space<vmem>>, vector<2x256xf32>
    %148 = vector.broadcast %145 : f32 to vector<2x256xf32>
    %149 = arith.mulf %147, %148 : vector<2x256xf32>
    %150 = arith.addf %144, %149 : vector<2x256xf32>
    %c2_57 = arith.constant 2 : index
    %c64_58 = arith.constant 64 : index
    %151 = vector.load %arg9[%c2_57, %c64_58] : memref<4x358xf32, #tpu.memory_space<vmem>>, vector<2x256xf32>
    %152 = vector.broadcast %146 : f32 to vector<2x256xf32>
    %153 = arith.mulf %151, %152 : vector<2x256xf32>
    %154 = arith.addf %150, %153 : vector<2x256xf32>
    %c35 = arith.constant 35 : index
    %155 = memref.load %arg6[%c35] : memref<98xf32, #tpu.memory_space<smem>>
    %c84 = arith.constant 84 : index
    %156 = memref.load %arg6[%c84] : memref<98xf32, #tpu.memory_space<smem>>
    %c0_59 = arith.constant 0 : index
    %c80 = arith.constant 80 : index
    %157 = vector.load %arg9[%c0_59, %c80] : memref<4x358xf32, #tpu.memory_space<vmem>>, vector<2x256xf32>
    %158 = vector.broadcast %155 : f32 to vector<2x256xf32>
    %159 = arith.mulf %157, %158 : vector<2x256xf32>
    %160 = arith.addf %154, %159 : vector<2x256xf32>
    %c2_60 = arith.constant 2 : index
    %c80_61 = arith.constant 80 : index
    %161 = vector.load %arg9[%c2_60, %c80_61] : memref<4x358xf32, #tpu.memory_space<vmem>>, vector<2x256xf32>
    %162 = vector.broadcast %156 : f32 to vector<2x256xf32>
    %163 = arith.mulf %161, %162 : vector<2x256xf32>
    %164 = arith.addf %160, %163 : vector<2x256xf32>
    %c42 = arith.constant 42 : index
    %165 = memref.load %arg6[%c42] : memref<98xf32, #tpu.memory_space<smem>>
    %c91 = arith.constant 91 : index
    %166 = memref.load %arg6[%c91] : memref<98xf32, #tpu.memory_space<smem>>
    %c0_62 = arith.constant 0 : index
    %c96 = arith.constant 96 : index
    %167 = vector.load %arg9[%c0_62, %c96] : memref<4x358xf32, #tpu.memory_space<vmem>>, vector<2x256xf32>
    %168 = vector.broadcast %165 : f32 to vector<2x256xf32>
    %169 = arith.mulf %167, %168 : vector<2x256xf32>
    %170 = arith.addf %164, %169 : vector<2x256xf32>
    %c2_63 = arith.constant 2 : index
    %c96_64 = arith.constant 96 : index
    %171 = vector.load %arg9[%c2_63, %c96_64] : memref<4x358xf32, #tpu.memory_space<vmem>>, vector<2x256xf32>
    %172 = vector.broadcast %166 : f32 to vector<2x256xf32>
    %173 = arith.mulf %171, %172 : vector<2x256xf32>
    %174 = arith.addf %170, %173 : vector<2x256xf32>
    %c-3_i32 = arith.constant -3 : i32
    %175 = vector.broadcast %c-3_i32 : i32 to vector<1x256xi32>
    %176 = arith.addi %102, %175 : vector<1x256xi32>
    %c0_i32_65 = arith.constant 0 : i32
    %177 = vector.broadcast %c0_i32_65 : i32 to vector<1x256xi32>
    %178 = arith.cmpi sge, %176, %177 : vector<1x256xi32>
    %c-3_i32_66 = arith.constant -3 : i32
    %179 = vector.broadcast %c-3_i32_66 : i32 to vector<1x256xi32>
    %180 = arith.addi %102, %179 : vector<1x256xi32>
    %c16_i32_67 = arith.constant 16 : i32
    %181 = vector.broadcast %c16_i32_67 : i32 to vector<1x256xi32>
    %182 = arith.cmpi slt, %180, %181 : vector<1x256xi32>
    %183 = arith.andi %178, %182 : vector<1x256xi1>
    %cst_68 = arith.constant 0.000000e+00 : f32
    %184 = vector.shape_cast %183 : vector<1x256xi1> to vector<1x256xi1>
    %185 = vector.broadcast %184 : vector<1x256xi1> to vector<2x256xi1>
    %186 = vector.broadcast %cst_68 : f32 to vector<2x256xf32>
    %187 = arith.select %185, %174, %186 : vector<2x256xi1>, vector<2x256xf32>
    %188 = arith.addf %103, %187 : vector<2x256xf32>
    %cst_69 = arith.constant 0.000000e+00 : f32
    %189 = vector.broadcast %cst_69 : f32 to vector<2x256xf32>
    %c1_70 = arith.constant 1 : index
    %190 = memref.load %arg6[%c1_70] : memref<98xf32, #tpu.memory_space<smem>>
    %c50 = arith.constant 50 : index
    %191 = memref.load %arg6[%c50] : memref<98xf32, #tpu.memory_space<smem>>
    %c0_71 = arith.constant 0 : index
    %c1_72 = arith.constant 1 : index
    %192 = vector.load %arg9[%c0_71, %c1_72] : memref<4x358xf32, #tpu.memory_space<vmem>>, vector<2x256xf32>
    %193 = vector.broadcast %190 : f32 to vector<2x256xf32>
    %194 = arith.mulf %192, %193 : vector<2x256xf32>
    %195 = arith.addf %189, %194 : vector<2x256xf32>
    %c2_73 = arith.constant 2 : index
    %c1_74 = arith.constant 1 : index
    %196 = vector.load %arg9[%c2_73, %c1_74] : memref<4x358xf32, #tpu.memory_space<vmem>>, vector<2x256xf32>
    %197 = vector.broadcast %191 : f32 to vector<2x256xf32>
    %198 = arith.mulf %196, %197 : vector<2x256xf32>
    %199 = arith.addf %195, %198 : vector<2x256xf32>
    %c8 = arith.constant 8 : index
    %200 = memref.load %arg6[%c8] : memref<98xf32, #tpu.memory_space<smem>>
    %c57 = arith.constant 57 : index
    %201 = memref.load %arg6[%c57] : memref<98xf32, #tpu.memory_space<smem>>
    %c0_75 = arith.constant 0 : index
    %c17 = arith.constant 17 : index
    %202 = vector.load %arg9[%c0_75, %c17] : memref<4x358xf32, #tpu.memory_space<vmem>>, vector<2x256xf32>
    %203 = vector.broadcast %200 : f32 to vector<2x256xf32>
    %204 = arith.mulf %202, %203 : vector<2x256xf32>
    %205 = arith.addf %199, %204 : vector<2x256xf32>
    %c2_76 = arith.constant 2 : index
    %c17_77 = arith.constant 17 : index
    %206 = vector.load %arg9[%c2_76, %c17_77] : memref<4x358xf32, #tpu.memory_space<vmem>>, vector<2x256xf32>
    %207 = vector.broadcast %201 : f32 to vector<2x256xf32>
    %208 = arith.mulf %206, %207 : vector<2x256xf32>
    %209 = arith.addf %205, %208 : vector<2x256xf32>
    %c15 = arith.constant 15 : index
    %210 = memref.load %arg6[%c15] : memref<98xf32, #tpu.memory_space<smem>>
    %c64_78 = arith.constant 64 : index
    %211 = memref.load %arg6[%c64_78] : memref<98xf32, #tpu.memory_space<smem>>
    %c0_79 = arith.constant 0 : index
    %c33 = arith.constant 33 : index
    %212 = vector.load %arg9[%c0_79, %c33] : memref<4x358xf32, #tpu.memory_space<vmem>>, vector<2x256xf32>
    %213 = vector.broadcast %210 : f32 to vector<2x256xf32>
    %214 = arith.mulf %212, %213 : vector<2x256xf32>
    %215 = arith.addf %209, %214 : vector<2x256xf32>
    %c2_80 = arith.constant 2 : index
    %c33_81 = arith.constant 33 : index
    %216 = vector.load %arg9[%c2_80, %c33_81] : memref<4x358xf32, #tpu.memory_space<vmem>>, vector<2x256xf32>
    %217 = vector.broadcast %211 : f32 to vector<2x256xf32>
    %218 = arith.mulf %216, %217 : vector<2x256xf32>
    %219 = arith.addf %215, %218 : vector<2x256xf32>
    %c22 = arith.constant 22 : index
    %220 = memref.load %arg6[%c22] : memref<98xf32, #tpu.memory_space<smem>>
    %c71 = arith.constant 71 : index
    %221 = memref.load %arg6[%c71] : memref<98xf32, #tpu.memory_space<smem>>
    %c0_82 = arith.constant 0 : index
    %c49_83 = arith.constant 49 : index
    %222 = vector.load %arg9[%c0_82, %c49_83] : memref<4x358xf32, #tpu.memory_space<vmem>>, vector<2x256xf32>
    %223 = vector.broadcast %220 : f32 to vector<2x256xf32>
    %224 = arith.mulf %222, %223 : vector<2x256xf32>
    %225 = arith.addf %219, %224 : vector<2x256xf32>
    %c2_84 = arith.constant 2 : index
    %c49_85 = arith.constant 49 : index
    %226 = vector.load %arg9[%c2_84, %c49_85] : memref<4x358xf32, #tpu.memory_space<vmem>>, vector<2x256xf32>
    %227 = vector.broadcast %221 : f32 to vector<2x256xf32>
    %228 = arith.mulf %226, %227 : vector<2x256xf32>
    %229 = arith.addf %225, %228 : vector<2x256xf32>
    %c29 = arith.constant 29 : index
    %230 = memref.load %arg6[%c29] : memref<98xf32, #tpu.memory_space<smem>>
    %c78 = arith.constant 78 : index
    %231 = memref.load %arg6[%c78] : memref<98xf32, #tpu.memory_space<smem>>
    %c0_86 = arith.constant 0 : index
    %c65 = arith.constant 65 : index
    %232 = vector.load %arg9[%c0_86, %c65] : memref<4x358xf32, #tpu.memory_space<vmem>>, vector<2x256xf32>
    %233 = vector.broadcast %230 : f32 to vector<2x256xf32>
    %234 = arith.mulf %232, %233 : vector<2x256xf32>
    %235 = arith.addf %229, %234 : vector<2x256xf32>
    %c2_87 = arith.constant 2 : index
    %c65_88 = arith.constant 65 : index
    %236 = vector.load %arg9[%c2_87, %c65_88] : memref<4x358xf32, #tpu.memory_space<vmem>>, vector<2x256xf32>
    %237 = vector.broadcast %231 : f32 to vector<2x256xf32>
    %238 = arith.mulf %236, %237 : vector<2x256xf32>
    %239 = arith.addf %235, %238 : vector<2x256xf32>
    %c36 = arith.constant 36 : index
    %240 = memref.load %arg6[%c36] : memref<98xf32, #tpu.memory_space<smem>>
    %c85 = arith.constant 85 : index
    %241 = memref.load %arg6[%c85] : memref<98xf32, #tpu.memory_space<smem>>
    %c0_89 = arith.constant 0 : index
    %c81 = arith.constant 81 : index
    %242 = vector.load %arg9[%c0_89, %c81] : memref<4x358xf32, #tpu.memory_space<vmem>>, vector<2x256xf32>
    %243 = vector.broadcast %240 : f32 to vector<2x256xf32>
    %244 = arith.mulf %242, %243 : vector<2x256xf32>
    %245 = arith.addf %239, %244 : vector<2x256xf32>
    %c2_90 = arith.constant 2 : index
    %c81_91 = arith.constant 81 : index
    %246 = vector.load %arg9[%c2_90, %c81_91] : memref<4x358xf32, #tpu.memory_space<vmem>>, vector<2x256xf32>
    %247 = vector.broadcast %241 : f32 to vector<2x256xf32>
    %248 = arith.mulf %246, %247 : vector<2x256xf32>
    %249 = arith.addf %245, %248 : vector<2x256xf32>
    %c43 = arith.constant 43 : index
    %250 = memref.load %arg6[%c43] : memref<98xf32, #tpu.memory_space<smem>>
    %c92 = arith.constant 92 : index
    %251 = memref.load %arg6[%c92] : memref<98xf32, #tpu.memory_space<smem>>
    %c0_92 = arith.constant 0 : index
    %c97 = arith.constant 97 : index
    %252 = vector.load %arg9[%c0_92, %c97] : memref<4x358xf32, #tpu.memory_space<vmem>>, vector<2x256xf32>
    %253 = vector.broadcast %250 : f32 to vector<2x256xf32>
    %254 = arith.mulf %252, %253 : vector<2x256xf32>
    %255 = arith.addf %249, %254 : vector<2x256xf32>
    %c2_93 = arith.constant 2 : index
    %c97_94 = arith.constant 97 : index
    %256 = vector.load %arg9[%c2_93, %c97_94] : memref<4x358xf32, #tpu.memory_space<vmem>>, vector<2x256xf32>
    %257 = vector.broadcast %251 : f32 to vector<2x256xf32>
    %258 = arith.mulf %256, %257 : vector<2x256xf32>
    %259 = arith.addf %255, %258 : vector<2x256xf32>
    %c-2_i32 = arith.constant -2 : i32
    %260 = vector.broadcast %c-2_i32 : i32 to vector<1x256xi32>
    %261 = arith.addi %102, %260 : vector<1x256xi32>
    %c0_i32_95 = arith.constant 0 : i32
    %262 = vector.broadcast %c0_i32_95 : i32 to vector<1x256xi32>
    %263 = arith.cmpi sge, %261, %262 : vector<1x256xi32>
    %c-2_i32_96 = arith.constant -2 : i32
    %264 = vector.broadcast %c-2_i32_96 : i32 to vector<1x256xi32>
    %265 = arith.addi %102, %264 : vector<1x256xi32>
    %c16_i32_97 = arith.constant 16 : i32
    %266 = vector.broadcast %c16_i32_97 : i32 to vector<1x256xi32>
    %267 = arith.cmpi slt, %265, %266 : vector<1x256xi32>
    %268 = arith.andi %263, %267 : vector<1x256xi1>
    %cst_98 = arith.constant 0.000000e+00 : f32
    %269 = vector.shape_cast %268 : vector<1x256xi1> to vector<1x256xi1>
    %270 = vector.broadcast %269 : vector<1x256xi1> to vector<2x256xi1>
    %271 = vector.broadcast %cst_98 : f32 to vector<2x256xf32>
    %272 = arith.select %270, %259, %271 : vector<2x256xi1>, vector<2x256xf32>
    %273 = arith.addf %188, %272 : vector<2x256xf32>
    %cst_99 = arith.constant 0.000000e+00 : f32
    %274 = vector.broadcast %cst_99 : f32 to vector<2x256xf32>
    %c2_100 = arith.constant 2 : index
    %275 = memref.load %arg6[%c2_100] : memref<98xf32, #tpu.memory_space<smem>>
    %c51_101 = arith.constant 51 : index
    %276 = memref.load %arg6[%c51_101] : memref<98xf32, #tpu.memory_space<smem>>
    %c0_102 = arith.constant 0 : index
    %c2_103 = arith.constant 2 : index
    %277 = vector.load %arg9[%c0_102, %c2_103] : memref<4x358xf32, #tpu.memory_space<vmem>>, vector<2x256xf32>
    %278 = vector.broadcast %275 : f32 to vector<2x256xf32>
    %279 = arith.mulf %277, %278 : vector<2x256xf32>
    %280 = arith.addf %274, %279 : vector<2x256xf32>
    %c2_104 = arith.constant 2 : index
    %c2_105 = arith.constant 2 : index
    %281 = vector.load %arg9[%c2_104, %c2_105] : memref<4x358xf32, #tpu.memory_space<vmem>>, vector<2x256xf32>
    %282 = vector.broadcast %276 : f32 to vector<2x256xf32>
    %283 = arith.mulf %281, %282 : vector<2x256xf32>
    %284 = arith.addf %280, %283 : vector<2x256xf32>
    %c9 = arith.constant 9 : index
    %285 = memref.load %arg6[%c9] : memref<98xf32, #tpu.memory_space<smem>>
    %c58 = arith.constant 58 : index
    %286 = memref.load %arg6[%c58] : memref<98xf32, #tpu.memory_space<smem>>
    %c0_106 = arith.constant 0 : index
    %c18 = arith.constant 18 : index
    %287 = vector.load %arg9[%c0_106, %c18] : memref<4x358xf32, #tpu.memory_space<vmem>>, vector<2x256xf32>
    %288 = vector.broadcast %285 : f32 to vector<2x256xf32>
    %289 = arith.mulf %287, %288 : vector<2x256xf32>
    %290 = arith.addf %284, %289 : vector<2x256xf32>
    %c2_107 = arith.constant 2 : index
    %c18_108 = arith.constant 18 : index
    %291 = vector.load %arg9[%c2_107, %c18_108] : memref<4x358xf32, #tpu.memory_space<vmem>>, vector<2x256xf32>
    %292 = vector.broadcast %286 : f32 to vector<2x256xf32>
    %293 = arith.mulf %291, %292 : vector<2x256xf32>
    %294 = arith.addf %290, %293 : vector<2x256xf32>
    %c16_109 = arith.constant 16 : index
    %295 = memref.load %arg6[%c16_109] : memref<98xf32, #tpu.memory_space<smem>>
    %c65_110 = arith.constant 65 : index
    %296 = memref.load %arg6[%c65_110] : memref<98xf32, #tpu.memory_space<smem>>
    %c0_111 = arith.constant 0 : index
    %c34 = arith.constant 34 : index
    %297 = vector.load %arg9[%c0_111, %c34] : memref<4x358xf32, #tpu.memory_space<vmem>>, vector<2x256xf32>
    %298 = vector.broadcast %295 : f32 to vector<2x256xf32>
    %299 = arith.mulf %297, %298 : vector<2x256xf32>
    %300 = arith.addf %294, %299 : vector<2x256xf32>
    %c2_112 = arith.constant 2 : index
    %c34_113 = arith.constant 34 : index
    %301 = vector.load %arg9[%c2_112, %c34_113] : memref<4x358xf32, #tpu.memory_space<vmem>>, vector<2x256xf32>
    %302 = vector.broadcast %296 : f32 to vector<2x256xf32>
    %303 = arith.mulf %301, %302 : vector<2x256xf32>
    %304 = arith.addf %300, %303 : vector<2x256xf32>
    %c23 = arith.constant 23 : index
    %305 = memref.load %arg6[%c23] : memref<98xf32, #tpu.memory_space<smem>>
    %c72 = arith.constant 72 : index
    %306 = memref.load %arg6[%c72] : memref<98xf32, #tpu.memory_space<smem>>
    %c0_114 = arith.constant 0 : index
    %c50_115 = arith.constant 50 : index
    %307 = vector.load %arg9[%c0_114, %c50_115] : memref<4x358xf32, #tpu.memory_space<vmem>>, vector<2x256xf32>
    %308 = vector.broadcast %305 : f32 to vector<2x256xf32>
    %309 = arith.mulf %307, %308 : vector<2x256xf32>
    %310 = arith.addf %304, %309 : vector<2x256xf32>
    %c2_116 = arith.constant 2 : index
    %c50_117 = arith.constant 50 : index
    %311 = vector.load %arg9[%c2_116, %c50_117] : memref<4x358xf32, #tpu.memory_space<vmem>>, vector<2x256xf32>
    %312 = vector.broadcast %306 : f32 to vector<2x256xf32>
    %313 = arith.mulf %311, %312 : vector<2x256xf32>
    %314 = arith.addf %310, %313 : vector<2x256xf32>
    %c30 = arith.constant 30 : index
    %315 = memref.load %arg6[%c30] : memref<98xf32, #tpu.memory_space<smem>>
    %c79 = arith.constant 79 : index
    %316 = memref.load %arg6[%c79] : memref<98xf32, #tpu.memory_space<smem>>
    %c0_118 = arith.constant 0 : index
    %c66 = arith.constant 66 : index
    %317 = vector.load %arg9[%c0_118, %c66] : memref<4x358xf32, #tpu.memory_space<vmem>>, vector<2x256xf32>
    %318 = vector.broadcast %315 : f32 to vector<2x256xf32>
    %319 = arith.mulf %317, %318 : vector<2x256xf32>
    %320 = arith.addf %314, %319 : vector<2x256xf32>
    %c2_119 = arith.constant 2 : index
    %c66_120 = arith.constant 66 : index
    %321 = vector.load %arg9[%c2_119, %c66_120] : memref<4x358xf32, #tpu.memory_space<vmem>>, vector<2x256xf32>
    %322 = vector.broadcast %316 : f32 to vector<2x256xf32>
    %323 = arith.mulf %321, %322 : vector<2x256xf32>
    %324 = arith.addf %320, %323 : vector<2x256xf32>
    %c37 = arith.constant 37 : index
    %325 = memref.load %arg6[%c37] : memref<98xf32, #tpu.memory_space<smem>>
    %c86 = arith.constant 86 : index
    %326 = memref.load %arg6[%c86] : memref<98xf32, #tpu.memory_space<smem>>
    %c0_121 = arith.constant 0 : index
    %c82 = arith.constant 82 : index
    %327 = vector.load %arg9[%c0_121, %c82] : memref<4x358xf32, #tpu.memory_space<vmem>>, vector<2x256xf32>
    %328 = vector.broadcast %325 : f32 to vector<2x256xf32>
    %329 = arith.mulf %327, %328 : vector<2x256xf32>
    %330 = arith.addf %324, %329 : vector<2x256xf32>
    %c2_122 = arith.constant 2 : index
    %c82_123 = arith.constant 82 : index
    %331 = vector.load %arg9[%c2_122, %c82_123] : memref<4x358xf32, #tpu.memory_space<vmem>>, vector<2x256xf32>
    %332 = vector.broadcast %326 : f32 to vector<2x256xf32>
    %333 = arith.mulf %331, %332 : vector<2x256xf32>
    %334 = arith.addf %330, %333 : vector<2x256xf32>
    %c44 = arith.constant 44 : index
    %335 = memref.load %arg6[%c44] : memref<98xf32, #tpu.memory_space<smem>>
    %c93 = arith.constant 93 : index
    %336 = memref.load %arg6[%c93] : memref<98xf32, #tpu.memory_space<smem>>
    %c0_124 = arith.constant 0 : index
    %c98 = arith.constant 98 : index
    %337 = vector.load %arg9[%c0_124, %c98] : memref<4x358xf32, #tpu.memory_space<vmem>>, vector<2x256xf32>
    %338 = vector.broadcast %335 : f32 to vector<2x256xf32>
    %339 = arith.mulf %337, %338 : vector<2x256xf32>
    %340 = arith.addf %334, %339 : vector<2x256xf32>
    %c2_125 = arith.constant 2 : index
    %c98_126 = arith.constant 98 : index
    %341 = vector.load %arg9[%c2_125, %c98_126] : memref<4x358xf32, #tpu.memory_space<vmem>>, vector<2x256xf32>
    %342 = vector.broadcast %336 : f32 to vector<2x256xf32>
    %343 = arith.mulf %341, %342 : vector<2x256xf32>
    %344 = arith.addf %340, %343 : vector<2x256xf32>
    %c-1_i32 = arith.constant -1 : i32
    %345 = vector.broadcast %c-1_i32 : i32 to vector<1x256xi32>
    %346 = arith.addi %102, %345 : vector<1x256xi32>
    %c0_i32_127 = arith.constant 0 : i32
    %347 = vector.broadcast %c0_i32_127 : i32 to vector<1x256xi32>
    %348 = arith.cmpi sge, %346, %347 : vector<1x256xi32>
    %c-1_i32_128 = arith.constant -1 : i32
    %349 = vector.broadcast %c-1_i32_128 : i32 to vector<1x256xi32>
    %350 = arith.addi %102, %349 : vector<1x256xi32>
    %c16_i32_129 = arith.constant 16 : i32
    %351 = vector.broadcast %c16_i32_129 : i32 to vector<1x256xi32>
    %352 = arith.cmpi slt, %350, %351 : vector<1x256xi32>
    %353 = arith.andi %348, %352 : vector<1x256xi1>
    %cst_130 = arith.constant 0.000000e+00 : f32
    %354 = vector.shape_cast %353 : vector<1x256xi1> to vector<1x256xi1>
    %355 = vector.broadcast %354 : vector<1x256xi1> to vector<2x256xi1>
    %356 = vector.broadcast %cst_130 : f32 to vector<2x256xf32>
    %357 = arith.select %355, %344, %356 : vector<2x256xi1>, vector<2x256xf32>
    %358 = arith.addf %273, %357 : vector<2x256xf32>
    %cst_131 = arith.constant 0.000000e+00 : f32
    %359 = vector.broadcast %cst_131 : f32 to vector<2x256xf32>
    %c3 = arith.constant 3 : index
    %360 = memref.load %arg6[%c3] : memref<98xf32, #tpu.memory_space<smem>>
    %c52 = arith.constant 52 : index
    %361 = memref.load %arg6[%c52] : memref<98xf32, #tpu.memory_space<smem>>
    %c0_132 = arith.constant 0 : index
    %c3_133 = arith.constant 3 : index
    %362 = vector.load %arg9[%c0_132, %c3_133] : memref<4x358xf32, #tpu.memory_space<vmem>>, vector<2x256xf32>
    %363 = vector.broadcast %360 : f32 to vector<2x256xf32>
    %364 = arith.mulf %362, %363 : vector<2x256xf32>
    %365 = arith.addf %359, %364 : vector<2x256xf32>
    %c2_134 = arith.constant 2 : index
    %c3_135 = arith.constant 3 : index
    %366 = vector.load %arg9[%c2_134, %c3_135] : memref<4x358xf32, #tpu.memory_space<vmem>>, vector<2x256xf32>
    %367 = vector.broadcast %361 : f32 to vector<2x256xf32>
    %368 = arith.mulf %366, %367 : vector<2x256xf32>
    %369 = arith.addf %365, %368 : vector<2x256xf32>
    %c10 = arith.constant 10 : index
    %370 = memref.load %arg6[%c10] : memref<98xf32, #tpu.memory_space<smem>>
    %c59 = arith.constant 59 : index
    %371 = memref.load %arg6[%c59] : memref<98xf32, #tpu.memory_space<smem>>
    %c0_136 = arith.constant 0 : index
    %c19 = arith.constant 19 : index
    %372 = vector.load %arg9[%c0_136, %c19] : memref<4x358xf32, #tpu.memory_space<vmem>>, vector<2x256xf32>
    %373 = vector.broadcast %370 : f32 to vector<2x256xf32>
    %374 = arith.mulf %372, %373 : vector<2x256xf32>
    %375 = arith.addf %369, %374 : vector<2x256xf32>
    %c2_137 = arith.constant 2 : index
    %c19_138 = arith.constant 19 : index
    %376 = vector.load %arg9[%c2_137, %c19_138] : memref<4x358xf32, #tpu.memory_space<vmem>>, vector<2x256xf32>
    %377 = vector.broadcast %371 : f32 to vector<2x256xf32>
    %378 = arith.mulf %376, %377 : vector<2x256xf32>
    %379 = arith.addf %375, %378 : vector<2x256xf32>
    %c17_139 = arith.constant 17 : index
    %380 = memref.load %arg6[%c17_139] : memref<98xf32, #tpu.memory_space<smem>>
    %c66_140 = arith.constant 66 : index
    %381 = memref.load %arg6[%c66_140] : memref<98xf32, #tpu.memory_space<smem>>
    %c0_141 = arith.constant 0 : index
    %c35_142 = arith.constant 35 : index
    %382 = vector.load %arg9[%c0_141, %c35_142] : memref<4x358xf32, #tpu.memory_space<vmem>>, vector<2x256xf32>
    %383 = vector.broadcast %380 : f32 to vector<2x256xf32>
    %384 = arith.mulf %382, %383 : vector<2x256xf32>
    %385 = arith.addf %379, %384 : vector<2x256xf32>
    %c2_143 = arith.constant 2 : index
    %c35_144 = arith.constant 35 : index
    %386 = vector.load %arg9[%c2_143, %c35_144] : memref<4x358xf32, #tpu.memory_space<vmem>>, vector<2x256xf32>
    %387 = vector.broadcast %381 : f32 to vector<2x256xf32>
    %388 = arith.mulf %386, %387 : vector<2x256xf32>
    %389 = arith.addf %385, %388 : vector<2x256xf32>
    %c24 = arith.constant 24 : index
    %390 = memref.load %arg6[%c24] : memref<98xf32, #tpu.memory_space<smem>>
    %c73 = arith.constant 73 : index
    %391 = memref.load %arg6[%c73] : memref<98xf32, #tpu.memory_space<smem>>
    %c0_145 = arith.constant 0 : index
    %c51_146 = arith.constant 51 : index
    %392 = vector.load %arg9[%c0_145, %c51_146] : memref<4x358xf32, #tpu.memory_space<vmem>>, vector<2x256xf32>
    %393 = vector.broadcast %390 : f32 to vector<2x256xf32>
    %394 = arith.mulf %392, %393 : vector<2x256xf32>
    %395 = arith.addf %389, %394 : vector<2x256xf32>
    %c2_147 = arith.constant 2 : index
    %c51_148 = arith.constant 51 : index
    %396 = vector.load %arg9[%c2_147, %c51_148] : memref<4x358xf32, #tpu.memory_space<vmem>>, vector<2x256xf32>
    %397 = vector.broadcast %391 : f32 to vector<2x256xf32>
    %398 = arith.mulf %396, %397 : vector<2x256xf32>
    %399 = arith.addf %395, %398 : vector<2x256xf32>
    %c31 = arith.constant 31 : index
    %400 = memref.load %arg6[%c31] : memref<98xf32, #tpu.memory_space<smem>>
    %c80_149 = arith.constant 80 : index
    %401 = memref.load %arg6[%c80_149] : memref<98xf32, #tpu.memory_space<smem>>
    %c0_150 = arith.constant 0 : index
    %c67 = arith.constant 67 : index
    %402 = vector.load %arg9[%c0_150, %c67] : memref<4x358xf32, #tpu.memory_space<vmem>>, vector<2x256xf32>
    %403 = vector.broadcast %400 : f32 to vector<2x256xf32>
    %404 = arith.mulf %402, %403 : vector<2x256xf32>
    %405 = arith.addf %399, %404 : vector<2x256xf32>
    %c2_151 = arith.constant 2 : index
    %c67_152 = arith.constant 67 : index
    %406 = vector.load %arg9[%c2_151, %c67_152] : memref<4x358xf32, #tpu.memory_space<vmem>>, vector<2x256xf32>
    %407 = vector.broadcast %401 : f32 to vector<2x256xf32>
    %408 = arith.mulf %406, %407 : vector<2x256xf32>
    %409 = arith.addf %405, %408 : vector<2x256xf32>
    %c38 = arith.constant 38 : index
    %410 = memref.load %arg6[%c38] : memref<98xf32, #tpu.memory_space<smem>>
    %c87 = arith.constant 87 : index
    %411 = memref.load %arg6[%c87] : memref<98xf32, #tpu.memory_space<smem>>
    %c0_153 = arith.constant 0 : index
    %c83 = arith.constant 83 : index
    %412 = vector.load %arg9[%c0_153, %c83] : memref<4x358xf32, #tpu.memory_space<vmem>>, vector<2x256xf32>
    %413 = vector.broadcast %410 : f32 to vector<2x256xf32>
    %414 = arith.mulf %412, %413 : vector<2x256xf32>
    %415 = arith.addf %409, %414 : vector<2x256xf32>
    %c2_154 = arith.constant 2 : index
    %c83_155 = arith.constant 83 : index
    %416 = vector.load %arg9[%c2_154, %c83_155] : memref<4x358xf32, #tpu.memory_space<vmem>>, vector<2x256xf32>
    %417 = vector.broadcast %411 : f32 to vector<2x256xf32>
    %418 = arith.mulf %416, %417 : vector<2x256xf32>
    %419 = arith.addf %415, %418 : vector<2x256xf32>
    %c45 = arith.constant 45 : index
    %420 = memref.load %arg6[%c45] : memref<98xf32, #tpu.memory_space<smem>>
    %c94 = arith.constant 94 : index
    %421 = memref.load %arg6[%c94] : memref<98xf32, #tpu.memory_space<smem>>
    %c0_156 = arith.constant 0 : index
    %c99 = arith.constant 99 : index
    %422 = vector.load %arg9[%c0_156, %c99] : memref<4x358xf32, #tpu.memory_space<vmem>>, vector<2x256xf32>
    %423 = vector.broadcast %420 : f32 to vector<2x256xf32>
    %424 = arith.mulf %422, %423 : vector<2x256xf32>
    %425 = arith.addf %419, %424 : vector<2x256xf32>
    %c2_157 = arith.constant 2 : index
    %c99_158 = arith.constant 99 : index
    %426 = vector.load %arg9[%c2_157, %c99_158] : memref<4x358xf32, #tpu.memory_space<vmem>>, vector<2x256xf32>
    %427 = vector.broadcast %421 : f32 to vector<2x256xf32>
    %428 = arith.mulf %426, %427 : vector<2x256xf32>
    %429 = arith.addf %425, %428 : vector<2x256xf32>
    %430 = arith.addf %358, %429 : vector<2x256xf32>
    %cst_159 = arith.constant 0.000000e+00 : f32
    %431 = vector.broadcast %cst_159 : f32 to vector<2x256xf32>
    %c4 = arith.constant 4 : index
    %432 = memref.load %arg6[%c4] : memref<98xf32, #tpu.memory_space<smem>>
    %c53 = arith.constant 53 : index
    %433 = memref.load %arg6[%c53] : memref<98xf32, #tpu.memory_space<smem>>
    %c0_160 = arith.constant 0 : index
    %c4_161 = arith.constant 4 : index
    %434 = vector.load %arg9[%c0_160, %c4_161] : memref<4x358xf32, #tpu.memory_space<vmem>>, vector<2x256xf32>
    %435 = vector.broadcast %432 : f32 to vector<2x256xf32>
    %436 = arith.mulf %434, %435 : vector<2x256xf32>
    %437 = arith.addf %431, %436 : vector<2x256xf32>
    %c2_162 = arith.constant 2 : index
    %c4_163 = arith.constant 4 : index
    %438 = vector.load %arg9[%c2_162, %c4_163] : memref<4x358xf32, #tpu.memory_space<vmem>>, vector<2x256xf32>
    %439 = vector.broadcast %433 : f32 to vector<2x256xf32>
    %440 = arith.mulf %438, %439 : vector<2x256xf32>
    %441 = arith.addf %437, %440 : vector<2x256xf32>
    %c11 = arith.constant 11 : index
    %442 = memref.load %arg6[%c11] : memref<98xf32, #tpu.memory_space<smem>>
    %c60 = arith.constant 60 : index
    %443 = memref.load %arg6[%c60] : memref<98xf32, #tpu.memory_space<smem>>
    %c0_164 = arith.constant 0 : index
    %c20 = arith.constant 20 : index
    %444 = vector.load %arg9[%c0_164, %c20] : memref<4x358xf32, #tpu.memory_space<vmem>>, vector<2x256xf32>
    %445 = vector.broadcast %442 : f32 to vector<2x256xf32>
    %446 = arith.mulf %444, %445 : vector<2x256xf32>
    %447 = arith.addf %441, %446 : vector<2x256xf32>
    %c2_165 = arith.constant 2 : index
    %c20_166 = arith.constant 20 : index
    %448 = vector.load %arg9[%c2_165, %c20_166] : memref<4x358xf32, #tpu.memory_space<vmem>>, vector<2x256xf32>
    %449 = vector.broadcast %443 : f32 to vector<2x256xf32>
    %450 = arith.mulf %448, %449 : vector<2x256xf32>
    %451 = arith.addf %447, %450 : vector<2x256xf32>
    %c18_167 = arith.constant 18 : index
    %452 = memref.load %arg6[%c18_167] : memref<98xf32, #tpu.memory_space<smem>>
    %c67_168 = arith.constant 67 : index
    %453 = memref.load %arg6[%c67_168] : memref<98xf32, #tpu.memory_space<smem>>
    %c0_169 = arith.constant 0 : index
    %c36_170 = arith.constant 36 : index
    %454 = vector.load %arg9[%c0_169, %c36_170] : memref<4x358xf32, #tpu.memory_space<vmem>>, vector<2x256xf32>
    %455 = vector.broadcast %452 : f32 to vector<2x256xf32>
    %456 = arith.mulf %454, %455 : vector<2x256xf32>
    %457 = arith.addf %451, %456 : vector<2x256xf32>
    %c2_171 = arith.constant 2 : index
    %c36_172 = arith.constant 36 : index
    %458 = vector.load %arg9[%c2_171, %c36_172] : memref<4x358xf32, #tpu.memory_space<vmem>>, vector<2x256xf32>
    %459 = vector.broadcast %453 : f32 to vector<2x256xf32>
    %460 = arith.mulf %458, %459 : vector<2x256xf32>
    %461 = arith.addf %457, %460 : vector<2x256xf32>
    %c25 = arith.constant 25 : index
    %462 = memref.load %arg6[%c25] : memref<98xf32, #tpu.memory_space<smem>>
    %c74 = arith.constant 74 : index
    %463 = memref.load %arg6[%c74] : memref<98xf32, #tpu.memory_space<smem>>
    %c0_173 = arith.constant 0 : index
    %c52_174 = arith.constant 52 : index
    %464 = vector.load %arg9[%c0_173, %c52_174] : memref<4x358xf32, #tpu.memory_space<vmem>>, vector<2x256xf32>
    %465 = vector.broadcast %462 : f32 to vector<2x256xf32>
    %466 = arith.mulf %464, %465 : vector<2x256xf32>
    %467 = arith.addf %461, %466 : vector<2x256xf32>
    %c2_175 = arith.constant 2 : index
    %c52_176 = arith.constant 52 : index
    %468 = vector.load %arg9[%c2_175, %c52_176] : memref<4x358xf32, #tpu.memory_space<vmem>>, vector<2x256xf32>
    %469 = vector.broadcast %463 : f32 to vector<2x256xf32>
    %470 = arith.mulf %468, %469 : vector<2x256xf32>
    %471 = arith.addf %467, %470 : vector<2x256xf32>
    %c32_177 = arith.constant 32 : index
    %472 = memref.load %arg6[%c32_177] : memref<98xf32, #tpu.memory_space<smem>>
    %c81_178 = arith.constant 81 : index
    %473 = memref.load %arg6[%c81_178] : memref<98xf32, #tpu.memory_space<smem>>
    %c0_179 = arith.constant 0 : index
    %c68 = arith.constant 68 : index
    %474 = vector.load %arg9[%c0_179, %c68] : memref<4x358xf32, #tpu.memory_space<vmem>>, vector<2x256xf32>
    %475 = vector.broadcast %472 : f32 to vector<2x256xf32>
    %476 = arith.mulf %474, %475 : vector<2x256xf32>
    %477 = arith.addf %471, %476 : vector<2x256xf32>
    %c2_180 = arith.constant 2 : index
    %c68_181 = arith.constant 68 : index
    %478 = vector.load %arg9[%c2_180, %c68_181] : memref<4x358xf32, #tpu.memory_space<vmem>>, vector<2x256xf32>
    %479 = vector.broadcast %473 : f32 to vector<2x256xf32>
    %480 = arith.mulf %478, %479 : vector<2x256xf32>
    %481 = arith.addf %477, %480 : vector<2x256xf32>
    %c39 = arith.constant 39 : index
    %482 = memref.load %arg6[%c39] : memref<98xf32, #tpu.memory_space<smem>>
    %c88 = arith.constant 88 : index
    %483 = memref.load %arg6[%c88] : memref<98xf32, #tpu.memory_space<smem>>
    %c0_182 = arith.constant 0 : index
    %c84_183 = arith.constant 84 : index
    %484 = vector.load %arg9[%c0_182, %c84_183] : memref<4x358xf32, #tpu.memory_space<vmem>>, vector<2x256xf32>
    %485 = vector.broadcast %482 : f32 to vector<2x256xf32>
    %486 = arith.mulf %484, %485 : vector<2x256xf32>
    %487 = arith.addf %481, %486 : vector<2x256xf32>
    %c2_184 = arith.constant 2 : index
    %c84_185 = arith.constant 84 : index
    %488 = vector.load %arg9[%c2_184, %c84_185] : memref<4x358xf32, #tpu.memory_space<vmem>>, vector<2x256xf32>
    %489 = vector.broadcast %483 : f32 to vector<2x256xf32>
    %490 = arith.mulf %488, %489 : vector<2x256xf32>
    %491 = arith.addf %487, %490 : vector<2x256xf32>
    %c46 = arith.constant 46 : index
    %492 = memref.load %arg6[%c46] : memref<98xf32, #tpu.memory_space<smem>>
    %c95 = arith.constant 95 : index
    %493 = memref.load %arg6[%c95] : memref<98xf32, #tpu.memory_space<smem>>
    %c0_186 = arith.constant 0 : index
    %c100 = arith.constant 100 : index
    %494 = vector.load %arg9[%c0_186, %c100] : memref<4x358xf32, #tpu.memory_space<vmem>>, vector<2x256xf32>
    %495 = vector.broadcast %492 : f32 to vector<2x256xf32>
    %496 = arith.mulf %494, %495 : vector<2x256xf32>
    %497 = arith.addf %491, %496 : vector<2x256xf32>
    %c2_187 = arith.constant 2 : index
    %c100_188 = arith.constant 100 : index
    %498 = vector.load %arg9[%c2_187, %c100_188] : memref<4x358xf32, #tpu.memory_space<vmem>>, vector<2x256xf32>
    %499 = vector.broadcast %493 : f32 to vector<2x256xf32>
    %500 = arith.mulf %498, %499 : vector<2x256xf32>
    %501 = arith.addf %497, %500 : vector<2x256xf32>
    %c1_i32_189 = arith.constant 1 : i32
    %502 = vector.broadcast %c1_i32_189 : i32 to vector<1x256xi32>
    %503 = arith.addi %102, %502 : vector<1x256xi32>
    %c0_i32_190 = arith.constant 0 : i32
    %504 = vector.broadcast %c0_i32_190 : i32 to vector<1x256xi32>
    %505 = arith.cmpi sge, %503, %504 : vector<1x256xi32>
    %c1_i32_191 = arith.constant 1 : i32
    %506 = vector.broadcast %c1_i32_191 : i32 to vector<1x256xi32>
    %507 = arith.addi %102, %506 : vector<1x256xi32>
    %c16_i32_192 = arith.constant 16 : i32
    %508 = vector.broadcast %c16_i32_192 : i32 to vector<1x256xi32>
    %509 = arith.cmpi slt, %507, %508 : vector<1x256xi32>
    %510 = arith.andi %505, %509 : vector<1x256xi1>
    %cst_193 = arith.constant 0.000000e+00 : f32
    %511 = vector.shape_cast %510 : vector<1x256xi1> to vector<1x256xi1>
    %512 = vector.broadcast %511 : vector<1x256xi1> to vector<2x256xi1>
    %513 = vector.broadcast %cst_193 : f32 to vector<2x256xf32>
    %514 = arith.select %512, %501, %513 : vector<2x256xi1>, vector<2x256xf32>
    %515 = arith.addf %430, %514 : vector<2x256xf32>
    %cst_194 = arith.constant 0.000000e+00 : f32
    %516 = vector.broadcast %cst_194 : f32 to vector<2x256xf32>
    %c5 = arith.constant 5 : index
    %517 = memref.load %arg6[%c5] : memref<98xf32, #tpu.memory_space<smem>>
    %c54 = arith.constant 54 : index
    %518 = memref.load %arg6[%c54] : memref<98xf32, #tpu.memory_space<smem>>
    %c0_195 = arith.constant 0 : index
    %c5_196 = arith.constant 5 : index
    %519 = vector.load %arg9[%c0_195, %c5_196] : memref<4x358xf32, #tpu.memory_space<vmem>>, vector<2x256xf32>
    %520 = vector.broadcast %517 : f32 to vector<2x256xf32>
    %521 = arith.mulf %519, %520 : vector<2x256xf32>
    %522 = arith.addf %516, %521 : vector<2x256xf32>
    %c2_197 = arith.constant 2 : index
    %c5_198 = arith.constant 5 : index
    %523 = vector.load %arg9[%c2_197, %c5_198] : memref<4x358xf32, #tpu.memory_space<vmem>>, vector<2x256xf32>
    %524 = vector.broadcast %518 : f32 to vector<2x256xf32>
    %525 = arith.mulf %523, %524 : vector<2x256xf32>
    %526 = arith.addf %522, %525 : vector<2x256xf32>
    %c12 = arith.constant 12 : index
    %527 = memref.load %arg6[%c12] : memref<98xf32, #tpu.memory_space<smem>>
    %c61 = arith.constant 61 : index
    %528 = memref.load %arg6[%c61] : memref<98xf32, #tpu.memory_space<smem>>
    %c0_199 = arith.constant 0 : index
    %c21_200 = arith.constant 21 : index
    %529 = vector.load %arg9[%c0_199, %c21_200] : memref<4x358xf32, #tpu.memory_space<vmem>>, vector<2x256xf32>
    %530 = vector.broadcast %527 : f32 to vector<2x256xf32>
    %531 = arith.mulf %529, %530 : vector<2x256xf32>
    %532 = arith.addf %526, %531 : vector<2x256xf32>
    %c2_201 = arith.constant 2 : index
    %c21_202 = arith.constant 21 : index
    %533 = vector.load %arg9[%c2_201, %c21_202] : memref<4x358xf32, #tpu.memory_space<vmem>>, vector<2x256xf32>
    %534 = vector.broadcast %528 : f32 to vector<2x256xf32>
    %535 = arith.mulf %533, %534 : vector<2x256xf32>
    %536 = arith.addf %532, %535 : vector<2x256xf32>
    %c19_203 = arith.constant 19 : index
    %537 = memref.load %arg6[%c19_203] : memref<98xf32, #tpu.memory_space<smem>>
    %c68_204 = arith.constant 68 : index
    %538 = memref.load %arg6[%c68_204] : memref<98xf32, #tpu.memory_space<smem>>
    %c0_205 = arith.constant 0 : index
    %c37_206 = arith.constant 37 : index
    %539 = vector.load %arg9[%c0_205, %c37_206] : memref<4x358xf32, #tpu.memory_space<vmem>>, vector<2x256xf32>
    %540 = vector.broadcast %537 : f32 to vector<2x256xf32>
    %541 = arith.mulf %539, %540 : vector<2x256xf32>
    %542 = arith.addf %536, %541 : vector<2x256xf32>
    %c2_207 = arith.constant 2 : index
    %c37_208 = arith.constant 37 : index
    %543 = vector.load %arg9[%c2_207, %c37_208] : memref<4x358xf32, #tpu.memory_space<vmem>>, vector<2x256xf32>
    %544 = vector.broadcast %538 : f32 to vector<2x256xf32>
    %545 = arith.mulf %543, %544 : vector<2x256xf32>
    %546 = arith.addf %542, %545 : vector<2x256xf32>
    %c26 = arith.constant 26 : index
    %547 = memref.load %arg6[%c26] : memref<98xf32, #tpu.memory_space<smem>>
    %c75 = arith.constant 75 : index
    %548 = memref.load %arg6[%c75] : memref<98xf32, #tpu.memory_space<smem>>
    %c0_209 = arith.constant 0 : index
    %c53_210 = arith.constant 53 : index
    %549 = vector.load %arg9[%c0_209, %c53_210] : memref<4x358xf32, #tpu.memory_space<vmem>>, vector<2x256xf32>
    %550 = vector.broadcast %547 : f32 to vector<2x256xf32>
    %551 = arith.mulf %549, %550 : vector<2x256xf32>
    %552 = arith.addf %546, %551 : vector<2x256xf32>
    %c2_211 = arith.constant 2 : index
    %c53_212 = arith.constant 53 : index
    %553 = vector.load %arg9[%c2_211, %c53_212] : memref<4x358xf32, #tpu.memory_space<vmem>>, vector<2x256xf32>
    %554 = vector.broadcast %548 : f32 to vector<2x256xf32>
    %555 = arith.mulf %553, %554 : vector<2x256xf32>
    %556 = arith.addf %552, %555 : vector<2x256xf32>
    %c33_213 = arith.constant 33 : index
    %557 = memref.load %arg6[%c33_213] : memref<98xf32, #tpu.memory_space<smem>>
    %c82_214 = arith.constant 82 : index
    %558 = memref.load %arg6[%c82_214] : memref<98xf32, #tpu.memory_space<smem>>
    %c0_215 = arith.constant 0 : index
    %c69 = arith.constant 69 : index
    %559 = vector.load %arg9[%c0_215, %c69] : memref<4x358xf32, #tpu.memory_space<vmem>>, vector<2x256xf32>
    %560 = vector.broadcast %557 : f32 to vector<2x256xf32>
    %561 = arith.mulf %559, %560 : vector<2x256xf32>
    %562 = arith.addf %556, %561 : vector<2x256xf32>
    %c2_216 = arith.constant 2 : index
    %c69_217 = arith.constant 69 : index
    %563 = vector.load %arg9[%c2_216, %c69_217] : memref<4x358xf32, #tpu.memory_space<vmem>>, vector<2x256xf32>
    %564 = vector.broadcast %558 : f32 to vector<2x256xf32>
    %565 = arith.mulf %563, %564 : vector<2x256xf32>
    %566 = arith.addf %562, %565 : vector<2x256xf32>
    %c40 = arith.constant 40 : index
    %567 = memref.load %arg6[%c40] : memref<98xf32, #tpu.memory_space<smem>>
    %c89 = arith.constant 89 : index
    %568 = memref.load %arg6[%c89] : memref<98xf32, #tpu.memory_space<smem>>
    %c0_218 = arith.constant 0 : index
    %c85_219 = arith.constant 85 : index
    %569 = vector.load %arg9[%c0_218, %c85_219] : memref<4x358xf32, #tpu.memory_space<vmem>>, vector<2x256xf32>
    %570 = vector.broadcast %567 : f32 to vector<2x256xf32>
    %571 = arith.mulf %569, %570 : vector<2x256xf32>
    %572 = arith.addf %566, %571 : vector<2x256xf32>
    %c2_220 = arith.constant 2 : index
    %c85_221 = arith.constant 85 : index
    %573 = vector.load %arg9[%c2_220, %c85_221] : memref<4x358xf32, #tpu.memory_space<vmem>>, vector<2x256xf32>
    %574 = vector.broadcast %568 : f32 to vector<2x256xf32>
    %575 = arith.mulf %573, %574 : vector<2x256xf32>
    %576 = arith.addf %572, %575 : vector<2x256xf32>
    %c47 = arith.constant 47 : index
    %577 = memref.load %arg6[%c47] : memref<98xf32, #tpu.memory_space<smem>>
    %c96_222 = arith.constant 96 : index
    %578 = memref.load %arg6[%c96_222] : memref<98xf32, #tpu.memory_space<smem>>
    %c0_223 = arith.constant 0 : index
    %c101 = arith.constant 101 : index
    %579 = vector.load %arg9[%c0_223, %c101] : memref<4x358xf32, #tpu.memory_space<vmem>>, vector<2x256xf32>
    %580 = vector.broadcast %577 : f32 to vector<2x256xf32>
    %581 = arith.mulf %579, %580 : vector<2x256xf32>
    %582 = arith.addf %576, %581 : vector<2x256xf32>
    %c2_224 = arith.constant 2 : index
    %c101_225 = arith.constant 101 : index
    %583 = vector.load %arg9[%c2_224, %c101_225] : memref<4x358xf32, #tpu.memory_space<vmem>>, vector<2x256xf32>
    %584 = vector.broadcast %578 : f32 to vector<2x256xf32>
    %585 = arith.mulf %583, %584 : vector<2x256xf32>
    %586 = arith.addf %582, %585 : vector<2x256xf32>
    %c2_i32 = arith.constant 2 : i32
    %587 = vector.broadcast %c2_i32 : i32 to vector<1x256xi32>
    %588 = arith.addi %102, %587 : vector<1x256xi32>
    %c0_i32_226 = arith.constant 0 : i32
    %589 = vector.broadcast %c0_i32_226 : i32 to vector<1x256xi32>
    %590 = arith.cmpi sge, %588, %589 : vector<1x256xi32>
    %c2_i32_227 = arith.constant 2 : i32
    %591 = vector.broadcast %c2_i32_227 : i32 to vector<1x256xi32>
    %592 = arith.addi %102, %591 : vector<1x256xi32>
    %c16_i32_228 = arith.constant 16 : i32
    %593 = vector.broadcast %c16_i32_228 : i32 to vector<1x256xi32>
    %594 = arith.cmpi slt, %592, %593 : vector<1x256xi32>
    %595 = arith.andi %590, %594 : vector<1x256xi1>
    %cst_229 = arith.constant 0.000000e+00 : f32
    %596 = vector.shape_cast %595 : vector<1x256xi1> to vector<1x256xi1>
    %597 = vector.broadcast %596 : vector<1x256xi1> to vector<2x256xi1>
    %598 = vector.broadcast %cst_229 : f32 to vector<2x256xf32>
    %599 = arith.select %597, %586, %598 : vector<2x256xi1>, vector<2x256xf32>
    %600 = arith.addf %515, %599 : vector<2x256xf32>
    %cst_230 = arith.constant 0.000000e+00 : f32
    %601 = vector.broadcast %cst_230 : f32 to vector<2x256xf32>
    %c6 = arith.constant 6 : index
    %602 = memref.load %arg6[%c6] : memref<98xf32, #tpu.memory_space<smem>>
    %c55 = arith.constant 55 : index
    %603 = memref.load %arg6[%c55] : memref<98xf32, #tpu.memory_space<smem>>
    %c0_231 = arith.constant 0 : index
    %c6_232 = arith.constant 6 : index
    %604 = vector.load %arg9[%c0_231, %c6_232] : memref<4x358xf32, #tpu.memory_space<vmem>>, vector<2x256xf32>
    %605 = vector.broadcast %602 : f32 to vector<2x256xf32>
    %606 = arith.mulf %604, %605 : vector<2x256xf32>
    %607 = arith.addf %601, %606 : vector<2x256xf32>
    %c2_233 = arith.constant 2 : index
    %c6_234 = arith.constant 6 : index
    %608 = vector.load %arg9[%c2_233, %c6_234] : memref<4x358xf32, #tpu.memory_space<vmem>>, vector<2x256xf32>
    %609 = vector.broadcast %603 : f32 to vector<2x256xf32>
    %610 = arith.mulf %608, %609 : vector<2x256xf32>
    %611 = arith.addf %607, %610 : vector<2x256xf32>
    %c13 = arith.constant 13 : index
    %612 = memref.load %arg6[%c13] : memref<98xf32, #tpu.memory_space<smem>>
    %c62 = arith.constant 62 : index
    %613 = memref.load %arg6[%c62] : memref<98xf32, #tpu.memory_space<smem>>
    %c0_235 = arith.constant 0 : index
    %c22_236 = arith.constant 22 : index
    %614 = vector.load %arg9[%c0_235, %c22_236] : memref<4x358xf32, #tpu.memory_space<vmem>>, vector<2x256xf32>
    %615 = vector.broadcast %612 : f32 to vector<2x256xf32>
    %616 = arith.mulf %614, %615 : vector<2x256xf32>
    %617 = arith.addf %611, %616 : vector<2x256xf32>
    %c2_237 = arith.constant 2 : index
    %c22_238 = arith.constant 22 : index
    %618 = vector.load %arg9[%c2_237, %c22_238] : memref<4x358xf32, #tpu.memory_space<vmem>>, vector<2x256xf32>
    %619 = vector.broadcast %613 : f32 to vector<2x256xf32>
    %620 = arith.mulf %618, %619 : vector<2x256xf32>
    %621 = arith.addf %617, %620 : vector<2x256xf32>
    %c20_239 = arith.constant 20 : index
    %622 = memref.load %arg6[%c20_239] : memref<98xf32, #tpu.memory_space<smem>>
    %c69_240 = arith.constant 69 : index
    %623 = memref.load %arg6[%c69_240] : memref<98xf32, #tpu.memory_space<smem>>
    %c0_241 = arith.constant 0 : index
    %c38_242 = arith.constant 38 : index
    %624 = vector.load %arg9[%c0_241, %c38_242] : memref<4x358xf32, #tpu.memory_space<vmem>>, vector<2x256xf32>
    %625 = vector.broadcast %622 : f32 to vector<2x256xf32>
    %626 = arith.mulf %624, %625 : vector<2x256xf32>
    %627 = arith.addf %621, %626 : vector<2x256xf32>
    %c2_243 = arith.constant 2 : index
    %c38_244 = arith.constant 38 : index
    %628 = vector.load %arg9[%c2_243, %c38_244] : memref<4x358xf32, #tpu.memory_space<vmem>>, vector<2x256xf32>
    %629 = vector.broadcast %623 : f32 to vector<2x256xf32>
    %630 = arith.mulf %628, %629 : vector<2x256xf32>
    %631 = arith.addf %627, %630 : vector<2x256xf32>
    %c27 = arith.constant 27 : index
    %632 = memref.load %arg6[%c27] : memref<98xf32, #tpu.memory_space<smem>>
    %c76 = arith.constant 76 : index
    %633 = memref.load %arg6[%c76] : memref<98xf32, #tpu.memory_space<smem>>
    %c0_245 = arith.constant 0 : index
    %c54_246 = arith.constant 54 : index
    %634 = vector.load %arg9[%c0_245, %c54_246] : memref<4x358xf32, #tpu.memory_space<vmem>>, vector<2x256xf32>
    %635 = vector.broadcast %632 : f32 to vector<2x256xf32>
    %636 = arith.mulf %634, %635 : vector<2x256xf32>
    %637 = arith.addf %631, %636 : vector<2x256xf32>
    %c2_247 = arith.constant 2 : index
    %c54_248 = arith.constant 54 : index
    %638 = vector.load %arg9[%c2_247, %c54_248] : memref<4x358xf32, #tpu.memory_space<vmem>>, vector<2x256xf32>
    %639 = vector.broadcast %633 : f32 to vector<2x256xf32>
    %640 = arith.mulf %638, %639 : vector<2x256xf32>
    %641 = arith.addf %637, %640 : vector<2x256xf32>
    %c34_249 = arith.constant 34 : index
    %642 = memref.load %arg6[%c34_249] : memref<98xf32, #tpu.memory_space<smem>>
    %c83_250 = arith.constant 83 : index
    %643 = memref.load %arg6[%c83_250] : memref<98xf32, #tpu.memory_space<smem>>
    %c0_251 = arith.constant 0 : index
    %c70_252 = arith.constant 70 : index
    %644 = vector.load %arg9[%c0_251, %c70_252] : memref<4x358xf32, #tpu.memory_space<vmem>>, vector<2x256xf32>
    %645 = vector.broadcast %642 : f32 to vector<2x256xf32>
    %646 = arith.mulf %644, %645 : vector<2x256xf32>
    %647 = arith.addf %641, %646 : vector<2x256xf32>
    %c2_253 = arith.constant 2 : index
    %c70_254 = arith.constant 70 : index
    %648 = vector.load %arg9[%c2_253, %c70_254] : memref<4x358xf32, #tpu.memory_space<vmem>>, vector<2x256xf32>
    %649 = vector.broadcast %643 : f32 to vector<2x256xf32>
    %650 = arith.mulf %648, %649 : vector<2x256xf32>
    %651 = arith.addf %647, %650 : vector<2x256xf32>
    %c41 = arith.constant 41 : index
    %652 = memref.load %arg6[%c41] : memref<98xf32, #tpu.memory_space<smem>>
    %c90 = arith.constant 90 : index
    %653 = memref.load %arg6[%c90] : memref<98xf32, #tpu.memory_space<smem>>
    %c0_255 = arith.constant 0 : index
    %c86_256 = arith.constant 86 : index
    %654 = vector.load %arg9[%c0_255, %c86_256] : memref<4x358xf32, #tpu.memory_space<vmem>>, vector<2x256xf32>
    %655 = vector.broadcast %652 : f32 to vector<2x256xf32>
    %656 = arith.mulf %654, %655 : vector<2x256xf32>
    %657 = arith.addf %651, %656 : vector<2x256xf32>
    %c2_257 = arith.constant 2 : index
    %c86_258 = arith.constant 86 : index
    %658 = vector.load %arg9[%c2_257, %c86_258] : memref<4x358xf32, #tpu.memory_space<vmem>>, vector<2x256xf32>
    %659 = vector.broadcast %653 : f32 to vector<2x256xf32>
    %660 = arith.mulf %658, %659 : vector<2x256xf32>
    %661 = arith.addf %657, %660 : vector<2x256xf32>
    %c48_259 = arith.constant 48 : index
    %662 = memref.load %arg6[%c48_259] : memref<98xf32, #tpu.memory_space<smem>>
    %c97_260 = arith.constant 97 : index
    %663 = memref.load %arg6[%c97_260] : memref<98xf32, #tpu.memory_space<smem>>
    %c0_261 = arith.constant 0 : index
    %c102 = arith.constant 102 : index
    %664 = vector.load %arg9[%c0_261, %c102] : memref<4x358xf32, #tpu.memory_space<vmem>>, vector<2x256xf32>
    %665 = vector.broadcast %662 : f32 to vector<2x256xf32>
    %666 = arith.mulf %664, %665 : vector<2x256xf32>
    %667 = arith.addf %661, %666 : vector<2x256xf32>
    %c2_262 = arith.constant 2 : index
    %c102_263 = arith.constant 102 : index
    %668 = vector.load %arg9[%c2_262, %c102_263] : memref<4x358xf32, #tpu.memory_space<vmem>>, vector<2x256xf32>
    %669 = vector.broadcast %663 : f32 to vector<2x256xf32>
    %670 = arith.mulf %668, %669 : vector<2x256xf32>
    %671 = arith.addf %667, %670 : vector<2x256xf32>
    %c3_i32 = arith.constant 3 : i32
    %672 = vector.broadcast %c3_i32 : i32 to vector<1x256xi32>
    %673 = arith.addi %102, %672 : vector<1x256xi32>
    %c0_i32_264 = arith.constant 0 : i32
    %674 = vector.broadcast %c0_i32_264 : i32 to vector<1x256xi32>
    %675 = arith.cmpi sge, %673, %674 : vector<1x256xi32>
    %c3_i32_265 = arith.constant 3 : i32
    %676 = vector.broadcast %c3_i32_265 : i32 to vector<1x256xi32>
    %677 = arith.addi %102, %676 : vector<1x256xi32>
    %c16_i32_266 = arith.constant 16 : i32
    %678 = vector.broadcast %c16_i32_266 : i32 to vector<1x256xi32>
    %679 = arith.cmpi slt, %677, %678 : vector<1x256xi32>
    %680 = arith.andi %675, %679 : vector<1x256xi1>
    %cst_267 = arith.constant 0.000000e+00 : f32
    %681 = vector.shape_cast %680 : vector<1x256xi1> to vector<1x256xi1>
    %682 = vector.broadcast %681 : vector<1x256xi1> to vector<2x256xi1>
    %683 = vector.broadcast %cst_267 : f32 to vector<2x256xf32>
    %684 = arith.select %682, %671, %683 : vector<2x256xi1>, vector<2x256xf32>
    %685 = arith.addf %600, %684 : vector<2x256xf32>
    %c0_268 = arith.constant 0 : index
    %686 = memref.load %arg7[%c0_268] : memref<2xf32, #tpu.memory_space<smem>>
    %687 = vector.broadcast %686 : f32 to vector<2x256xf32>
    %688 = arith.mulf %685, %687 : vector<2x256xf32>
    %c1_269 = arith.constant 1 : index
    %689 = memref.load %arg7[%c1_269] : memref<2xf32, #tpu.memory_space<smem>>
    %690 = vector.broadcast %689 : f32 to vector<2x256xf32>
    %691 = arith.addf %688, %690 : vector<2x256xf32>
    %cst_270 = arith.constant 0.000000e+00 : f32
    %692 = vector.broadcast %cst_270 : f32 to vector<2x256xf32>
    %693 = arith.subf %692, %691 : vector<2x256xf32>
    %694 = arith.negf %693 : vector<2x256xf32>
    %695 = math.exp %694 : vector<2x256xf32>
    %cst_271 = arith.constant 1.000000e+00 : f32
    %696 = vector.broadcast %cst_271 : f32 to vector<2x256xf32>
    %697 = arith.addf %696, %695 : vector<2x256xf32>
    %698 = arith.divf %696, %697 : vector<2x256xf32>
    %699 = vector.shape_cast %698 : vector<2x256xf32> to vector<2x1x256xf32>
    %700 = vector.broadcast %699 : vector<2x1x256xf32> to vector<2x32x256xf32>
    %701 = arith.mulf %76, %700 : vector<2x32x256xf32>
    %c0_272 = arith.constant 0 : index
    %c0_273 = arith.constant 0 : index
    %c0_274 = arith.constant 0 : index
    %702 = vector.load %arg8[%c0_272, %c0_273, %c0_274] : memref<2x32x256xf32, #tpu.memory_space<vmem>>, vector<2x32x256xf32>
    tpu.vector_store %arg8[%c0_272, %c0_273, %c0_274], %701 {strides = array<i32>} : memref<2x32x256xf32, #tpu.memory_space<vmem>>, vector<2x32x256xf32>,
    return
  }
  func.func @transform_0(%arg0: i32) -> (i32, i32, i32) {
    %c0_i32 = arith.constant 0 : i32
    %c0_i32_0 = arith.constant 0 : i32
    %c0_i32_1 = arith.constant 0 : i32
    return %arg0, %c0_i32, %c0_i32_0 : i32, i32, i32
  }
  func.func @transform_1(%arg0: i32) -> (i32, i32) {
    %c0_i32 = arith.constant 0 : i32
    %c0_i32_0 = arith.constant 0 : i32
    %c0_i32_1 = arith.constant 0 : i32
    return %c0_i32, %c0_i32_0 : i32, i32
  }
  func.func @transform_2(%arg0: i32) -> (i32, i32) {
    %c0_i32 = arith.constant 0 : i32
    %c0_i32_0 = arith.constant 0 : i32
    %c0_i32_1 = arith.constant 0 : i32
    return %c0_i32, %c0_i32_0 : i32, i32
  }
  func.func @transform_3(%arg0: i32) -> (i32, i32) {
    %c0_i32 = arith.constant 0 : i32
    %c0_i32_0 = arith.constant 0 : i32
    %c0_i32_1 = arith.constant 0 : i32
    return %c0_i32, %c0_i32_0 : i32, i32
  }
  func.func @transform_4(%arg0: i32) -> i32 {
    %c0_i32 = arith.constant 0 : i32
    %c0_i32_0 = arith.constant 0 : i32
    return %c0_i32 : i32
  }
  func.func @transform_5(%arg0: i32) -> i32 {
    %c0_i32 = arith.constant 0 : i32
    %c0_i32_0 = arith.constant 0 : i32
    return %c0_i32 : i32
  }
  func.func @transform_6(%arg0: i32) -> i32 {
    %c0_i32 = arith.constant 0 : i32
    %c0_i32_0 = arith.constant 0 : i32
    return %c0_i32 : i32
  }
  func.func @transform_7(%arg0: i32) -> (i32, i32, i32) {
    %c0_i32 = arith.constant 0 : i32
    %c0_i32_0 = arith.constant 0 : i32
    %c0_i32_1 = arith.constant 0 : i32
    return %arg0, %c0_i32, %c0_i32_0 : i32, i32, i32
  }
}

</mosaic_0001>

<bundles_post_ra>
// kernel: tpu_custom_call.1
= control target key start
LH: loop header
LB: loop body
LE: loop exit
PB: predicated region body
PF: predicated region fallthrough
CT: control target
= control target key end

     0   :  { %s6138_s0 = inlined_call_operand.hbm [shape: f32[4,32,256], index: 0, kind: input, shape index: {}]   ;;  %s6139_s1 = inlined_call_operand.vmem [shape: f32[32,2], index: 1, kind: input, shape index: {}]   ;;  %s6140_s2 = inlined_call_operand.vmem [shape: f32[32,2], index: 2, kind: input, shape index: {}]   ;;  %s6141_s3 = inlined_call_operand.vmem [shape: f32[32,1], index: 3, kind: input, shape index: {}]   ;;  %s6142_s4 = inlined_call_operand.vmem [shape: f32[2], index: 4, kind: input, shape index: {}]   ;;  %s6143_s5 = inlined_call_operand.vmem [shape: f32[98], index: 5, kind: input, shape index: {}]   ;;  %s6144_s6 = inlined_call_operand.vmem [shape: f32[2], index: 6, kind: input, shape index: {}]   ;;  %s6145_s7 = inlined_call_operand.hbm [shape: f32[4,32,256], index: 7, kind: output, shape index: {}]  }
   0x1   :  { %6347 = sst [smem:[#allocation127_spill]] %s6138_s0 }
   0x2   :  { %6348 = sst [smem:[#allocation128_spill]] %s6139_s1 }
   0x3   :  { %6349 = sst [smem:[#allocation129_spill]] %s6140_s2 }
   0x4   :  { %6350 = sst [smem:[#allocation130_spill]] %s6141_s3 }
   0x5   :  { %6351 = sst [smem:[#allocation131_spill]] %s6142_s4 }
   0x6   :  { %6352 = sst [smem:[#allocation132_spill]] %s6143_s5 }
   0x7   :  { %6353 = sst [smem:[#allocation133_spill]] %s6144_s6 }
   0x8   :  { %6354 = sst [smem:[#allocation134_spill]] %s6145_s7 }
   0x9   :  { %12 = vsyncpa [#allocation4], 0 }
   0xa   :  { %14 = vsyncpa [#allocation4 + $0x1], 0 }
   0xb   :  { %15 = vsyncpa [#allocation6], 0 }
   0xc   :  { %16 = vsyncpa [#allocation9], 0 }
   0xd   :  { %17 = vsyncpa [#allocation5], 0 }
   0xe   :  { %19 = vsyncpa [#allocation5 + $0x1], 0  ;;  %s3730_s24 = smov 0   ;;  %s3732_s25 = smov 0  }
   0xf   :  { %s3734_s26 = smov 0   ;;  %s3736_s27 = smov 0  }
  0x10 LB: > { %6355 = sst [smem:[#allocation16_spill]] %s3651_s24  ;;  %s3751_s28 = sadd.s32 4294967295, %s3663_s27   ;;  %s3663_s27 = sphi %s3736_s27, %s6725_s27   ;;  %s3659_s26 = sphi %s3734_s26, %s6728_s26   ;;  %s3655_s25 = sphi %s3732_s25, %s6727_s25   ;;  %s3651_s24 = sphi %s3730_s24, %s6726_s24  }
  0x11   : > { %6356 = sst [smem:[#allocation17_spill]] %s3655_s25  ;;  %s3134_s29 = sadd.s32 4294967294, %s3663_s27  }
  0x12   : > { %6357 = sst [smem:[#allocation18_spill]] %s3659_s26  ;;  %p45_p0 = scmp.ne.s32.totalorder %s3655_s25, %s3651_s24 }
  0x13   : > { %6358 = sst [smem:[#allocation19_spill]] %s3663_s27  ;;  %p6146_p1 = scmp.eq.s32.totalorder %s3751_s28, 0 }
  0x14   : > { %6359 = sst [smem:[#allocation20_spill]] %s3751_s28  ;;  %p201_p3 = scmp.eq.s32.totalorder %s3134_s29, 1 }
  0x15   : > { %p3760_p4 = por %p6146_p1, %p45_p0  ;;  %p3135_p5 = scmp.ge.s32.totalorder %s3663_s27, 1 }
  0x16   : > { %p3765_p6 = por %p201_p3, %p45_p0  ;;  %p208_p7 = scmp.lt.s32.totalorder %s3663_s27, 3 }
  0x17   : > { %s6360_s30 = scalar_select %p3760_p4, 1, 0 }
  0x18   : > { %s6361_s8 = scalar_select %p3765_p6, 1, 0 }
  0x19   : > { %s6363_s5 = sld [smem:[#allocation132_spill]]  ;;  %p3773_p8 = pnand %p3135_p5, %p208_p7 }
  0x1a   : > { %6362 = sst [smem:[#allocation21_spill]] %s6361_s8  ;;  %s6365_s4 = sld [smem:[#allocation131_spill]] }
  0x1b   : > { %s6364_s12 = scalar_select %p3773_p8, 1, 0 }
  0x1c   : > { %p3382_p10 = pneg %p3773_p8  ;;  %s6367_s6 = sld [smem:[#allocation133_spill]] }
  0x1e   : > { %p3785_p11 = pnand %p3382_p10, %p6146_p1 }
  0x1f   : > { %s241_s11 = sshll.u32 %s6363_s5, 4  ;;  %s242_s11 = int_to_ptr.vmem [resolvable:$true] %s241_s11 }
  0x20   : > { %s230_s15 = sshll.u32 %s6365_s4, 4  ;;  %s3514_s20 = scalar_lea.vmem %s242_s11, 16  ;;  %s231_s15 = int_to_ptr.vmem [resolvable:$true] %s230_s15 }
  0x21   : > { %p3515_p12 = scmp.ne.s32.totalorder %s242_s11, %s3514_s20  ;;  %p3516_p13 = pneg %p3785_p11 }
  0x22   : > { %s252_s19 = sshll.u32 %s6367_s6, 4  ;;  %p3522_p5 = scmp.lt.s32.totalorder %s242_s11, %s242_s11  ;;  %s3792_s19 = int_to_ptr.vmem [resolvable:$true] %s252_s19 }
  0x23   : > { %p3517_p0 = pnand %p3516_p13, %p3515_p12  ;;  %p3523_p7 = scmp.lt.s32.totalorder %s3514_s20, %s3514_s20 }
  0x25   : > { %p3518_p3 = pneg %p3517_p0  ;;  %p3524_p10 = por %p3523_p7, %p3522_p5 }
  0x27   : > { %p3525_p9 = pnand %p3524_p10, %p3518_p3 }
  0x29   : > { %3528 = shalt.err (!%p3525_p9)
}
  0x2a   : > { %s3665_s21 = smov [#allocation8]   ;;  %s3529_s22 = scalar_lea.vmem %s231_s15, 16 }
  0x2b   : > { %3388 = dma.vmem_to_smem (!%p3785_p11), %s242_s11, 16, %s3665_s21, [#allocation9]  }
  0x2c   : > { %p3530_p1 = scmp.ne.s32.totalorder %s231_s15, %s3529_s22  ;;  %p3537_p4 = scmp.lt.s32.totalorder %s231_s15, %s231_s15 }
  0x2d   : > { %p3538_p8 = scmp.lt.s32.totalorder %s3529_s22, %s3529_s22 }
  0x2e   : > { %p3532_p2 = pnand %p3530_p1, %p3516_p13 }
  0x2f   : > { %p3539_p12 = por %p3538_p8, %p3537_p4 }
  0x30   : > { %p3533_p6 = pneg %p3532_p2 }
  0x32   : > { %p3540_p0 = pnand %p3539_p12, %p3533_p6 }
  0x34   : > { %3543 = shalt.err (!%p3540_p0)
}
  0x35   : > { %s3666_s23 = smov [#allocation7]   ;;  %s3544_s29 = scalar_lea.vmem %s3792_s19, 16 }
  0x36   : > { %3385 = dma.vmem_to_smem (!%p3785_p11), %s231_s15, 16, %s3666_s23, [#allocation6]  }
  0x37   : > { %p3545_p9 = scmp.ne.s32.totalorder %s3792_s19, %s3544_s29  ;;  %p3552_p2 = scmp.lt.s32.totalorder %s3792_s19, %s3792_s19 }
  0x38   : > { %p3553_p5 = scmp.lt.s32.totalorder %s3544_s29, %s3544_s29 }
  0x39   : > { %p3547_p3 = pnand %p3545_p9, %p3516_p13 }
  0x3a   : > { %p3554_p4 = por %p3553_p5, %p3552_p2 }
  0x3b   : > { %p3548_p1 = pneg %p3547_p3 }
  0x3d   : > { %p3555_p6 = pnand %p3554_p4, %p3548_p1 }
  0x3f   : > { %3558 = shalt.err (!%p3555_p6)
}
  0x40   : > { %s3667_s9 = smov [#allocation10]   ;;  %s3817_s10 = sadd.s32 1, %s3663_s27  }
  0x41   : > { %3391 = dma.vmem_to_smem (!%p3785_p11), %s3792_s19, 16, %s3667_s9, [#allocation9]  }
  0x42   : > { %6368 = sst [smem:[#allocation22_spill]] %s3817_s10  ;;  %s29_s11 = ssub.s32 %s3663_s27, %s3817_s10 }
  0x43   : > { %s32_s13 = sadd.s32 1, %s3659_s26  ;;  %p30_p8 = scmp.eq.s32.totalorder %s29_s11, 0 }
  0x44   : > { %p39_p13 = scmp.ne.s32.totalorder %s3659_s26, %s3655_s25  ;;  %p40_p7 = scmp.eq.s32.totalorder %s3663_s27, 0 }
  0x45   : > { %p3403_p10 = scmp.lt.s32.totalorder %s3663_s27, 2  ;;  %p6370_p0 = scmp.eq.s32.totalorder %s3751_s28, 1 }
  0x46   : > { %s3827_s14 = scalar_select %p30_p8, %s3659_s26, %s32_s13  }
  0x47   : > { %p41_p12 = por %p40_p7, %p39_p13  ;;  %p3831_p9 = por %p6370_p0, %p39_p13 }
  0x48   : > { %6369 = sst [smem:[#allocation23_spill]] %s3827_s14  ;;  %s263_s16 = sand.u32 1, %s3659_s26  }
  0x49   : > { %s6371_s15 = scalar_select %p3831_p9, 1, 0 }
  0x4a   : > { %s3363_s17 = sshll.u32 %s3663_s27, 11  ;;  %s3140_s18 = sshll.u32 %s263_s16, 7 }
  0x4b   : > { %6372 = sst [smem:[#allocation24_spill]] %s6371_s15  ;;  %s267_s22 = scalar_lea.vmem [#allocation3], %s3140_s18 }
  0x4c   : > { %s6373_s0 = sld [smem:[#allocation127_spill]]  ;;  %s275_s23 = sshll.u32 %s267_s22, 4  ;;  %s3846_s23 = int_to_ptr.vmem [resolvable:$true] %s275_s23 }
  0x4d   : > { %p3842_p11 = pnand %p3403_p10, %p41_p12  ;;  %s3848_s9 = scalar_lea.sflag [#allocation4], %s263_s16 }
  0x4f   : > { %p3561_p1 = pneg %p3842_p11 }
  0x52   : > { %s3840_s21 = scalar_lea.hbm %s6373_s0, %s3363_s17  ;;  %s3564_s18 = scalar_lea.hbm %s6373_s0, 4096 }
  0x53   : > { %s3559_s11 = scalar_lea.hbm %s3840_s21, 2048  ;;  %p3565_p4 = scmp.lt.u32.totalorder %s3840_s21, %s6373_s0 }
  0x54   : > { %p3560_p3 = scmp.ne.s32.totalorder %s3840_s21, %s3559_s11  ;;  %p3566_p6 = scmp.lt.u32.totalorder %s3564_s18, %s3559_s11 }
  0x55   : > { %p3568_p13 = scmp.lt.u32.totalorder %s3559_s11, %s3840_s21 }
  0x56   : > { %p3562_p2 = pnand %p3561_p1, %p3560_p3  ;;  %p3567_p8 = por %p3566_p6, %p3565_p4 }
  0x58   : > { %p3563_p5 = pneg %p3562_p2  ;;  %p3569_p7 = por %p3568_p13, %p3567_p8 }
  0x5a   : > { %p3570_p10 = pnand %p3569_p7, %p3563_p5 }
  0x5c   : > { %3573 = shalt.err (!%p3570_p10)
}
  0x5d   : > { %s3574_s16 = scalar_lea.vmem %s3846_s23, 2048  ;;  %s3668_s22 = smov [#allocation3]  }
  0x5e   : > { %p3575_p12 = scmp.ne.s32.totalorder %s3846_s23, %s3574_s16  ;;  %s3579_s13 = sshll.u32 %s3668_s22, 4  ;;  %s3580_s13 = int_to_ptr.vmem [resolvable:$false] %s3579_s13 }
  0x5f   : > { %s3581_s17 = scalar_lea.vmem %s3580_s13, 4096  ;;  %p3582_p2 = scmp.lt.s32.totalorder %s3846_s23, %s3580_s13 }
  0x60   : > { %p3577_p0 = pnand %p3575_p12, %p3561_p1  ;;  %p3583_p4 = scmp.lt.s32.totalorder %s3581_s17, %s3574_s16 }
  0x62   : > { %p3578_p3 = pneg %p3577_p0  ;;  %p3584_p6 = por %p3583_p4, %p3582_p2 }
  0x64   : > { %p3585_p8 = pnand %p3584_p6, %p3578_p3 }
  0x66   : > { %3588 = shalt.err (!%p3585_p8)
}
  0x67   : > { %s3669_s11 = smov 256   ;;  %s3670_s18 = smov 16  }
  0x68   : > { %3395 = dma.hbm_to_vmem [thread:$0]  (!%p3842_p11), %s3840_s21, 2048, %s3846_s23, %s3848_s9, %s3669_s11, %s3669_s11, %s3670_s18  }
  0x69   : > { %p6375_p1 = scmp.ne.s32.totalorder %s6364_s12, 0 }
  0x6b   : > { %287 = sbr.rel (%p6375_p1) target bundleno = 1425 (0x591), region = 48 }
  0x72   : > { %s3879_s19 = sand.u32 1, %s3655_s25   ;;  %p6377_p5 = scmp.ne.s32.totalorder %s6360_s30, 0 }
  0x73   : > { %6376 = sst [smem:[#allocation25_spill]] %s3879_s19  ;;  %s6149_s20 = sshll.u32 %s3879_s19, 7 }
  0x74   : > { %s290_s16 = scalar_lea.sflag [#allocation4], %s3879_s19  ;;  %s3885_s22 = scalar_lea.vmem [#allocation3], %s6149_s20 }
  0x75   : > { %3634 = dma.done.wait (%p6377_p5), %s290_s16, 2048  }
  0x76   : > { %3636 = vsyncadd (%p6377_p5), %s290_s16, 4294965248  ;;  %p6378_p11 = scmp.eq.s32.totalorder %s3751_s28, 0 }
  0x78   : > { %3638 = dma.done.wait (%p6378_p11), [#allocation6], 16   ;;  %p6379_p13 = pmov %p6378_p11 }
  0x79   : > { %p6380_p7 = pmov %p6378_p11 }
  0x7a   : > { %3640 = vsyncadd (%p6379_p13), [#allocation6], 4294967280 }
  0x7b   : > { %3642 = dma.done.wait (%p6380_p7), [#allocation9], 32   ;;  %p6381_p10 = pmov %p6380_p7 }
  0x7d   : > { %3644 = vsyncadd (%p6381_p10), [#allocation9], 4294967264 }
  0x7e   : > { %310 = sfence }
  0x7f   : > { %v3900_v0 = vld [vmem:[%s3885_s22 + $0x40] sm:$0xff]  ;;  %v3903_v1 = vld [vmem:[%s3885_s22 + $0x48] sm:$0xff]  ;;  %v3914_v5 = vld [vmem:[%s3885_s22 + $0x50] sm:$0xff]  ;;  %s6382_s1 = sld [smem:[#allocation128_spill]]  ;;  %vm432_vm0 = vcmask 7168   ;;  %vm525_vm1 = vcmask 15368  }
  0x80   : > { %v3906_v2 = vld [vmem:[%s3885_s22] sm:$0xff]  ;;  %v367_v3 = vadd.f32 %v3903_v1, %v3900_v0  ;;  %v3911_v4 = vld [vmem:[%s3885_s22 + $0x8] sm:$0xff]  ;;  %v3917_v6 = vld [vmem:[%s3885_s22 + $0x58] sm:$0xff]  ;;  %v400_v21 = vmax.f32 %v3900_v0, %v3903_v1  ;;  %s459_s11 = sld [smem:[#allocation7]]  ;;  %s3150_s18 = sld [smem:[#allocation7 + $0x1]]  ;;  %vm827_vm2 = vcmask 412672  }
  0x81   : > { %v355_v7 = vadd.f32 %v3911_v4, %v3906_v2  ;;  %v3922_v8 = vld [vmem:[%s3885_s22 + $0x10] sm:$0xff]  ;;  %v3925_v9 = vld [vmem:[%s3885_s22 + $0x18] sm:$0xff]  ;;  %v370_v10 = vadd.f32 %v3917_v6, %v3914_v5  ;;  %v3932_v12 = vld [vmem:[%s3885_s22 + $0x60] sm:$0xff]  ;;  %v388_v19 = vmax.f32 %v3906_v2, %v3911_v4  ;;  %v403_v20 = vmax.f32 %v3914_v5, %v3917_v6  ;;  %s6383_s2 = sld [smem:[#allocation129_spill]]  ;;  %s6150_s13 = smov 127  }
  0x82   : > { %368 = vadd.xlane.f32.xlu1 %v367_v3  ;;  %v358_v11 = vadd.f32 %v3925_v9, %v3922_v8  ;;  %v3935_v13 = vld [vmem:[%s3885_s22 + $0x68] sm:$0xff]  ;;  %v3938_v14 = vld [vmem:[%s3885_s22 + $0x20] sm:$0xff]  ;;  %v391_v18 = vmax.f32 %v3922_v8, %v3925_v9  ;;  %v3956_v22 = vld [vmem:[%s3885_s22 + $0x70] sm:$0xff]  ;;  %s6384_s3 = sld [smem:[#allocation130_spill]]  ;;  %vm829_vm3 = vcmask 830872   ;;  %vm838_vm4 = vcmask 1041409  }
  0x83   : > { %356 = vadd.xlane.f32.xlu0 %v355_v7  ;;  %v3941_v15 = vld [vmem:[%s3885_s22 + $0x28] sm:$0xff]  ;;  %v373_v16 = vadd.f32 %v3935_v13, %v3932_v12  ;;  %v3959_v23 = vld [vmem:[%s3885_s22 + $0x78] sm:$0xff]  ;;  %v3962_v24 = vld [vmem:[%s3885_s22 + $0x30] sm:$0xff]  ;;  %v406_v28 = vmax.f32 %v3932_v12, %v3935_v13  ;;  %vm840_vm5 = vcmask 1045509   ;;  %vm863_vm6 = vcmask 1043459   ;;  %s3674_s23 = smov 51  }
  0x84   : > { %v361_v17 = vadd.f32 %v3941_v15, %v3938_v14  ;;  %v3965_v25 = vld [vmem:[%s3885_s22 + $0x38] sm:$0xff]  ;;  %v376_v26 = vadd.f32 %v3959_v23, %v3956_v22  ;;  %v394_v29 = vmax.f32 %v3938_v14, %v3941_v15  ;;  %v409_v30 = vmax.f32 %v3956_v22, %v3959_v23  ;;  %s4147_s29 = sld [smem:[#allocation8 + $0x9]]  ;;  %s4149_s9 = sld [smem:[#allocation8 + $0x7]] }
  0x85   : > { %v364_v27 = vadd.f32 %v3965_v25, %v3962_v24  ;;  %v397_v31 = vmax.f32 %v3962_v24, %v3965_v25  ;;  %v420_v35 = vld [vmem:[%s6382_s1] sm:$0xff]  ;;  %v421_v38 = vld [vmem:[%s6382_s1 + $0x8] sm:$0xff]  ;;  %v3989_v47 = vld [vmem:[%s6382_s1 + $0x10] sm:$0xff]  ;;  %vm865_vm7 = vcmask 1047559   ;;  %vm849_vm8 = vcmask 1041816   ;;  %s4152_s17 = sld [smem:[#allocation8 + $0x10]] }
  0x86   : > { %371 = vadd.xlane.f32.xlu1 %v370_v10  ;;  %vm850_vm9 = vcmask 1045508   ;;  %vm845_vm10 = vcmask 416768   ;;  %vm853_vm11 = vcmask 410624   ;;  %vm873_vm12 = vcmask 1043866   ;;  %s4161_s16 = sld [smem:[#allocation8 + $0x15]]  ;;  %s4172_s22 = sld [smem:[#allocation8 + $0x1e]] }
  0x87   : > { %359 = vadd.xlane.f32.xlu0 %v358_v11  ;;  %vm874_vm13 = vcmask 1047558   ;;  %vm851_vm14 = vmor %vm850_vm9, %vm849_vm8  ;;  %vm877_vm15 = vcmask 412674   ;;  %s4174_s30 = sld [smem:[#allocation8 + $0x1c]]  ;;  %s6152_s12 = smov 112  }
  0x88   : > { %s4185_s21 = sld [smem:[#allocation8 + $0x25]]  ;;  %s6154_s20 = smov 96  }
  0x89   : > { %s4202_s0 = sld [smem:[#allocation8 + $0x2a]]  ;;  %s4223_s5 = sld [smem:[#allocation8 + $0x4]] }
  0x8a   : > { %374 = vadd.xlane.f32.xlu1 %v373_v16  ;;  %s4217_s4 = sld [smem:[#allocation8 + $0x32]]  ;;  %s6160_s6 = smov 64  }
  0x8b   : > { %362 = vadd.xlane.f32.xlu0 %v361_v17  ;;  %s4227_s14 = sld [smem:[#allocation8 + $0x1]]  ;;  %s4229_s26 = sld [smem:[#allocation8 + $0xc]] }
  0x8c   : > { %s4241_s25 = sld [smem:[#allocation8 + $0xf]]  ;;  %s6165_s10 = smov 48  }
  0x8d   : > { %s4254_s27 = sld [smem:[#allocation8 + $0x3]]  ;;  %s4264_s8 = sld [smem:[#allocation8 + $0x16]] }
  0x8e   : > { %392 = vmax.xlane.f32.xlu1 %v391_v18  ;;  %6401 = sst [smem:[#allocation42_spill]] %s4185_s21  ;;  %s6169_s24 = smov 32  }
  0x8f   : > { %389 = vmax.xlane.f32.xlu0 %v388_v19  ;;  %s4328_s15 = sld [smem:[#allocation8 + $0x24]]  ;;  %s6410_s7 = smov 96  }
  0x90   : > { %s6412_s19 = smov 80   ;;  %s4363_s28 = sld [smem:[#allocation8 + $0xa]] }
  0x91   : > { %6404 = sst [smem:[#allocation45_spill]] %s4229_s26 }
  0x92   : > { %404 = vmax.xlane.f32.xlu1 %v403_v20 }
  0x93   : > { %401 = vmax.xlane.f32.xlu0 %v400_v21 }
  0x96   : > { %377 = vadd.xlane.f32.xlu1 %v376_v26 }
  0x97   : > { %365 = vadd.xlane.f32.xlu0 %v364_v27 }
  0x9a   : > { %407 = vmax.xlane.f32.xlu1 %v406_v28 }
  0x9b   : > { %395 = vmax.xlane.f32.xlu0 %v394_v29 }
  0x9e   : > { %410 = vmax.xlane.f32.xlu1 %v409_v30 }
  0x9f   : > { %398 = vmax.xlane.f32.xlu0 %v397_v31 }
 0x10f   : > { %v369_v32 = vpop.xlane.xlu1 %368 }
 0x110   : > { %v384_v33 = vmul.f32 0.00390625, %v369_v32  ;;  %v357_v34 = vpop.xlane.xlu0 %356 }
 0x111   : > { %v380_v36 = vmul.f32 0.00390625, %v357_v34 }
 0x112   : > { %v428_v37 = vmul.f32 %v420_v35, %v384_v33  ;;  %v423_v33 = vld [vmem:[%s6382_s1 + $0x18] sm:$0xff]  ;;  %s6156_s1 = smov 80  }
 0x113   : > { %v372_v39 = vpop.xlane.xlu1 %371  ;;  %v424_v42 = vmul.f32 %v420_v35, %v380_v36 }
 0x114   : > { %v385_v40 = vmul.f32 0.00390625, %v372_v39  ;;  %v360_v41 = vpop.xlane.xlu0 %359  ;;  %v446_v44 = vsel %vm432_vm0, %v428_v37, 0.0  ;;  %v539_v21 = vsel %vm525_vm1, %v428_v37, 0.0 }
 0x115   : > { %v381_v43 = vmul.f32 0.00390625, %v360_v41  ;;  %v433_v52 = vsel %vm432_vm0, %v424_v42, 0.0  ;;  %v526_v30 = vsel %vm525_vm1, %v424_v42, 0.0 }
 0x116   : > { %v429_v45 = vmul.f32 %v421_v38, %v385_v40 }
 0x117   : > { %v425_v46 = vmul.f32 %v421_v38, %v381_v43  ;;  %v375_v48 = vpop.xlane.xlu1 %374 }
 0x118   : > { %v447_v49 = vsel %vm432_vm0, %v429_v45, 0.0  ;;  %v386_v50 = vmul.f32 0.00390625, %v375_v48  ;;  %v363_v51 = vpop.xlane.xlu0 %362  ;;  %v540_v26 = vsel %vm525_vm1, %v429_v45, 0.0 }
 0x119   : > { %v448_v53 = vadd.f32 %v447_v49, %v446_v44  ;;  %v434_v54 = vsel %vm432_vm0, %v425_v46, 0.0  ;;  %v382_v57 = vmul.f32 0.00390625, %v363_v51  ;;  %v527_v28 = vsel %vm525_vm1, %v425_v46, 0.0 }
 0x11a   : > { %v435_v55 = vadd.f32 %v434_v54, %v433_v52  ;;  %v430_v56 = vmul.f32 %v3989_v47, %v386_v50  ;;  %v541_v36 = vadd.f32 %v540_v26, %v539_v21  ;;  %v528_v40 = vadd.f32 %v527_v28, %v526_v30 }
 0x11b   : > { %v393_v58 = vpop.xlane.xlu1 %392  ;;  %v426_v60 = vmul.f32 %v3989_v47, %v382_v57 }
 0x11c   : > { %v449_v59 = vsel %vm432_vm0, %v430_v56, 0.0  ;;  %v464_v61 = vmul.f32 %v421_v38, %v393_v58  ;;  %v390_v62 = vpop.xlane.xlu0 %389  ;;  %v542_v31 = vsel %vm525_vm1, %v430_v56, 0.0 }
 0x11d   : > { %v450_v63 = vadd.f32 %v449_v59, %v448_v53  ;;  %v463_v3 = vmul.f32 %v420_v35, %v390_v62  ;;  %v436_v7 = vsel %vm432_vm0, %v426_v60, 0.0  ;;  %v529_v37 = vsel %vm525_vm1, %v426_v60, 0.0 }
 0x11e   : > { %v472_v10 = vsel %vm432_vm0, %v464_v61, 0.0  ;;  %v437_v11 = vadd.f32 %v436_v7, %v435_v55  ;;  %v543_v43 = vadd.f32 %v542_v31, %v541_v36  ;;  %v530_v42 = vadd.f32 %v529_v37, %v528_v40 }
 0x11f   : > { %v471_v16 = vsel %vm432_vm0, %v463_v3, 0.0  ;;  %v405_v17 = vpop.xlane.xlu1 %404  ;;  %v557_v45 = vsel %vm525_vm1, %v464_v61, 0.0  ;;  %v556_v46 = vsel %vm525_vm1, %v463_v3, 0.0 }
 0x120   : > { %v473_v18 = vadd.f32 %v472_v10, %v471_v16  ;;  %v468_v19 = vmul.f32 %v421_v38, %v405_v17  ;;  %v402_v20 = vpop.xlane.xlu0 %401  ;;  %v558_v28 = vadd.f32 %v557_v45, %v556_v46 }
 0x121   : > { %v467_v27 = vmul.f32 %v420_v35, %v402_v20 }
 0x122   : > { %v485_v29 = vsel %vm432_vm0, %v468_v19, 0.0  ;;  %v570_v50 = vsel %vm525_vm1, %v468_v19, 0.0 }
 0x123   : > { %v484_v32 = vsel %vm432_vm0, %v467_v27, 0.0  ;;  %v378_v34 = vpop.xlane.xlu1 %377  ;;  %v569_v59 = vsel %vm525_vm1, %v467_v27, 0.0 }
 0x124   : > { %v486_v38 = vadd.f32 %v485_v29, %v484_v32  ;;  %v387_v35 = vmul.f32 0.00390625, %v378_v34  ;;  %v366_v39 = vpop.xlane.xlu0 %365  ;;  %v571_v29 = vadd.f32 %v570_v50, %v569_v59 }
 0x125   : > { %v383_v41 = vmul.f32 0.00390625, %v366_v39 }
 0x126   : > { %v431_v44 = vmul.f32 %v423_v33, %v387_v35 }
 0x127   : > { %v427_v48 = vmul.f32 %v423_v33, %v383_v41  ;;  %v408_v49 = vpop.xlane.xlu1 %407 }
 0x128   : > { %v451_v51 = vsel %vm432_vm0, %v431_v44, 0.0  ;;  %v544_v52 = vsel %vm525_vm1, %v431_v44, 0.0  ;;  %v469_v53 = vmul.f32 %v3989_v47, %v408_v49  ;;  %v396_v54 = vpop.xlane.xlu0 %395 }
 0x129   : > { %v452_v55 = vadd.f32 %v451_v51, %v450_v63  ;;  %v545_v56 = vadd.f32 %v544_v52, %v543_v43  ;;  %v438_v57 = vsel %vm432_vm0, %v427_v48, 0.0  ;;  %v531_v58 = vsel %vm525_vm1, %v427_v48, 0.0 }
 0x12a   : > { %v439_v60 = vadd.f32 %v438_v57, %v437_v11  ;;  %v532_v61 = vadd.f32 %v531_v58, %v530_v42  ;;  %v487_v62 = vsel %vm432_vm0, %v469_v53, 0.0  ;;  %v572_v16 = vsel %vm525_vm1, %v469_v53, 0.0 }
 0x12b   : > { %v453_v3 = vrot.slane %v452_v55, 4  ;;  %v546_v7 = vrot.slane %v545_v56, 4  ;;  %v488_v10 = vadd.f32 %v487_v62, %v486_v38  ;;  %v411_v17 = vpop.xlane.xlu1 %410  ;;  %v465_v63 = vmul.f32 %v3989_v47, %v396_v54 }
 0x12c   : > { %v440_v19 = vrot.slane %v439_v60, 4  ;;  %v533_v20 = vrot.slane %v532_v61, 4  ;;  %v470_v21 = vmul.f32 %v423_v33, %v411_v17  ;;  %v399_v26 = vpop.xlane.xlu0 %398  ;;  %v573_v37 = vadd.f32 %v572_v16, %v571_v29 }
 0x12d   : > { %v454_v30 = vadd.f32 %v453_v3, %v452_v55  ;;  %v547_v27 = vadd.f32 %v546_v7, %v545_v56  ;;  %v474_v32 = vsel %vm432_vm0, %v465_v63, 0.0  ;;  %v466_v34 = vmul.f32 %v423_v33, %v399_v26 }
 0x12e   : > { %v441_v11 = vadd.f32 %v440_v19, %v439_v60  ;;  %v534_v31 = vadd.f32 %v533_v20, %v532_v61  ;;  %v475_v38 = vadd.f32 %v474_v32, %v473_v18  ;;  %v559_v35 = vsel %vm525_vm1, %v465_v63, 0.0 }
 0x12f   : > { %v455_v36 = vrot.slane %v454_v30, 2  ;;  %v489_v47 = vsel %vm432_vm0, %v470_v21, 0.0  ;;  %v574_v41 = vsel %vm525_vm1, %v470_v21, 0.0  ;;  %v548_v44 = vrot.slane %v547_v27, 2 }
 0x130   : > { %v442_v39 = vrot.slane %v441_v11, 2  ;;  %v535_v40 = vrot.slane %v534_v31, 2  ;;  %v490_v42 = vadd.f32 %v489_v47, %v488_v10  ;;  %v575_v45 = vadd.f32 %v574_v41, %v573_v37 }
 0x131   : > { %v456_v43 = vadd.f32 %v455_v36, %v454_v30  ;;  %v560_v46 = vadd.f32 %v559_v35, %v558_v28  ;;  %v476_v48 = vsel %vm432_vm0, %v466_v34, 0.0  ;;  %v561_v33 = vsel %vm525_vm1, %v466_v34, 0.0  ;;  %vm875_vm0 = vmor %vm874_vm13, %vm873_vm12 }
 0x132   : > { %v443_v49 = vadd.f32 %v442_v39, %v441_v11  ;;  %v491_v18 = vrot.slane %v490_v42, 4  ;;  %v576_v50 = vrot.slane %v575_v45, 4  ;;  %v536_v51 = vadd.f32 %v535_v40, %v534_v31 }
 0x133   : > { %v477_v52 = vadd.f32 %v476_v48, %v475_v38  ;;  %v562_v53 = vadd.f32 %v561_v33, %v560_v46  ;;  %v457_v54 = vrot.slane %v456_v43, 1  ;;  %v549_v55 = vadd.f32 %v548_v44, %v547_v27 }
 0x134   : > { %v492_v56 = vadd.f32 %v491_v18, %v490_v42  ;;  %v577_v57 = vadd.f32 %v576_v50, %v575_v45  ;;  %v444_v60 = vrot.slane %v443_v49, 1  ;;  %v537_v3 = vrot.slane %v536_v51, 1  ;;  %v506_v50 = vld [vmem:[%s6383_s2 + $0x8] sm:$0xff] }
 0x135   : > { %v478_v58 = vrot.slane %v477_v52, 4  ;;  %v563_v59 = vrot.slane %v562_v53, 4  ;;  %v458_v16 = vadd.f32 %v457_v54, %v456_v43  ;;  %v550_v17 = vrot.slane %v549_v55, 1 }
 0x136   : > { %v493_v61 = vrot.slane %v492_v56, 2  ;;  %v578_v62 = vrot.slane %v577_v57, 2  ;;  %v460_v63 = vstv %s459_s11  ;;  %v445_v28 = vadd.f32 %v444_v60, %v443_v49  ;;  %s4154_s11 = sld [smem:[#allocation8 + $0xe]] }
 0x137   : > { %v479_v7 = vadd.f32 %v478_v58, %v477_v52  ;;  %v564_v10 = vadd.f32 %v563_v59, %v562_v53  ;;  %v538_v27 = vadd.f32 %v537_v3, %v536_v51  ;;  %v553_v11 = vstv %s3150_s18  ;;  %v505_v51 = vld [vmem:[%s6383_s2] sm:$0xff]  ;;  %v508_v58 = vld [vmem:[%s6383_s2 + $0x18] sm:$0xff]  ;;  %s4159_s18 = sld [smem:[#allocation8 + $0x17]] }
 0x138   : > { %v494_v19 = vadd.f32 %v493_v61, %v492_v56  ;;  %v579_v20 = vadd.f32 %v578_v62, %v577_v57  ;;  %v462_v34 = vadd.f32 %v460_v63, %v458_v16  ;;  %v551_v36 = vadd.f32 %v550_v17, %v549_v55  ;;  %v507_v57 = vld [vmem:[%s6383_s2 + $0x10] sm:$0xff]  ;;  %s4208_s2 = sld [smem:[#allocation8 + $0x35]] }
 0x139   : > { %v480_v21 = vrot.slane %v479_v7, 2  ;;  %v565_v26 = vrot.slane %v564_v10, 2  ;;  %v461_v40 = vadd.f32 %v460_v63, %v445_v28  ;;  %v554_v42 = vadd.f32 %v553_v11, %v538_v27 }
 0x13a   : > { %v495_v29 = vrot.slane %v494_v19, 1  ;;  %v580_v30 = vrot.slane %v579_v20, 1  ;;  %v500_v45 = vmax.f32 %v462_v34, 0.0  ;;  %v555_v48 = vadd.f32 %v553_v11, %v551_v36  ;;  %v413_v34 = vld [vmem:[%s6384_s3 + $0x8] sm:$0xff]  ;;  %v412_v36 = vld [vmem:[%s6384_s3] sm:$0xff] }
 0x13b   : > { %v481_v31 = vadd.f32 %v480_v21, %v479_v7  ;;  %v566_v32 = vadd.f32 %v565_v26, %v564_v10  ;;  %v499_v18 = vmax.f32 %v461_v40, 0.0  ;;  %v584_v56 = vmax.f32 %v554_v42, 0.0 }
 0x13c   : > { %v496_v37 = vadd.f32 %v495_v29, %v494_v19  ;;  %v581_v38 = vadd.f32 %v580_v30, %v579_v20  ;;  %v585_v59 = vmax.f32 %v555_v48, 0.0  ;;  %vm935_vm1 = vcmask 1043456  }
 0x13d   : > { %v482_v35 = vrot.slane %v481_v31, 1  ;;  %v567_v39 = vrot.slane %v566_v32, 1 }
 0x13e   : > { %v498_v47 = vadd.f32 %v496_v37, %v460_v63  ;;  %v583_v41 = vadd.f32 %v581_v38, %v553_v11  ;;  %v417_v37 = vmul.f32 2.0, %v413_v34  ;;  %v416_v38 = vmul.f32 2.0, %v412_v36 }
 0x13f   : > { %v483_v43 = vadd.f32 %v482_v35, %v481_v31  ;;  %v568_v44 = vadd.f32 %v567_v39, %v566_v32  ;;  %v3672_v32 = vmov 0   ;;  %v414_v35 = vld [vmem:[%s6384_s3 + $0x10] sm:$0xff] }
 0x140   : > { %v502_v46 = vmax.f32 %v498_v47, 0.0  ;;  %v587_v53 = vmax.f32 %v583_v41, 0.0  ;;  %3464 = vset.pattern.permute.xlu1 %v3672_v32  ;;  %3463 = vset.pattern.permute.xlu0 %v3672_v32  ;;  %v418_v47 = vmul.f32 2.0, %v414_v35  ;;  %v415_v41 = vld [vmem:[%s6384_s3 + $0x18] sm:$0xff]  ;;  %s4215_s3 = sld [smem:[#allocation8 + $0xb]] }
 0x141   : > { %v497_v33 = vadd.f32 %v483_v43, %v460_v63  ;;  %v582_v49 = vadd.f32 %v568_v44, %v553_v11 }
 0x142   : > { %v504_v52 = vadd.f32 %v502_v46, %v500_v45  ;;  %v589_v19 = vadd.f32 %v587_v53, %v585_v59  ;;  %v419_v46 = vmul.f32 2.0, %v415_v41 }
 0x143   : > { %v501_v54 = vmax.f32 %v497_v33, 0.0  ;;  %v586_v55 = vmax.f32 %v582_v49, 0.0 }
 0x144   : > { %v513_v62 = vmul.f32 %v505_v51, %v504_v52  ;;  %v514_v3 = vmul.f32 %v506_v50, %v504_v52  ;;  %v4041_v7 = vmul.f32 %v507_v57, %v504_v52  ;;  %v4043_v10 = vmul.f32 %v508_v58, %v504_v52 }
 0x145   : > { %v588_v60 = vadd.f32 %v586_v55, %v584_v56  ;;  %v503_v61 = vadd.f32 %v501_v54, %v499_v18  ;;  %v594_v28 = vmul.f32 %v589_v19, %v505_v51  ;;  %v595_v30 = vmul.f32 %v589_v19, %v506_v50 }
 0x146   : > { %v596_v11 = vmul.f32 %v589_v19, %v507_v57  ;;  %v597_v31 = vmul.f32 %v589_v19, %v508_v58  ;;  %v521_v49 = vadd.f32 %v513_v62, %v416_v38  ;;  %v522_v56 = vadd.f32 %v514_v3, %v417_v37  ;;  %6403 = sst [smem:[#allocation44_spill]] %s4215_s3 }
 0x147   : > { %v591_v16 = vmul.f32 %v588_v60, %v506_v50  ;;  %v590_v17 = vmul.f32 %v588_v60, %v505_v51  ;;  %v510_v20 = vmul.f32 %v506_v50, %v503_v61  ;;  %v509_v63 = vmul.f32 %v505_v51, %v503_v61 }
 0x148   : > { %v511_v21 = vmul.f32 %v507_v57, %v503_v61  ;;  %v512_v26 = vmul.f32 %v508_v58, %v503_v61  ;;  %v592_v29 = vmul.f32 %v588_v60, %v507_v57  ;;  %v593_v27 = vmul.f32 %v588_v60, %v508_v58 }
 0x149   : > { %608 = vrot.lane.b32.xlu1 %v591_v16, %s6150_s13  ;;  %606 = vrot.lane.b32.xlu0 %v590_v17, %s6150_s13  ;;  %v518_v39 = vadd.f32 %v510_v20, %v417_v37  ;;  %v517_v40 = vadd.f32 %v509_v63, %v416_v38 }
 0x14a   : > { %v519_v18 = vadd.f32 %v511_v21, %v418_v47  ;;  %v520_v59 = vadd.f32 %v512_v26, %v419_v46  ;;  %v523_v21 = vadd.f32 %v4041_v7, %v418_v47  ;;  %v524_v26 = vadd.f32 %v4043_v10, %v419_v46 }
 0x14d   : > { %614 = vrot.lane.b32.xlu1 %v594_v28, %s6150_s13  ;;  %610 = vrot.lane.b32.xlu0 %v592_v29, %s6150_s13 }
 0x151   : > { %616 = vrot.lane.b32.xlu1 %v595_v30, %s6150_s13  ;;  %612 = vrot.lane.b32.xlu0 %v593_v27, %s6150_s13 }
 0x155   : > { %618 = vrot.lane.b32.xlu1 %v596_v11, %s6150_s13 }
 0x159   : > { %620 = vrot.lane.b32.xlu1 %v597_v31, %s6150_s13  ;;  %s4196_s13 = sld [smem:[#allocation8 + $0x33]] }
 0x1bb   : > { %v609_v43 = vpop.permute.xlu1 %608  ;;  %v607_v44 = vpop.permute.xlu0 %606 }
 0x1bc   : > { %v631_v42 = vadd.f32 %v609_v43, %v518_v39  ;;  %v630_v45 = vadd.f32 %v607_v44, %v517_v40 }
 0x1be   : > { %v639_v48 = vsub.f32 0.0, %v631_v42  ;;  %v638_v33 = vsub.f32 0.0, %v630_v45 }
 0x1bf   : > { %v615_v50 = vpop.permute.xlu1 %614  ;;  %v611_v51 = vpop.permute.xlu0 %610 }
 0x1c0   : > { %v3152_v52 = vmul.f32 -1.442695, %v639_v48  ;;  %v3151_v53 = vmul.f32 -1.442695, %v638_v33  ;;  %v634_v54 = vadd.f32 %v615_v50, %v521_v49  ;;  %v632_v55 = vadd.f32 %v611_v51, %v519_v18 }
 0x1c2   : > { %3465 = vpow2.f32 %v3152_v52  ;;  %v642_v57 = vsub.f32 0.0, %v634_v54  ;;  %v640_v58 = vsub.f32 0.0, %v632_v55 }
 0x1c3   : > { %3467 = vpow2.f32 %v3151_v53  ;;  %v617_v60 = vpop.permute.xlu1 %616  ;;  %v613_v61 = vpop.permute.xlu0 %612 }
 0x1c4   : > { %v3155_v16 = vmul.f32 -1.442695, %v642_v57  ;;  %v3153_v17 = vmul.f32 -1.442695, %v640_v58  ;;  %v635_v19 = vadd.f32 %v617_v60, %v522_v56  ;;  %v633_v20 = vadd.f32 %v613_v61, %v520_v59 }
 0x1c5   : > { %v3673_v56 = vmov 0.0  }
 0x1c6   : > { %3469 = vpow2.f32 %v3155_v16  ;;  %v643_v62 = vsub.f32 0.0, %v635_v19  ;;  %v641_v63 = vsub.f32 0.0, %v633_v20  ;;  %828 = vst.msk [vmem:[#allocation2] sm:$0xf] %vm827_vm2, %v3673_v56  ;;  %vm937_vm2 = vcmask 916480  }
 0x1c7   : > { %3471 = vpow2.f32 %v3153_v17  ;;  %v619_v28 = vpop.permute.xlu1 %618  ;;  %830 = vst.msk [vmem:[#allocation2 + $0x8] sm:$0xf] %vm829_vm3, %v3673_v56  ;;  %vm976_vm3 = vcmask 785408  }
 0x1c8   : > { %v3156_v29 = vmul.f32 -1.442695, %v643_v62  ;;  %v3154_v3 = vmul.f32 -1.442695, %v641_v63  ;;  %v636_v30 = vadd.f32 %v619_v28, %v523_v21 }
 0x1ca   : > { %3473 = vpow2.f32 %v3156_v29  ;;  %v644_v27 = vsub.f32 0.0, %v636_v30 }
 0x1cb   : > { %3475 = vpow2.f32 %v3154_v3  ;;  %v621_v11 = vpop.permute.xlu1 %620 }
 0x1cc   : > { %v3466_v31 = vpop.eup %3465  ;;  %v3157_v32 = vmul.f32 -1.442695, %v644_v27  ;;  %v637_v34 = vadd.f32 %v621_v11, %v524_v26 }
 0x1cd   : > { %v3468_v36 = vpop.eup %3467  ;;  %v671_v37 = vadd.f32 1.0, %v3466_v31 }
 0x1ce   : > { %v670_v38 = vadd.f32 1.0, %v3468_v36  ;;  %3477 = vpow2.f32 %v3157_v32  ;;  %v645_v35 = vsub.f32 0.0, %v637_v34 }
 0x1cf   : > { %3479 = vrcp.f32 %v671_v37 }
 0x1d0   : > { %v3470_v7 = vpop.eup %3469  ;;  %3481 = vrcp.f32 %v670_v38  ;;  %v3158_v39 = vmul.f32 -1.442695, %v645_v35 }
 0x1d1   : > { %v3472_v40 = vpop.eup %3471  ;;  %v674_v41 = vadd.f32 1.0, %v3470_v7 }
 0x1d2   : > { %v672_v47 = vadd.f32 1.0, %v3472_v40  ;;  %3483 = vpow2.f32 %v3158_v39 }
 0x1d4   : > { %v3474_v43 = vpop.eup %3473  ;;  %3485 = vrcp.f32 %v672_v47 }
 0x1d5   : > { %v3476_v10 = vpop.eup %3475  ;;  %3487 = vrcp.f32 %v674_v41  ;;  %v675_v45 = vadd.f32 1.0, %v3474_v43 }
 0x1d6   : > { %v673_v44 = vadd.f32 1.0, %v3476_v10 }
 0x1d8   : > { %v3478_v42 = vpop.eup %3477  ;;  %3489 = vrcp.f32 %v673_v44 }
 0x1d9   : > { %v3480_v46 = vpop.eup %3479  ;;  %v676_v48 = vadd.f32 1.0, %v3478_v42 }
 0x1da   : > { %v3482_v33 = vpop.eup %3481  ;;  %701 = vperm.xlu1 %3464, %v3480_v46  }
 0x1db   : > { %3491 = vrcp.f32 %v676_v48  ;;  %696 = vperm.xlu0 %3463, %v3482_v33  }
 0x1dc   : > { %v3484_v49 = vpop.eup %3483  ;;  %3493 = vrcp.f32 %v675_v45 }
 0x1dd   : > { %v677_v18 = vadd.f32 1.0, %v3484_v49 }
 0x1de   : > { %v3486_v50 = vpop.eup %3485 }
 0x1df   : > { %3495 = vrcp.f32 %v677_v18  ;;  %706 = vperm.xlu1 %3464, %v3486_v50   ;;  %v3488_v51 = vpop.eup %3487 }
 0x1e2   : > { %v3490_v52 = vpop.eup %3489 }
 0x1e3   : > { %716 = vperm.xlu1 %3464, %v3488_v51   ;;  %711 = vperm.xlu0 %3463, %v3490_v52  }
 0x1e5   : > { %v3492_v53 = vpop.eup %3491 }
 0x1e6   : > { %v3494_v54 = vpop.eup %3493 }
 0x1e7   : > { %726 = vperm.xlu1 %3464, %v3492_v53   ;;  %721 = vperm.xlu0 %3463, %v3494_v54  }
 0x1e9   : > { %v3496_v55 = vpop.eup %3495 }
 0x1eb   : > { %731 = vperm.xlu0 %3463, %v3496_v55  }
 0x259   : > { %v702_v57 = vpop.permute.xlu1 %701 }
 0x25a   : > { %v697_v58 = vpop.permute.xlu0 %696  ;;  %v4068_v59 = vmul.f32 %v702_v57, %v3922_v8  ;;  %v4071_v60 = vmul.f32 %v702_v57, %v3925_v9 }
 0x25b   : > { %v4074_v61 = vmul.f32 %v697_v58, %v3906_v2  ;;  %v4077_v16 = vmul.f32 %v697_v58, %v3911_v4 }
 0x25c   : > { %6385 = vst [vmem:[#allocation26_spill] sm:$0xff] %v4068_v59  ;;  %6386 = vst [vmem:[#allocation27_spill] sm:$0xff] %v4071_v60 }
 0x25d   : > { %6387 = vst [vmem:[#allocation28_spill] sm:$0xff] %v4074_v61  ;;  %6388 = vst [vmem:[#allocation29_spill] sm:$0xff] %v4077_v16  ;;  %v750_v8 = vmax.f32 %v4074_v61, %v4068_v59  ;;  %v759_v9 = vmax.f32 %v4077_v16, %v4071_v60  ;;  %v786_v2 = vadd.f32 %v4068_v59, %v4074_v61 }
 0x25e   : > { %v707_v17 = vpop.permute.xlu1 %706  ;;  %v795_v4 = vadd.f32 %v4071_v60, %v4077_v16 }
 0x25f   : > { %v4080_v19 = vmul.f32 %v707_v17, %v3938_v14  ;;  %v4083_v20 = vmul.f32 %v707_v17, %v3941_v15 }
 0x261   : > { %6389 = vst [vmem:[#allocation30_spill] sm:$0xff] %v4080_v19  ;;  %6390 = vst [vmem:[#allocation31_spill] sm:$0xff] %v4083_v20  ;;  %v751_v62 = vmax.f32 %v750_v8, %v4080_v19  ;;  %v760_v14 = vmax.f32 %v759_v9, %v4083_v20  ;;  %v787_v15 = vadd.f32 %v786_v2, %v4080_v19 }
 0x262   : > { %v717_v63 = vpop.permute.xlu1 %716  ;;  %v712_v21 = vpop.permute.xlu0 %711  ;;  %v796_v28 = vadd.f32 %v795_v4, %v4083_v20 }
 0x263   : > { %v4098_v29 = vmul.f32 %v712_v21, %v3962_v24  ;;  %v4101_v3 = vmul.f32 %v712_v21, %v3965_v25  ;;  %v4108_v24 = vmul.f32 %v717_v63, %v3900_v0  ;;  %v4111_v25 = vmul.f32 %v717_v63, %v3903_v1 }
 0x265   : > { %6391 = vst [vmem:[#allocation32_spill] sm:$0xff] %v4098_v29  ;;  %6392 = vst [vmem:[#allocation33_spill] sm:$0xff] %v4101_v3  ;;  %v752_v30 = vmax.f32 %v751_v62, %v4098_v29  ;;  %v761_v27 = vmax.f32 %v760_v14, %v4101_v3  ;;  %v788_v26 = vadd.f32 %v787_v15, %v4098_v29 }
 0x266   : > { %v797_v11 = vadd.f32 %v796_v28, %v4101_v3  ;;  %v727_v31 = vpop.permute.xlu1 %726  ;;  %v722_v32 = vpop.permute.xlu0 %721  ;;  %6393 = vst [vmem:[#allocation34_spill] sm:$0xff] %v4108_v24  ;;  %6394 = vst [vmem:[#allocation35_spill] sm:$0xff] %v4111_v25 }
 0x267   : > { %v753_v34 = vrot.slane %v752_v30, 4  ;;  %v762_v36 = vrot.slane %v761_v27, 4  ;;  %v789_v37 = vrot.slane %v788_v26, 4  ;;  %v4114_v35 = vmul.f32 %v722_v32, %v3914_v5 }
 0x268   : > { %v798_v38 = vrot.slane %v797_v11, 4  ;;  %v4117_v7 = vmul.f32 %v722_v32, %v3917_v6  ;;  %v4120_v47 = vmul.f32 %v727_v31, %v3932_v12  ;;  %v4123_v41 = vmul.f32 %v727_v31, %v3935_v13 }
 0x269   : > { %6395 = vst [vmem:[#allocation36_spill] sm:$0xff] %v4114_v35  ;;  %v790_v39 = vadd.f32 %v789_v37, %v788_v26  ;;  %v768_v0 = vmax.f32 %v4108_v24, %v4114_v35  ;;  %v804_v5 = vadd.f32 %v4114_v35, %v4108_v24  ;;  %v754_v43 = vmax.f32 %v752_v30, %v753_v34 }
 0x26a   : > { %6396 = vst [vmem:[#allocation37_spill] sm:$0xff] %v4117_v7  ;;  %v799_v40 = vadd.f32 %v798_v38, %v797_v11  ;;  %6397 = vst [vmem:[#allocation38_spill] sm:$0xff] %v4120_v47  ;;  %v777_v1 = vmax.f32 %v4111_v25, %v4117_v7  ;;  %v813_v6 = vadd.f32 %v4117_v7, %v4111_v25  ;;  %v732_v42 = vpop.permute.xlu0 %731 }
 0x26b   : > { %6398 = vst [vmem:[#allocation39_spill] sm:$0xff] %v4123_v41  ;;  %v763_v10 = vmax.f32 %v761_v27, %v762_v36  ;;  %v791_v44 = vrot.slane %v790_v39, 2  ;;  %v769_v13 = vmax.f32 %v768_v0, %v4120_v47  ;;  %v805_v46 = vadd.f32 %v804_v5, %v4120_v47 }
 0x26c   : > { %v800_v12 = vrot.slane %v799_v40, 2  ;;  %v778_v45 = vmax.f32 %v777_v1, %v4123_v41  ;;  %v814_v48 = vadd.f32 %v813_v6, %v4123_v41  ;;  %v4138_v18 = vmul.f32 %v732_v42, %v3956_v22 }
 0x26d   : > { %v792_v33 = vadd.f32 %v791_v44, %v790_v39  ;;  %v4141_v50 = vmul.f32 %v732_v42, %v3959_v23  ;;  %v755_v51 = vrot.slane %v754_v43, 2  ;;  %v764_v52 = vrot.slane %v763_v10, 2 }
 0x26e   : > { %v801_v49 = vadd.f32 %v800_v12, %v799_v40  ;;  %6399 = vst [vmem:[#allocation40_spill] sm:$0xff] %v4138_v18  ;;  %v770_v53 = vmax.f32 %v769_v13, %v4138_v18  ;;  %v806_v55 = vadd.f32 %v805_v46, %v4138_v18 }
 0x26f   : > { %6400 = vst [vmem:[#allocation41_spill] sm:$0xff] %v4141_v50  ;;  %v779_v54 = vmax.f32 %v778_v45, %v4141_v50  ;;  %v815_v56 = vadd.f32 %v814_v48, %v4141_v50  ;;  %v793_v57 = vrot.slane %v792_v33, 1  ;;  %v756_v2 = vmax.f32 %v754_v43, %v755_v51 }
 0x270   : > { %v802_v58 = vrot.slane %v801_v49, 1  ;;  %v771_v17 = vrot.slane %v770_v53, 4  ;;  %v807_v9 = vrot.slane %v806_v55, 4  ;;  %v765_v4 = vmax.f32 %v763_v10, %v764_v52 }
 0x271   : > { %v780_v8 = vrot.slane %v779_v54, 4  ;;  %v816_v22 = vrot.slane %v815_v56, 4  ;;  %v794_v21 = vadd.f32 %v793_v57, %v792_v33  ;;  %v757_v11 = vrot.slane %v756_v2, 1 }
 0x272   : > { %v772_v23 = vmax.f32 %v770_v53, %v771_v17  ;;  %v808_v14 = vadd.f32 %v807_v9, %v806_v55  ;;  %v803_v15 = vadd.f32 %v802_v58, %v801_v49  ;;  %v766_v31 = vrot.slane %v765_v4, 1 }
 0x273   : > { %v781_v62 = vmax.f32 %v779_v54, %v780_v8  ;;  %v817_v63 = vadd.f32 %v816_v22, %v815_v56  ;;  %v823_v38 = vmul.f32 0.03125, %v794_v21  ;;  %v758_v6 = vmax.f32 %v756_v2, %v757_v11 }
 0x274   : > { %v773_v28 = vrot.slane %v772_v23, 2  ;;  %v809_v27 = vrot.slane %v808_v14, 2  ;;  %v824_v39 = vmul.f32 0.03125, %v803_v15  ;;  %v767_v43 = vmax.f32 %v765_v4, %v766_v31 }
 0x275   : > { %v782_v30 = vrot.slane %v781_v62, 2  ;;  %v818_v26 = vrot.slane %v817_v63, 2  ;;  %v6194_v4 = vstv %s4147_s29  ;;  %v6193_v15 = vstv %s4152_s17 }
 0x276   : > { %v774_v32 = vmax.f32 %v772_v23, %v773_v28  ;;  %v810_v36 = vadd.f32 %v809_v27, %v808_v14  ;;  %v859_v48 = vcombine.low %v823_v38, %v824_v39  ;;  %v835_v33 = vcombine.low %v758_v6, %v767_v43 }
 0x277   : > { %v783_v34 = vmax.f32 %v781_v62, %v782_v30  ;;  %v819_v37 = vadd.f32 %v818_v26, %v817_v63  ;;  %v924_v23 = vstv %s4149_s9  ;;  %v964_v28 = vstv %s4154_s11  ;;  %s4409_s9 = sld [smem:[#allocation8 + $0x36]]  ;;  %s4423_s11 = sld [smem:[#allocation8 + $0x5]] }
 0x278   : > { %v775_v40 = vrot.slane %v774_v32, 1  ;;  %v811_v1 = vrot.slane %v810_v36, 1  ;;  %v861_v53 = vrot.slane %v859_v48, 6  ;;  %v6192_v26 = vstv %s4159_s18 }
 0x279   : > { %v784_v0 = vrot.slane %v783_v34, 1  ;;  %v820_v5 = vrot.slane %v819_v37, 1  ;;  %v1001_v11 = vstv %s4161_s16  ;;  %v6183_v39 = vstv %s4185_s21  ;;  %s4419_s21 = sld [smem:[#allocation8 + $0x37]]  ;;  %s4457_s16 = sld [smem:[#allocation8 + $0x1a]] }
 0x27a   : > { %v776_v10 = vmax.f32 %v774_v32, %v775_v40  ;;  %v812_v12 = vadd.f32 %v811_v1, %v810_v36  ;;  %v1038_v36 = vstv %s4174_s30  ;;  %v1471_v6 = vstv %s4196_s13  ;;  %s4425_s13 = sld [smem:[#allocation8 + $0x6]]  ;;  %s4531_s30 = sld [smem:[#allocation8 + $0x21]] }
 0x27b   : > { %v785_v44 = vmax.f32 %v783_v34, %v784_v0  ;;  %v821_v42 = vadd.f32 %v820_v5, %v819_v37  ;;  %v6184_v34 = vstv %s4172_s22  ;;  %v6178_v48 = vstv %s4215_s3  ;;  %s6416_s3 = smov 32  }
 0x27c   : > { %v825_v45 = vmul.f32 0.03125, %v812_v12 }
 0x27d   : > { %v836_v13 = vcombine.low %v776_v10, %v785_v44  ;;  %v826_v46 = vmul.f32 0.03125, %v821_v42  ;;  %v1112_v10 = vstv %s4202_s0  ;;  %6419 = sst [smem:[#allocation54_spill]] %s4423_s11  ;;  %s4520_s0 = sld [smem:[#allocation8 + $0x1b]] }
 0x27f   : > { %v837_v49 = vrot.slane %v836_v13, 7  ;;  %v860_v51 = vcombine.low %v825_v45, %v826_v46  ;;  %v2045_v13 = vstv %s4208_s2  ;;  %6418 = sst [smem:[#allocation53_spill]] %s4419_s21  ;;  %s4488_s2 = sld [smem:[#allocation8 + $0x1f]] }
 0x280   : > { %6420 = sst [smem:[#allocation55_spill]] %s4425_s13 }
 0x281   : > { %v839_v52 = vsel %vm838_vm4, %v837_v49, %v835_v33  ;;  %v862_v54 = vrot.slane %v860_v51, 5  ;;  %vm1013_vm4 = vcmask 654336  }
 0x282   : > { %v841_v55 = vsel %vm840_vm5, %v837_v49, %v839_v52  ;;  %v1177_v49 = vstv %s4217_s4  ;;  %s4294_s4 = sld [smem:[#allocation8 + $0xd]]  ;;  %vm1050_vm5 = vcmask 523264  }
 0x283   : > { %842 = vrot.lane.b32.xlu1 %v841_v55, %s3674_s23  ;;  %v864_v56 = vsel %vm863_vm6, %v862_v54, %v861_v53  ;;  %vm1087_vm6 = vcmask 392192  }
 0x284   : > { %v866_v57 = vsel %vm865_vm7, %v862_v54, %v864_v56  ;;  %v2038_v56 = vstv %s4223_s5  ;;  %s4509_s5 = sld [smem:[#allocation8 + $0x20]]  ;;  %vm1124_vm7 = vcmask 261120  }
 0x285   : > { %867 = vrot.lane.b32.xlu0 %v866_v57, %s3674_s23  ;;  %s4187_s23 = sld [smem:[#allocation8 + $0x23]] }
 0x288   : > { %6406 = sst [smem:[#allocation47_spill]] %s4294_s4 }
 0x28b   : > { %v1075_v40 = vstv %s4187_s23  ;;  %s4608_s23 = sld [smem:[#allocation8 + $0x29]] }
 0x2f5   : > { %v843_v58 = vpop.permute.xlu1 %842 }
 0x2f6   : > { %v844_v17 = vrot.slane %v843_v58, 4 }
 0x2f7   : > { %v868_v8 = vpop.permute.xlu0 %867 }
 0x2f8   : > { %v846_v9 = vsel %vm845_vm10, %v844_v17, %v843_v58  ;;  %854 = vst.msk [vmem:[#allocation2 + $0x8] sm:$0x3] %vm853_vm11, %v844_v17  ;;  %v869_v22 = vrot.slane %v868_v8, 4  ;;  %v1170_v58 = vstv %s4227_s14  ;;  %v6177_v17 = vstv %s4229_s26  ;;  %s6407_s14 = smov 112   ;;  %s6415_s26 = smov 48  }
 0x2f9   : > { %852 = vst.msk [vmem:[#allocation2] sm:$0x33] %vm851_vm14, %v846_v9  ;;  %vm1745_vm11 = vcmask 1031168  }
 0x2fa   : > { %v870_v2 = vsel %vm845_vm10, %v869_v22, %v868_v8  ;;  %878 = vst.msk [vmem:[#allocation2 + $0x8] sm:$0xc] %vm877_vm15, %v869_v22  ;;  %vm1451_vm10 = vcmask 1039360   ;;  %vm2027_vm15 = vcmask 1022976  }
 0x2fb   : > { %876 = vst.msk [vmem:[#allocation2] sm:$0xcc] %vm875_vm0, %v870_v2 }
 0x2ff   : > { %v4163_v62 = vld [vmem:[#allocation2 + $0x8] sm:$0x3] }
 0x300   : > { %v923_v14 = vld [vmem:[#allocation2 + $0x8] sm:$0x3]  ;;  %v1488_v63 = vmul.f32 %v6194_v4, %v4163_v62  ;;  %v1528_v30 = vmul.f32 %v6193_v15, %v4163_v62  ;;  %v1568_v31 = vmul.f32 %v6192_v26, %v4163_v62  ;;  %v1608_v37 = vmul.f32 %v6184_v34, %v4163_v62  ;;  %v4381_v34 = vld [vmem:[#allocation2] sm:$0x33] }
 0x301   : > { %v926_v21 = vmul.f32 %v924_v23, %v923_v14  ;;  %v966_v27 = vmul.f32 %v964_v28, %v923_v14  ;;  %v1003_v32 = vmul.f32 %v1001_v11, %v923_v14  ;;  %v1040_v38 = vmul.f32 %v1038_v36, %v923_v14  ;;  %v4236_v5 = vld [vmem:[#allocation2 + $0x8] sm:$0xc]  ;;  %v4269_v51 = vld [vmem:[#allocation2 + $0x8] sm:$0x3]  ;;  %v4462_v26 = vld [vmem:[#allocation2] sm:$0x33] }
 0x302   : > { %1493 = vrot.lane.b32.xlu1 %v1488_v63, %s6152_s12  ;;  %v1648_v0 = vmul.f32 %v6183_v39, %v4163_v62  ;;  %v1077_v1 = vmul.f32 %v1075_v40, %v923_v14  ;;  %v1473_v12 = vmul.f32 %v1471_v6, %v4236_v5  ;;  %v4251_v42 = vld [vmem:[#allocation2 + $0x8] sm:$0xc]  ;;  %v1114_v46 = vmul.f32 %v1112_v10, %v923_v14  ;;  %v4271_v52 = vld [vmem:[#allocation2 + $0x8] sm:$0x3]  ;;  %v4470_v4 = vld [vmem:[#allocation2] sm:$0x33] }
 0x303   : > { %931 = vrot.lane.b32.xlu0 %v926_v21, %s6152_s12  ;;  %s4200_s12 = sld [smem:[#allocation8 + $0x2c]]  ;;  %v4266_v33 = vld [vmem:[#allocation2 + $0x8] sm:$0xc]  ;;  %v2047_v57 = vmul.f32 %v2045_v13, %v4251_v42  ;;  %v2062_v22 = vmul.f32 %v6178_v48, %v4269_v51  ;;  %v4301_v63 = vld [vmem:[#allocation2 + $0x8] sm:$0x3]  ;;  %v1232_v21 = vstv %s4241_s25  ;;  %s4553_s25 = sld [smem:[#allocation8 + $0x27]] }
 0x304   : > { %v3216_v54 = vrot.slane %v1473_v12, 10  ;;  %v1179_v9 = vmul.f32 %v1177_v49, %v4266_v33  ;;  %v2356_v12 = vmul.f32 %v6177_v17, %v4301_v63  ;;  %v4764_v50 = vld [vmem:[#allocation2 + $0x8] sm:$0xc] }
 0x305   : > { %v3272_v14 = vrot.slane %v2047_v57, 10 }
 0x306   : > { %1533 = vrot.lane.b32.xlu1 %v1528_v30, %s6154_s20  ;;  %v1172_v30 = vmul.f32 %v1170_v58, %v4271_v52 }
 0x307   : > { %971 = vrot.lane.b32.xlu0 %v966_v27, %s6154_s20  ;;  %s4206_s20 = sld [smem:[#allocation8 + $0x2]]  ;;  %v3188_v27 = vrot.slane %v1179_v9, 10 }
 0x309   : > { %6402 = sst [smem:[#allocation43_spill]] %s4200_s12  ;;  %v6179_v43 = vstv %s4200_s12  ;;  %s4417_s12 = sld [smem:[#allocation8 + $0x19]] }
 0x30a   : > { %1573 = vrot.lane.b32.xlu1 %v1568_v31, %s6156_s1  ;;  %v1688_v45 = vmul.f32 %v6179_v43, %v4163_v62  ;;  %v4305_v31 = vld [vmem:[#allocation2 + $0x8] sm:$0xc]  ;;  %v1352_v43 = vstv %s4328_s15  ;;  %s4586_s15 = sld [smem:[#allocation8 + $0x2d]] }
 0x30b   : > { %1008 = vrot.lane.b32.xlu0 %v1003_v32, %s6156_s1  ;;  %s4221_s1 = sld [smem:[#allocation8 + $0x8]] }
 0x30d   : > { %v1464_v44 = vstv %s4206_s20  ;;  %s4436_s20 = sld [smem:[#allocation8 + $0x14]] }
 0x30e   : > { %1613 = vrot.lane.b32.xlu1 %v1608_v37, %s6160_s6  ;;  %v1466_v55 = vmul.f32 %v1464_v44, %v4163_v62  ;;  %v2040_v62 = vmul.f32 %v2038_v56, %v4269_v51 }
 0x30f   : > { %1045 = vrot.lane.b32.xlu0 %v1040_v38, %s6160_s6  ;;  %s4243_s6 = sld [smem:[#allocation8 + $0x34]]  ;;  %v4312_v38 = vld [vmem:[#allocation2 + $0x8] sm:$0x3] }
 0x310   : > { %v4285_v8 = vadd.f32 %v3216_v54, %v1466_v55  ;;  %v4310_v37 = vadd.f32 %v3272_v14, %v2040_v62  ;;  %v1272_v55 = vstv %s4264_s8  ;;  %s4564_s8 = sld [smem:[#allocation8 + $0x22]] }
 0x311   : > { %v1192_v53 = vstv %s4221_s1  ;;  %v1274_v14 = vmul.f32 %v1272_v55, %v4271_v52  ;;  %s4542_s1 = sld [smem:[#allocation8 + $0x26]] }
 0x312   : > { %1653 = vrot.lane.b32.xlu1 %v1648_v0, %s6165_s10  ;;  %v1194_v2 = vmul.f32 %v1192_v53, %v4271_v52  ;;  %6408 = vst [vmem:[#allocation48_spill] sm:$0xff] %v4310_v37  ;;  %v4314_v0 = vadd.f32 %v3188_v27, %v1172_v30  ;;  %v4345_v27 = vld [vmem:[#allocation2 + $0x8] sm:$0x3] }
 0x313   : > { %1082 = vrot.lane.b32.xlu0 %v1077_v1, %s6165_s10  ;;  %s4262_s10 = sld [smem:[#allocation8 + $0x12]]  ;;  %v1758_v1 = vstv %s4254_s27  ;;  %s4349_s27 = sld [smem:[#allocation8 + $0x2b]] }
 0x314   : > { %v1760_v57 = vmul.f32 %v1758_v1, %v4312_v38 }
 0x315   : > { %v1765_v32 = vstv %s4243_s6  ;;  %s4326_s6 = sld [smem:[#allocation8 + $0x13]] }
 0x316   : > { %1693 = vrot.lane.b32.xlu1 %v1688_v45, %s6169_s24  ;;  %v1234_v45 = vmul.f32 %v1232_v21, %v4271_v52 }
 0x317   : > { %1119 = vrot.lane.b32.xlu0 %v1114_v46, %s6169_s24  ;;  %s4296_s24 = sld [smem:[#allocation8 + $0x1d]]  ;;  %v1767_v46 = vmul.f32 %v1765_v32, %v4305_v31 }
 0x319   : > { %6405 = sst [smem:[#allocation46_spill]] %s4262_s10  ;;  %v6176_v54 = vstv %s4262_s10  ;;  %v3244_v9 = vrot.slane %v1767_v46, 10  ;;  %s6413_s10 = smov 64   ;;  %v6199_v39 = vstv %s4349_s27 }
 0x31a   : > { %2067 = vrot.lane.b32.xlu1 %v2062_v22, %s6407_s14  ;;  %v4333_v22 = vld [vmem:[#allocation2] sm:$0x33]  ;;  %v2102_v62 = vmul.f32 %v6176_v54, %v4269_v51 }
 0x31b   : > { %1199 = vrot.lane.b32.xlu0 %v1194_v2, %s6407_s14  ;;  %6409 = sst [smem:[#allocation49_spill]] %s4326_s6  ;;  %v4335_v2 = vld [vmem:[#allocation2] sm:$0xcc]  ;;  %v4343_v30 = vadd.f32 %v3244_v9, %v1760_v57  ;;  %v1171_v46 = vmul.f32 %v1170_v58, %v4333_v22  ;;  %v6187_v48 = vstv %s4326_s6 }
 0x31c   : > { %v1178_v54 = vmul.f32 %v1177_v49, %v4335_v2  ;;  %v4371_v58 = vld [vmem:[#allocation2] sm:$0xcc]  ;;  %s4397_s6 = sld [smem:[#allocation8 + $0x18]] }
 0x31d   : > { %6411 = vst [vmem:[#allocation50_spill] sm:$0xff] %v4343_v30 }
 0x31e   : > { %2361 = vrot.lane.b32.xlu1 %v2356_v12, %s6407_s14  ;;  %v6182_v12 = vstv %s4294_s4  ;;  %v3187_v17 = vrot.slane %v1178_v54, 10  ;;  %v2396_v54 = vmul.f32 %v6187_v48, %v4301_v63  ;;  %s4383_s4 = sld [smem:[#allocation8 + $0x11]]  ;;  %v6197_v48 = vstv %s4363_s28 }
 0x31f   : > { %1239 = vrot.lane.b32.xlu0 %v1234_v45, %s6410_s7  ;;  %v1312_v45 = vstv %s4296_s24  ;;  %v2650_v57 = vmul.f32 %v6182_v12, %v4345_v27  ;;  %s4575_s24 = sld [smem:[#allocation8 + $0x28]] }
 0x320   : > { %v1314_v9 = vmul.f32 %v1312_v45, %v4271_v52  ;;  %v4369_v49 = vadd.f32 %v3187_v17, %v1171_v46  ;;  %v1766_v17 = vmul.f32 %v1765_v32, %v4371_v58  ;;  %v1394_v46 = vmul.f32 %v6199_v39, %v4271_v52 }
 0x322   : > { %2107 = vrot.lane.b32.xlu1 %v2102_v62, %s6410_s7  ;;  %v4365_v62 = vld [vmem:[#allocation2] sm:$0x33]  ;;  %6414 = vst [vmem:[#allocation51_spill] sm:$0xff] %v4369_v49 }
 0x323   : > { %1279 = vrot.lane.b32.xlu0 %v1274_v14, %s6412_s19  ;;  %v1354_v14 = vmul.f32 %v1352_v43, %v4271_v52  ;;  %v1759_v12 = vmul.f32 %v1758_v1, %v4365_v62  ;;  %v925_v1 = vmul.f32 %v924_v23, %v4381_v34  ;;  %v1782_v52 = vmul.f32 %v6197_v48, %v4312_v38 }
 0x324   : > { %v965_v23 = vmul.f32 %v964_v28, %v4381_v34 }
 0x326   : > { %2655 = vrot.lane.b32.xlu1 %v2650_v57, %s6407_s14  ;;  %v3243_v57 = vrot.slane %v1766_v17, 10 }
 0x327   : > { %1319 = vrot.lane.b32.xlu0 %v1314_v9, %s6413_s10  ;;  %v4394_v9 = vld [vmem:[#allocation2] sm:$0x33] }
 0x328   : > { %v4401_v32 = vadd.f32 %v3243_v57, %v1759_v12  ;;  %v1465_v17 = vmul.f32 %v1464_v44, %v4394_v9  ;;  %v1002_v44 = vmul.f32 %v1001_v11, %v4381_v34  ;;  %v4438_v57 = vld [vmem:[#allocation2] sm:$0xcc]  ;;  %v1039_v11 = vmul.f32 %v1038_v36, %v4381_v34 }
 0x329   : > { %v6201_v36 = vstv %s4423_s11  ;;  %s5163_s11 = sld [smem:[#allocation8 + $0x59]] }
 0x32a   : > { %2401 = vrot.lane.b32.xlu1 %v2396_v54, %s6410_s7  ;;  %v1469_v54 = vld [vmem:[#allocation2] sm:$0xcc]  ;;  %6417 = vst [vmem:[#allocation52_spill] sm:$0xff] %v4401_v32 }
 0x32b   : > { %1359 = vrot.lane.b32.xlu0 %v1354_v14, %s6415_s26  ;;  %v1472_v14 = vmul.f32 %v1471_v6, %v1469_v54  ;;  %v4442_v54 = vld [vmem:[#allocation2] sm:$0x33] }
 0x32d   : > { %v3215_v28 = vrot.slane %v1472_v14, 10  ;;  %v2046_v14 = vmul.f32 %v2045_v13, %v4438_v57  ;;  %v2039_v13 = vmul.f32 %v2038_v56, %v4442_v54 }
 0x32e   : > { %929 = vrot.lane.b32.xlu1 %v925_v1, %s6407_s14  ;;  %v6195_v1 = vstv %s4397_s6 }
 0x32f   : > { %1399 = vrot.lane.b32.xlu0 %v1394_v46, %s6416_s3  ;;  %v6196_v46 = vstv %s4383_s4  ;;  %v4433_v12 = vadd.f32 %v3215_v28, %v1465_v17  ;;  %v4454_v17 = vld [vmem:[#allocation2] sm:$0xcc]  ;;  %v6202_v28 = vstv %s4417_s12  ;;  %v3271_v15 = vrot.slane %v2046_v14, 10 }
 0x330   : > { %v1822_v6 = vmul.f32 %v6196_v46, %v4312_v38  ;;  %v2142_v48 = vmul.f32 %v6202_v28, %v4269_v51  ;;  %v2688_v14 = vstv %s4436_s20  ;;  %s4746_s20 = sld [smem:[#allocation8 + $0x2f]] }
 0x331   : > { %6421 = vst [vmem:[#allocation56_spill] sm:$0xff] %v4433_v12 }
 0x332   : > { %969 = vrot.lane.b32.xlu1 %v965_v23, %s6410_s7  ;;  %v6198_v23 = vstv %s4409_s9 }
 0x333   : > { %1787 = vrot.lane.b32.xlu0 %v1782_v52, %s6407_s14  ;;  %v1862_v52 = vmul.f32 %v6195_v1, %v4312_v38  ;;  %v6203_v1 = vstv %s4425_s13  ;;  %v2340_v46 = vmul.f32 %v6198_v23, %v4454_v17  ;;  %v2333_v23 = vmul.f32 %v6201_v36, %v4462_v26  ;;  %s4938_s13 = sld [smem:[#allocation8 + $0x5c]] }
 0x334   : > { %v1113_v36 = vmul.f32 %v1112_v10, %v4381_v34  ;;  %v1233_v10 = vmul.f32 %v1232_v21, %v4333_v22 }
 0x335   : > { %v3299_v39 = vrot.slane %v2340_v46, 10  ;;  %v2434_v46 = vstv %s4457_s16  ;;  %s4748_s16 = sld [smem:[#allocation8 + $0x3f]] }
 0x336   : > { %1006 = vrot.lane.b32.xlu1 %v1002_v44, %s6412_s19  ;;  %v4460_v44 = vld [vmem:[#allocation2] sm:$0xcc]  ;;  %v6213_v47 = vstv %s4746_s20 }
 0x337   : > { %1827 = vrot.lane.b32.xlu0 %v1822_v6, %s6410_s7  ;;  %v6200_v6 = vstv %s4419_s21  ;;  %s4956_s21 = sld [smem:[#allocation8 + $0x3b]] }
 0x338   : > { %v2634_v56 = vmul.f32 %v6200_v6, %v4460_v44  ;;  %v2690_v6 = vmul.f32 %v2688_v14, %v4345_v27 }
 0x33a   : > { %1043 = vrot.lane.b32.xlu1 %v1039_v11, %s6413_s10  ;;  %v4482_v11 = vadd.f32 %v3271_v15, %v2039_v13  ;;  %v2627_v15 = vmul.f32 %v6203_v1, %v4470_v4  ;;  %v4498_v13 = vadd.f32 %v3299_v39, %v2333_v23  ;;  %v2436_v39 = vmul.f32 %v2434_v46, %v4301_v63 }
 0x33b   : > { %1867 = vrot.lane.b32.xlu0 %v1862_v52, %s6412_s19  ;;  %v1076_v52 = vmul.f32 %v1075_v40, %v4381_v34  ;;  %v3327_v40 = vrot.slane %v2634_v56, 10  ;;  %v1900_v23 = vstv %s4488_s2  ;;  %v1313_v56 = vmul.f32 %v1312_v45, %v4333_v22  ;;  %s4750_s2 = sld [smem:[#allocation8 + $0x3a]] }
 0x33c   : > { %6422 = vst [vmem:[#allocation57_spill] sm:$0xff] %v4482_v11  ;;  %6423 = vst [vmem:[#allocation58_spill] sm:$0xff] %v4498_v13  ;;  %v1902_v34 = vmul.f32 %v1900_v23, %v4312_v38  ;;  %v4916_v13 = vld [vmem:[#allocation2 + $0x8] sm:$0xc] }
 0x33d   : > { %v4506_v28 = vadd.f32 %v3327_v40, %v2627_v15  ;;  %v2474_v15 = vstv %s4531_s30  ;;  %v1353_v40 = vmul.f32 %v1352_v43, %v4333_v22  ;;  %s4789_s30 = sld [smem:[#allocation8 + $0x4d]] }
 0x33e   : > { %1080 = vrot.lane.b32.xlu1 %v1076_v52, %s6415_s26  ;;  %v2728_v52 = vstv %s4520_s0  ;;  %s4769_s0 = sld [smem:[#allocation8 + $0x41]] }
 0x33f   : > { %2147 = vrot.lane.b32.xlu0 %v2142_v48, %s6412_s19  ;;  %6424 = vst [vmem:[#allocation59_spill] sm:$0xff] %v4506_v28  ;;  %v1193_v48 = vmul.f32 %v1192_v53, %v4333_v22  ;;  %v2730_v21 = vmul.f32 %v2728_v52, %v4345_v27 }
 0x341   : > { %v6460_v25 = vstv %s4750_s2 }
 0x342   : > { %1117 = vrot.lane.b32.xlu1 %v1113_v36, %s6416_s3  ;;  %v1273_v36 = vmul.f32 %v1272_v55, %v4333_v22  ;;  %v2476_v55 = vmul.f32 %v2474_v15, %v4301_v63 }
 0x343   : > { %2695 = vrot.lane.b32.xlu0 %v2690_v6, %s6410_s7  ;;  %v2180_v6 = vstv %s4509_s5  ;;  %s4767_s5 = sld [smem:[#allocation8 + $0x46]]  ;;  %v6221_v29 = vstv %s4789_s30 }
 0x344   : > { %v2182_v53 = vmul.f32 %v2180_v6, %v4269_v51 }
 0x346   : > { %1197 = vrot.lane.b32.xlu1 %v1193_v48, %s6407_s14  ;;  %v6425_v48 = vstv %s4349_s27  ;;  %s6453_s27 = sld [smem:[#allocation49_spill]] }
 0x347   : > { %2441 = vrot.lane.b32.xlu0 %v2436_v39, %s6412_s19  ;;  %v1940_v39 = vstv %s4542_s1  ;;  %s4791_s1 = sld [smem:[#allocation8 + $0x48]] }
 0x348   : > { %v1942_v45 = vmul.f32 %v1940_v39, %v4312_v38 }
 0x349   : > { %v6217_v24 = vstv %s4767_s5 }
 0x34a   : > { %1237 = vrot.lane.b32.xlu1 %v1233_v10, %s6410_s7  ;;  %v2220_v10 = vstv %s4553_s25  ;;  %s4810_s25 = sld [smem:[#allocation8 + $0x54]] }
 0x34b   : > { %1907 = vrot.lane.b32.xlu0 %v1902_v34, %s6413_s10  ;;  %v1393_v34 = vmul.f32 %v6425_v48, %v4333_v22  ;;  %v2222_v43 = vmul.f32 %v2220_v10, %v4269_v51  ;;  %v6428_v48 = vstv %s4397_s6  ;;  %s4732_s6 = sld [smem:[#allocation8 + $0x38]] }
 0x34e   : > { %1277 = vrot.lane.b32.xlu1 %v1273_v36, %s6412_s19 }
 0x34f   : > { %2187 = vrot.lane.b32.xlu0 %v2182_v53, %s6413_s10  ;;  %v6426_v53 = vstv %s4363_s28  ;;  %s4597_s28 = sld [smem:[#allocation8 + $0x2e]] }
 0x350   : > { %v1781_v36 = vmul.f32 %v6426_v53, %v4365_v62  ;;  %v6225_v19 = vstv %s4810_s25 }
 0x351   : > { %v6459_v41 = vstv %s4732_s6 }
 0x352   : > { %1317 = vrot.lane.b32.xlu1 %v1313_v56, %s6413_s10  ;;  %v6427_v56 = vstv %s4383_s4  ;;  %s6447_s4 = sld [smem:[#allocation47_spill]] }
 0x353   : > { %2735 = vrot.lane.b32.xlu0 %v2730_v21, %s6412_s19  ;;  %v2768_v21 = vstv %s4564_s8  ;;  %s4812_s8 = sld [smem:[#allocation8 + $0x4f]] }
 0x354   : > { %v2770_v22 = vmul.f32 %v2768_v21, %v4345_v27 }
 0x356   : > { %1357 = vrot.lane.b32.xlu1 %v1353_v40, %s6415_s26  ;;  %v2514_v40 = vstv %s4575_s24  ;;  %s4828_s24 = sld [smem:[#allocation8 + $0x5b]] }
 0x357   : > { %2481 = vrot.lane.b32.xlu0 %v2476_v55, %s6413_s10  ;;  %v1821_v55 = vmul.f32 %v6427_v56, %v4365_v62 }
 0x35a   : > { %1397 = vrot.lane.b32.xlu1 %v1393_v34, %s6416_s3  ;;  %v1861_v34 = vmul.f32 %v6428_v48, %v4365_v62  ;;  %v2435_v48 = vmul.f32 %v2434_v46, %v4462_v26 }
 0x35b   : > { %1947 = vrot.lane.b32.xlu0 %v1942_v45, %s6415_s26  ;;  %v2516_v45 = vmul.f32 %v2514_v40, %v4301_v63 }
 0x35c   : > { %v6230_v59 = vstv %s4828_s24 }
 0x35e   : > { %1785 = vrot.lane.b32.xlu1 %v1781_v36, %s6407_s14  ;;  %v6429_v36 = vstv %s4417_s12  ;;  %s6439_s12 = sld [smem:[#allocation44_spill]] }
 0x35f   : > { %2227 = vrot.lane.b32.xlu0 %v2222_v43, %s6415_s26  ;;  %v1980_v43 = vstv %s4586_s15  ;;  %v2141_v63 = vmul.f32 %v6429_v36, %v4442_v54  ;;  %s4830_s15 = sld [smem:[#allocation8 + $0x56]] }
 0x360   : > { %v1982_v53 = vmul.f32 %v1980_v43, %v4312_v38 }
 0x362   : > { %1825 = vrot.lane.b32.xlu1 %v1821_v55, %s6410_s7  ;;  %v2689_v55 = vmul.f32 %v2688_v14, %v4470_v4 }
 0x363   : > { %2775 = vrot.lane.b32.xlu0 %v2770_v22, %s6413_s10  ;;  %v2260_v22 = vstv %s4597_s28  ;;  %s4846_s28 = sld [smem:[#allocation8 + $0x39]] }
 0x364   : > { %v2262_v56 = vmul.f32 %v2260_v22, %v4269_v51 }
 0x366   : > { %1865 = vrot.lane.b32.xlu1 %v1861_v34, %s6412_s19  ;;  %v6431_v34 = vstv %s4147_s29  ;;  %s6434_s29 = sld [smem:[#allocation42_spill]] }
 0x367   : > { %2521 = vrot.lane.b32.xlu0 %v2516_v45, %s6415_s26  ;;  %v6204_v45 = vstv %s4608_s23  ;;  %6454 = sst [smem:[#allocation42_spill]] %s4746_s20  ;;  %s4922_s20 = sld [smem:[#allocation8 + $0x3e]] }
 0x368   : > { %v2810_v38 = vmul.f32 %v6204_v45, %v4345_v27  ;;  %v1901_v27 = vmul.f32 %v1900_v23, %v4365_v62  ;;  %v2729_v23 = vmul.f32 %v2728_v52, %v4470_v4  ;;  %v6438_v52 = vstv %s4172_s22  ;;  %s6443_s22 = sld [smem:[#allocation46_spill]] }
 0x369   : > { %v6231_v61 = vstv %s4846_s28 }
 0x36a   : > { %2145 = vrot.lane.b32.xlu1 %v2141_v63, %s6412_s19  ;;  %v6433_v63 = vstv %s4152_s17  ;;  %s6437_s17 = sld [smem:[#allocation43_spill]] }
 0x36b   : > { %1987 = vrot.lane.b32.xlu0 %v1982_v53, %s6416_s3  ;;  %v1487_v53 = vmul.f32 %v6431_v34, %v4394_v9  ;;  %v6436_v34 = vstv %s4159_s18  ;;  %s6441_s18 = sld [smem:[#allocation45_spill]] }
 0x36d   : > { %6467 = sst [smem:[#allocation44_spill]] %s4922_s20 }
 0x36e   : > { %2693 = vrot.lane.b32.xlu1 %v2689_v55, %s6410_s7  ;;  %v2181_v55 = vmul.f32 %v2180_v6, %v4442_v54  ;;  %v2475_v6 = vmul.f32 %v2474_v15, %v4462_v26 }
 0x36f   : > { %2267 = vrot.lane.b32.xlu0 %v2262_v56, %s6416_s3  ;;  %v1527_v56 = vmul.f32 %v6433_v63, %v4394_v9 }
 0x372   : > { %2439 = vrot.lane.b32.xlu1 %v2435_v48, %s6412_s19 }
 0x373   : > { %2815 = vrot.lane.b32.xlu0 %v2810_v38, %s6415_s26 }
 0x374   : > { %v4638_v51 = vpop.permute.xlu1 %1493 }
 0x375   : > { %6430 = vst [vmem:[#allocation60_spill] sm:$0xff] %v4638_v51  ;;  %v4640_v14 = vpop.permute.xlu0 %931 }
 0x376   : > { %1905 = vrot.lane.b32.xlu1 %v1901_v27, %s6413_s10 }
 0x377   : > { %1491 = vrot.lane.b32.xlu0 %v1487_v53, %s6407_s14  ;;  %v1567_v53 = vmul.f32 %v6436_v34, %v4394_v9 }
 0x378   : > { %v4650_v46 = vpop.permute.xlu1 %1533 }
 0x379   : > { %6432 = vst [vmem:[#allocation61_spill] sm:$0xff] %v4650_v46  ;;  %v4652_v36 = vpop.permute.xlu0 %971 }
 0x37a   : > { %2185 = vrot.lane.b32.xlu1 %v2181_v55, %s6413_s10  ;;  %v6440_v55 = vstv %s6434_s29  ;;  %s4864_s29 = sld [smem:[#allocation8 + $0x40]] }
 0x37b   : > { %1531 = vrot.lane.b32.xlu0 %v1527_v56, %s6410_s7  ;;  %v1607_v56 = vmul.f32 %v6438_v52, %v4394_v9  ;;  %v1647_v34 = vmul.f32 %v6440_v55, %v4394_v9  ;;  %v6442_v52 = vstv %s6437_s17  ;;  %s4866_s17 = sld [smem:[#allocation8 + $0x3c]] }
 0x37c   : > { %v4665_v38 = vpop.permute.xlu1 %1573 }
 0x37d   : > { %6435 = vst [vmem:[#allocation62_spill] sm:$0xff] %v4665_v38  ;;  %v4667_v48 = vpop.permute.xlu0 %1008 }
 0x37e   : > { %2733 = vrot.lane.b32.xlu1 %v2729_v23, %s6412_s19  ;;  %v1941_v23 = vmul.f32 %v1940_v39, %v4365_v62  ;;  %v6444_v39 = vstv %s6439_s12  ;;  %s4882_s12 = sld [smem:[#allocation8 + $0x47]] }
 0x37f   : > { %1571 = vrot.lane.b32.xlu0 %v1567_v53, %s6412_s19 }
 0x380   : > { %v4677_v27 = vpop.permute.xlu1 %1613  ;;  %v6234_v28 = vstv %s4864_s29 }
 0x381   : > { %v4679_v63 = vpop.permute.xlu0 %1045 }
 0x382   : > { %2479 = vrot.lane.b32.xlu1 %v2475_v6, %s6413_s10  ;;  %v2221_v6 = vmul.f32 %v2220_v10, %v4442_v54  ;;  %v6446_v10 = vstv %s6441_s18  ;;  %s4884_s18 = sld [smem:[#allocation8 + $0x3d]] }
 0x383   : > { %1611 = vrot.lane.b32.xlu0 %v1607_v56, %s6413_s10  ;;  %v1687_v56 = vmul.f32 %v6442_v52, %v4394_v9 }
 0x384   : > { %v4692_v15 = vpop.permute.xlu1 %1653 }
 0x385   : > { %v4694_v53 = vpop.permute.xlu0 %1082 }
 0x386   : > { %1945 = vrot.lane.b32.xlu1 %v1941_v23, %s6415_s26  ;;  %v2769_v23 = vmul.f32 %v2768_v21, %v4470_v4  ;;  %v6450_v21 = vstv %s6443_s22  ;;  %s4900_s22 = sld [smem:[#allocation8 + $0x4e]] }
 0x387   : > { %1651 = vrot.lane.b32.xlu0 %v1647_v34, %s6415_s26  ;;  %v2061_v34 = vmul.f32 %v6444_v39, %v4442_v54 }
 0x388   : > { %v4704_v55 = vpop.permute.xlu1 %1693  ;;  %v6469_v11 = vstv %s4884_s18 }
 0x389   : > { %v4706_v1 = vpop.permute.xlu0 %1119  ;;  %v2373_v12 = vmul.f32 %v6469_v11, %v4916_v13 }
 0x38a   : > { %2225 = vrot.lane.b32.xlu1 %v2221_v6, %s6415_s26  ;;  %v2515_v6 = vmul.f32 %v2514_v40, %v4462_v26 }
 0x38b   : > { %1691 = vrot.lane.b32.xlu0 %v1687_v56, %s6416_s3  ;;  %v2355_v56 = vmul.f32 %v6446_v10, %v4462_v26 }
 0x38c   : > { %v4716_v9 = vpop.permute.xlu1 %2067  ;;  %v6242_v32 = vstv %s4900_s22 }
 0x38d   : > { %6445 = vst [vmem:[#allocation63_spill] sm:$0xff] %v4716_v9  ;;  %v4718_v52 = vpop.permute.xlu0 %1199  ;;  %v1331_v11 = vmul.f32 %v6242_v32, %v4266_v33  ;;  %v6255_v9 = vstv %s4956_s21 }
 0x38e   : > { %2773 = vrot.lane.b32.xlu1 %v2769_v23, %s6413_s10  ;;  %v1981_v23 = vmul.f32 %v1980_v43, %v4365_v62  ;;  %v2261_v43 = vmul.f32 %v2260_v22, %v4442_v54  ;;  %v6458_v22 = vstv %s4608_s23  ;;  %s4848_s23 = sld [smem:[#allocation8 + $0x5d]] }
 0x38f   : > { %2065 = vrot.lane.b32.xlu0 %v2061_v34, %s6407_s14  ;;  %v2101_v34 = vmul.f32 %v6450_v21, %v4442_v54 }
 0x390   : > { %v4728_v39 = vpop.permute.xlu1 %2361 }
 0x391   : > { %6448 = vst [vmem:[#allocation64_spill] sm:$0xff] %v4728_v39  ;;  %v4730_v45 = vpop.permute.xlu0 %1239 }
 0x392   : > { %6449 = vst [vmem:[#allocation65_spill] sm:$0xff] %v4730_v45  ;;  %2519 = vrot.lane.b32.xlu1 %v2515_v6, %s6415_s26 }
 0x393   : > { %2359 = vrot.lane.b32.xlu0 %v2355_v56, %s6407_s14  ;;  %v6455_v56 = vstv %s6447_s4  ;;  %s4902_s4 = sld [smem:[#allocation8 + $0x43]] }
 0x394   : > { %v4742_v10 = vpop.permute.xlu1 %2107  ;;  %v2649_v62 = vmul.f32 %v6455_v56, %v4470_v4 }
 0x395   : > { %6451 = vst [vmem:[#allocation66_spill] sm:$0xff] %v4742_v10  ;;  %v4744_v40 = vpop.permute.xlu0 %1279  ;;  %v6253_v10 = vstv %s4938_s13 }
 0x396   : > { %6452 = vst [vmem:[#allocation67_spill] sm:$0xff] %v4744_v40  ;;  %1985 = vrot.lane.b32.xlu1 %v1981_v23, %s6416_s3  ;;  %v2809_v23 = vmul.f32 %v6458_v22, %v4470_v4 }
 0x397   : > { %2105 = vrot.lane.b32.xlu0 %v2101_v34, %s6410_s7  ;;  %v6457_v34 = vstv %s6453_s27  ;;  %s4920_s27 = sld [smem:[#allocation8 + $0x55]] }
 0x398   : > { %v4760_v6 = vpop.permute.xlu1 %2655  ;;  %v2395_v54 = vmul.f32 %v6457_v34, %v4462_v26 }
 0x399   : > { %6456 = vst [vmem:[#allocation68_spill] sm:$0xff] %v4760_v6  ;;  %v4762_v21 = vpop.permute.xlu0 %1319  ;;  %6465 = sst [smem:[#allocation43_spill]] %s4902_s4 }
 0x39a   : > { %2265 = vrot.lane.b32.xlu1 %v2261_v43, %s6416_s3  ;;  %v6214_v43 = vstv %s4748_s16 }
 0x39b   : > { %2653 = vrot.lane.b32.xlu0 %v2649_v62, %s6407_s14  ;;  %v945_v62 = vmul.f32 %v6459_v41, %v4764_v50  ;;  %v2555_v41 = vmul.f32 %v6213_v47, %v4462_v26  ;;  %v982_v7 = vmul.f32 %v6214_v43, %v4764_v50 }
 0x39c   : > { %v4779_v56 = vpop.permute.xlu1 %2401 }
 0x39d   : > { %v4781_v18 = vpop.permute.xlu0 %1359  ;;  %v3164_v35 = vrot.slane %v945_v62, 10  ;;  %v3168_v47 = vrot.slane %v982_v7, 10 }
 0x39e   : > { %2813 = vrot.lane.b32.xlu1 %v2809_v23, %s6415_s26  ;;  %v6218_v23 = vstv %s4769_s0 }
 0x39f   : > { %2399 = vrot.lane.b32.xlu0 %v2395_v54, %s6410_s7  ;;  %v1505_v54 = vmul.f32 %v6460_v25, %v4236_v5  ;;  %v1019_v25 = vmul.f32 %v6217_v24, %v4764_v50  ;;  %v1545_v3 = vmul.f32 %v6218_v23, %v4236_v5  ;;  %v1056_v23 = vmul.f32 %v6221_v29, %v4764_v50 }
 0x3a0   : > { %v4797_v22 = vpop.permute.xlu1 %929 }
 0x3a1   : > { %v4795_v34 = vpop.permute.xlu0 %1399  ;;  %v3220_v43 = vrot.slane %v1505_v54, 10  ;;  %v3172_v54 = vrot.slane %v1019_v25, 10  ;;  %v3224_v24 = vrot.slane %v1545_v3, 10  ;;  %v3176_v25 = vrot.slane %v1056_v23, 10 }
 0x3a2   : > { %2559 = vrot.lane.b32.xlu1 %v2555_v41, %s6416_s3 }
 0x3a3   : > { %954 = vrot.lane.b32.xlu0 %v3164_v35, %s6407_s14  ;;  %v6222_v35 = vstv %s4791_s1 }
 0x3a4   : > { %v4818_v26 = vpop.permute.xlu1 %969  ;;  %v1585_v20 = vmul.f32 %v6222_v35, %v4236_v5  ;;  %v1093_v35 = vmul.f32 %v6225_v19, %v4764_v50 }
 0x3a5   : > { %v4816_v62 = vpop.permute.xlu0 %1787 }
 0x3a6   : > { %6461 = vst [vmem:[#allocation69_spill] sm:$0xff] %v4816_v62  ;;  %1514 = vrot.lane.b32.xlu1 %v3220_v43, %s6407_s14  ;;  %v3228_v29 = vrot.slane %v1585_v20, 10  ;;  %v3180_v23 = vrot.slane %v1093_v35, 10 }
 0x3a7   : > { %991 = vrot.lane.b32.xlu0 %v3168_v47, %s6410_s7  ;;  %v6226_v47 = vstv %s4812_s8 }
 0x3a8   : > { %v4836_v41 = vpop.permute.xlu1 %1006  ;;  %v1625_v60 = vmul.f32 %v6226_v47, %v4236_v5  ;;  %v1130_v47 = vmul.f32 %v6230_v59, %v4764_v50 }
 0x3a9   : > { %v4834_v7 = vpop.permute.xlu0 %1827 }
 0x3aa   : > { %6462 = vst [vmem:[#allocation70_spill] sm:$0xff] %v4834_v7  ;;  %1554 = vrot.lane.b32.xlu1 %v3224_v24, %s6410_s7  ;;  %v3232_v19 = vrot.slane %v1625_v60, 10  ;;  %v3184_v50 = vrot.slane %v1130_v47, 10  ;;  %v941_v7 = vld [vmem:[#allocation2] sm:$0xcc] }
 0x3ab   : > { %1028 = vrot.lane.b32.xlu0 %v3172_v54, %s6412_s19  ;;  %v6229_v54 = vstv %s4830_s15 }
 0x3ac   : > { %v4854_v3 = vpop.permute.xlu1 %1043  ;;  %v1665_v16 = vmul.f32 %v6229_v54, %v4236_v5  ;;  %v1211_v54 = vmul.f32 %v6231_v61, %v4266_v33 }
 0x3ad   : > { %v4852_v43 = vpop.permute.xlu0 %1867 }
 0x3ae   : > { %6463 = vst [vmem:[#allocation71_spill] sm:$0xff] %v4852_v43  ;;  %1594 = vrot.lane.b32.xlu1 %v3228_v29, %s6412_s19  ;;  %v3236_v35 = vrot.slane %v1665_v16, 10  ;;  %v3192_v47 = vrot.slane %v1211_v54, 10  ;;  %v6248_v43 = vstv %s4922_s20  ;;  %s4985_s20 = sld [smem:[#allocation8 + $0x44]] }
 0x3af   : > { %1065 = vrot.lane.b32.xlu0 %v3176_v25, %s6413_s10  ;;  %v6232_v25 = vstv %s4848_s23 }
 0x3b0   : > { %v4872_v20 = vpop.permute.xlu1 %1080  ;;  %v1705_v59 = vmul.f32 %v6232_v25, %v4236_v5  ;;  %v1251_v5 = vmul.f32 %v6234_v28, %v4266_v33 }
 0x3b1   : > { %v4870_v24 = vpop.permute.xlu0 %2147 }
 0x3b2   : > { %6464 = vst [vmem:[#allocation72_spill] sm:$0xff] %v4870_v24  ;;  %1634 = vrot.lane.b32.xlu1 %v3232_v19, %s6413_s10  ;;  %v3240_v61 = vrot.slane %v1705_v59, 10  ;;  %v3196_v28 = vrot.slane %v1251_v5, 10  ;;  %v4952_v24 = vld [vmem:[#allocation2 + $0x8] sm:$0xc] }
 0x3b3   : > { %1102 = vrot.lane.b32.xlu0 %v3180_v23, %s6415_s26  ;;  %v6235_v23 = vstv %s4866_s17 }
 0x3b4   : > { %v4890_v60 = vpop.permute.xlu1 %1117  ;;  %v2079_v25 = vmul.f32 %v6235_v23, %v4251_v42 }
 0x3b5   : > { %v4888_v29 = vpop.permute.xlu0 %2695 }
 0x3b6   : > { %1674 = vrot.lane.b32.xlu1 %v3236_v35, %s6415_s26  ;;  %v3276_v23 = vrot.slane %v2079_v25, 10 }
 0x3b7   : > { %1139 = vrot.lane.b32.xlu0 %v3184_v50, %s6416_s3  ;;  %v6237_v50 = vstv %s4882_s12 }
 0x3b8   : > { %v4908_v16 = vpop.permute.xlu1 %1197  ;;  %v1291_v35 = vmul.f32 %v6237_v50, %v4266_v33  ;;  %v3304_v50 = vrot.slane %v2373_v12, 10 }
 0x3b9   : > { %v4906_v19 = vpop.permute.xlu0 %2441 }
 0x3ba   : > { %6466 = vst [vmem:[#allocation73_spill] sm:$0xff] %v4906_v19  ;;  %1714 = vrot.lane.b32.xlu1 %v3240_v61, %s6416_s3  ;;  %v3200_v25 = vrot.slane %v1291_v35, 10  ;;  %v3204_v35 = vrot.slane %v1331_v11, 10 }
 0x3bb   : > { %1220 = vrot.lane.b32.xlu0 %v3192_v47, %s6407_s14  ;;  %v6243_v47 = vstv %s4902_s4  ;;  %s4971_s4 = sld [smem:[#allocation8 + $0x42]] }
 0x3bc   : > { %v4928_v54 = vpop.permute.xlu1 %1237 }
 0x3bd   : > { %v4926_v59 = vpop.permute.xlu0 %1907 }
 0x3be   : > { %6468 = vst [vmem:[#allocation74_spill] sm:$0xff] %v4926_v59  ;;  %2088 = vrot.lane.b32.xlu1 %v3276_v23, %s6407_s14  ;;  %v2119_v59 = vmul.f32 %v6243_v47, %v4251_v42 }
 0x3bf   : > { %1260 = vrot.lane.b32.xlu0 %v3196_v28, %s6410_s7  ;;  %v6249_v28 = vstv %s4920_s27 }
 0x3c0   : > { %v4944_v5 = vpop.permute.xlu1 %1277  ;;  %v3280_v32 = vrot.slane %v2119_v59, 10  ;;  %v1371_v47 = vmul.f32 %v6249_v28, %v4266_v33  ;;  %v6476_v28 = vstv %s4732_s6  ;;  %s4999_s6 = sld [smem:[#allocation8 + $0x49]] }
 0x3c1   : > { %v4942_v61 = vpop.permute.xlu0 %2187  ;;  %6471 = vst [vmem:[#allocation76_spill] sm:$0xff] %v4944_v5 }
 0x3c2   : > { %6470 = vst [vmem:[#allocation75_spill] sm:$0xff] %v4942_v61  ;;  %2382 = vrot.lane.b32.xlu1 %v3304_v50, %s6407_s14  ;;  %v2667_v61 = vmul.f32 %v6248_v43, %v4952_v24  ;;  %v1411_v43 = vmul.f32 %v6253_v10, %v4266_v33  ;;  %v1799_v33 = vmul.f32 %v6255_v9, %v4305_v31 }
 0x3c3   : > { %1300 = vrot.lane.b32.xlu0 %v3200_v25, %s6412_s19  ;;  %v3208_v25 = vrot.slane %v1371_v47, 10 }
 0x3c4   : > { %v4962_v12 = vpop.permute.xlu1 %1317  ;;  %v3332_v11 = vrot.slane %v2667_v61, 10  ;;  %v3212_v47 = vrot.slane %v1411_v43, 10  ;;  %v3248_v43 = vrot.slane %v1799_v33, 10 }
 0x3c5   : > { %v4960_v23 = vpop.permute.xlu0 %2735  ;;  %6473 = vst [vmem:[#allocation78_spill] sm:$0xff] %v4962_v12 }
 0x3c6   : > { %6472 = vst [vmem:[#allocation77_spill] sm:$0xff] %v4960_v23  ;;  %2128 = vrot.lane.b32.xlu1 %v3280_v32, %s6410_s7  ;;  %v944_v23 = vmul.f32 %v6476_v28, %v941_v7  ;;  %v6479_v28 = vstv %s4748_s16  ;;  %s5013_s16 = sld [smem:[#allocation8 + $0x4a]] }
 0x3c7   : > { %1340 = vrot.lane.b32.xlu0 %v3204_v35, %s6413_s10  ;;  %v981_v10 = vmul.f32 %v6479_v28, %v941_v7  ;;  %v6482_v28 = vstv %s4767_s5  ;;  %s5027_s5 = sld [smem:[#allocation8 + $0x45]] }
 0x3c8   : > { %v4977_v59 = vpop.permute.xlu1 %1357  ;;  %v3163_v61 = vrot.slane %v944_v23, 10 }
 0x3c9   : > { %v4975_v50 = vpop.permute.xlu0 %2481  ;;  %6475 = vst [vmem:[#allocation80_spill] sm:$0xff] %v4977_v59  ;;  %v3167_v23 = vrot.slane %v981_v10, 10 }
 0x3ca   : > { %6474 = vst [vmem:[#allocation79_spill] sm:$0xff] %v4975_v50  ;;  %2676 = vrot.lane.b32.xlu1 %v3332_v11, %s6407_s14  ;;  %v6258_v50 = vstv %s4971_s4 }
 0x3cb   : > { %1380 = vrot.lane.b32.xlu0 %v3208_v25, %s6415_s26  ;;  %v1839_v9 = vmul.f32 %v6258_v50, %v4305_v31 }
 0x3cc   : > { %v4991_v35 = vpop.permute.xlu1 %1397 }
 0x3cd   : > { %v4989_v32 = vpop.permute.xlu0 %1947  ;;  %6478 = vst [vmem:[#allocation82_spill] sm:$0xff] %v4991_v35  ;;  %v6261_v35 = vstv %s4985_s20  ;;  %v3252_v10 = vrot.slane %v1839_v9, 10 }
 0x3ce   : > { %6477 = vst [vmem:[#allocation81_spill] sm:$0xff] %v4989_v32  ;;  %952 = vrot.lane.b32.xlu1 %v3163_v61, %s6407_s14  ;;  %v1018_v32 = vmul.f32 %v6482_v28, %v941_v7  ;;  %v2413_v50 = vmul.f32 %v6261_v35, %v4916_v13  ;;  %v6485_v28 = vstv %s4789_s30  ;;  %s5041_s30 = sld [smem:[#allocation8 + $0x4b]] }
 0x3cf   : > { %1420 = vrot.lane.b32.xlu0 %v3212_v47, %s6416_s3 }
 0x3d0   : > { %v5005_v11 = vpop.permute.xlu1 %1785  ;;  %v3171_v33 = vrot.slane %v1018_v32, 10  ;;  %v3308_v9 = vrot.slane %v2413_v50, 10 }
 0x3d1   : > { %v5003_v25 = vpop.permute.xlu0 %2227  ;;  %6481 = vst [vmem:[#allocation84_spill] sm:$0xff] %v5005_v11  ;;  %v6264_v11 = vstv %s4999_s6 }
 0x3d2   : > { %6480 = vst [vmem:[#allocation83_spill] sm:$0xff] %v5003_v25  ;;  %989 = vrot.lane.b32.xlu1 %v3167_v23, %s6410_s7  ;;  %v1055_v25 = vmul.f32 %v6485_v28, %v941_v7  ;;  %v1879_v35 = vmul.f32 %v6264_v11, %v4305_v31  ;;  %v6488_v28 = vstv %s4810_s25  ;;  %s5055_s25 = sld [smem:[#allocation8 + $0x50]] }
 0x3d3   : > { %1808 = vrot.lane.b32.xlu0 %v3248_v43, %s6407_s14 }
 0x3d4   : > { %v5019_v61 = vpop.permute.xlu1 %1825  ;;  %v3175_v32 = vrot.slane %v1055_v25, 10  ;;  %v3256_v50 = vrot.slane %v1879_v35, 10 }
 0x3d5   : > { %v5017_v47 = vpop.permute.xlu0 %2775  ;;  %6484 = vst [vmem:[#allocation86_spill] sm:$0xff] %v5019_v61  ;;  %v6267_v61 = vstv %s5013_s16 }
 0x3d6   : > { %6483 = vst [vmem:[#allocation85_spill] sm:$0xff] %v5017_v47  ;;  %1026 = vrot.lane.b32.xlu1 %v3171_v33, %s6412_s19  ;;  %v1092_v47 = vmul.f32 %v6488_v28, %v941_v7  ;;  %v2159_v11 = vmul.f32 %v6267_v61, %v4251_v42  ;;  %v6491_v28 = vstv %s4828_s24  ;;  %v6271_v61 = vstv %s5041_s30  ;;  %s5070_s24 = sld [smem:[#allocation8 + $0x51]] }
 0x3d7   : > { %1848 = vrot.lane.b32.xlu0 %v3252_v10, %s6410_s7 }
 0x3d8   : > { %v5033_v23 = vpop.permute.xlu1 %1865  ;;  %v3179_v25 = vrot.slane %v1092_v47, 10  ;;  %v3284_v35 = vrot.slane %v2159_v11, 10 }
 0x3d9   : > { %v5031_v43 = vpop.permute.xlu0 %2521  ;;  %6487 = vst [vmem:[#allocation88_spill] sm:$0xff] %v5033_v23  ;;  %v6268_v23 = vstv %s5027_s5 }
 0x3da   : > { %6486 = vst [vmem:[#allocation87_spill] sm:$0xff] %v5031_v43  ;;  %1063 = vrot.lane.b32.xlu1 %v3175_v32, %s6413_s10  ;;  %v1129_v43 = vmul.f32 %v6491_v28, %v941_v7  ;;  %v2707_v42 = vmul.f32 %v6268_v23, %v4952_v24  ;;  %v6494_v7 = vstv %s4846_s28  ;;  %v2453_v23 = vmul.f32 %v6271_v61, %v4916_v13  ;;  %s5085_s28 = sld [smem:[#allocation8 + $0x4c]] }
 0x3db   : > { %2422 = vrot.lane.b32.xlu0 %v3308_v9, %s6410_s7  ;;  %v1210_v28 = vmul.f32 %v6494_v7, %v4335_v2  ;;  %v6497_v7 = vstv %s4864_s29  ;;  %s5100_s29 = sld [smem:[#allocation8 + $0x52]] }
 0x3dc   : > { %v5047_v33 = vpop.permute.xlu1 %2145  ;;  %v3183_v47 = vrot.slane %v1129_v43, 10  ;;  %v3336_v43 = vrot.slane %v2707_v42, 10  ;;  %v3312_v42 = vrot.slane %v2453_v23, 10 }
 0x3dd   : > { %v5045_v10 = vpop.permute.xlu0 %1987  ;;  %6490 = vst [vmem:[#allocation90_spill] sm:$0xff] %v5047_v33 }
 0x3de   : > { %6489 = vst [vmem:[#allocation89_spill] sm:$0xff] %v5045_v10  ;;  %1100 = vrot.lane.b32.xlu1 %v3179_v25, %s6415_s26  ;;  %v3191_v25 = vrot.slane %v1210_v28, 10 }
 0x3df   : > { %1888 = vrot.lane.b32.xlu0 %v3256_v50, %s6412_s19 }
 0x3e0   : > { %v5061_v32 = vpop.permute.xlu1 %2693 }
 0x3e1   : > { %v5059_v9 = vpop.permute.xlu0 %2267  ;;  %6493 = vst [vmem:[#allocation92_spill] sm:$0xff] %v5061_v32  ;;  %v6274_v32 = vstv %s5055_s25  ;;  %v6283_v33 = vstv %s5100_s29 }
 0x3e2   : > { %6492 = vst [vmem:[#allocation91_spill] sm:$0xff] %v5059_v9  ;;  %1137 = vrot.lane.b32.xlu1 %v3183_v47, %s6416_s3  ;;  %v1250_v9 = vmul.f32 %v6497_v7, %v4335_v2  ;;  %v1919_v61 = vmul.f32 %v6274_v32, %v4305_v31  ;;  %v6500_v7 = vstv %s4882_s12  ;;  %v5108_v31 = vld [vmem:[#allocation2 + $0x8] sm:$0xc]  ;;  %v6503_v32 = vstv %s4900_s22  ;;  %s5117_s12 = sld [smem:[#allocation8 + $0x57]]  ;;  %s5132_s22 = sld [smem:[#allocation8 + $0x58]] }
 0x3e3   : > { %2168 = vrot.lane.b32.xlu0 %v3284_v35, %s6412_s19 }
 0x3e4   : > { %v5076_v11 = vpop.permute.xlu1 %2439  ;;  %v3195_v28 = vrot.slane %v1250_v9, 10  ;;  %v3260_v23 = vrot.slane %v1919_v61, 10 }
 0x3e5   : > { %v5074_v50 = vpop.permute.xlu0 %2815  ;;  %6496 = vst [vmem:[#allocation94_spill] sm:$0xff] %v5076_v11  ;;  %v6277_v11 = vstv %s5070_s24 }
 0x3e6   : > { %6495 = vst [vmem:[#allocation93_spill] sm:$0xff] %v5074_v50  ;;  %1218 = vrot.lane.b32.xlu1 %v3191_v25, %s6407_s14  ;;  %v1290_v50 = vmul.f32 %v6500_v7, %v4335_v2  ;;  %v2199_v7 = vmul.f32 %v5108_v31, %v6277_v11 }
 0x3e7   : > { %2716 = vrot.lane.b32.xlu0 %v3336_v43, %s6410_s7 }
 0x3e8   : > { %v5091_v47 = vpop.permute.xlu1 %1905  ;;  %v3199_v9 = vrot.slane %v1290_v50, 10  ;;  %v3288_v50 = vrot.slane %v2199_v7, 10 }
 0x3e9   : > { %v5089_v35 = vpop.permute.xlu0 %1491  ;;  %6499 = vst [vmem:[#allocation96_spill] sm:$0xff] %v5091_v47  ;;  %v1330_v47 = vmul.f32 %v6503_v32, %v4335_v2  ;;  %v6506_v32 = vstv %s4920_s27  ;;  %s5147_s27 = sld [smem:[#allocation8 + $0x53]] }
 0x3ea   : > { %6498 = vst [vmem:[#allocation95_spill] sm:$0xff] %v5089_v35  ;;  %1258 = vrot.lane.b32.xlu1 %v3195_v28, %s6410_s7  ;;  %v6542_v35 = vstv %s5085_s28 }
 0x3eb   : > { %2462 = vrot.lane.b32.xlu0 %v3312_v42, %s6412_s19  ;;  %v6280_v42 = vstv %s5085_s28  ;;  %v2746_v10 = vmul.f32 %v6542_v35, %v4460_v44  ;;  %v6545_v35 = vstv %s4866_s17  ;;  %s5390_s17 = sld [smem:[#allocation8 + $0x61]] }
 0x3ec   : > { %v5106_v25 = vpop.permute.xlu1 %2185  ;;  %v2747_v11 = vmul.f32 %v6280_v42, %v4952_v24  ;;  %v2493_v42 = vmul.f32 %v6283_v33, %v4916_v13  ;;  %v3506_v33 = vld [vmem:[#allocation2 + $0x8] sm:$0xc] }
 0x3ed   : > { %v5104_v43 = vpop.permute.xlu0 %1531  ;;  %6502 = vst [vmem:[#allocation98_spill] sm:$0xff] %v5106_v25  ;;  %v3203_v25 = vrot.slane %v1330_v47, 10  ;;  %v3339_v37 = vrot.slane %v2746_v10, 10 }
 0x3ee   : > { %6501 = vst [vmem:[#allocation97_spill] sm:$0xff] %v5104_v43  ;;  %1298 = vrot.lane.b32.xlu1 %v3199_v9, %s6412_s19  ;;  %v1370_v43 = vmul.f32 %v6506_v32, %v4335_v2  ;;  %v3340_v47 = vrot.slane %v2747_v11, 10  ;;  %v6509_v32 = vstv %s4938_s13  ;;  %v3316_v11 = vrot.slane %v2493_v42, 10  ;;  %s5161_s13 = sld [smem:[#allocation8 + $0x30]] }
 0x3ef   : > { %1928 = vrot.lane.b32.xlu0 %v3260_v23, %s6413_s10 }
 0x3f0   : > { %v5123_v61 = vpop.permute.xlu1 %2733  ;;  %v3207_v7 = vrot.slane %v1370_v43, 10 }
 0x3f1   : > { %v5121_v28 = vpop.permute.xlu0 %1571  ;;  %6505 = vst [vmem:[#allocation100_spill] sm:$0xff] %v5123_v61  ;;  %v1410_v61 = vmul.f32 %v6509_v32, %v4335_v2  ;;  %v6512_v2 = vstv %s4956_s21  ;;  %s5178_s21 = sld [smem:[#allocation8 + $0x5e]] }
 0x3f2   : > { %6504 = vst [vmem:[#allocation99_spill] sm:$0xff] %v5121_v28  ;;  %1338 = vrot.lane.b32.xlu1 %v3203_v25, %s6413_s10  ;;  %v6287_v28 = vstv %s5117_s12  ;;  %v1798_v32 = vmul.f32 %v6512_v2, %v4371_v58 }
 0x3f3   : > { %2208 = vrot.lane.b32.xlu0 %v3288_v50, %s6413_s10  ;;  %v3211_v43 = vrot.slane %v1410_v61, 10 }
 0x3f4   : > { %v5138_v9 = vpop.permute.xlu1 %2479 }
 0x3f5   : > { %v5136_v23 = vpop.permute.xlu0 %1611  ;;  %6508 = vst [vmem:[#allocation102_spill] sm:$0xff] %v5138_v9  ;;  %v1959_v9 = vmul.f32 %v3506_v33, %v6287_v28  ;;  %v6515_v28 = vstv %s4971_s4  ;;  %s5191_s4 = sld [smem:[#allocation8 + $0x5f]] }
 0x3f6   : > { %6507 = vst [vmem:[#allocation101_spill] sm:$0xff] %v5136_v23  ;;  %1378 = vrot.lane.b32.xlu1 %v3207_v7, %s6415_s26  ;;  %v6290_v23 = vstv %s5132_s22  ;;  %v3247_v7 = vrot.slane %v1798_v32, 10 }
 0x3f7   : > { %2756 = vrot.lane.b32.xlu0 %v3340_v47, %s6412_s19  ;;  %v3264_v47 = vrot.slane %v1959_v9, 10  ;;  %v2239_v2 = vmul.f32 %v5108_v31, %v6290_v23  ;;  %v6297_v23 = vstv %s5163_s11 }
 0x3f8   : > { %v5153_v50 = vpop.permute.xlu1 %1945 }
 0x3f9   : > { %v5151_v25 = vpop.permute.xlu0 %1651  ;;  %6511 = vst [vmem:[#allocation104_spill] sm:$0xff] %v5153_v50  ;;  %v1838_v50 = vmul.f32 %v6515_v28, %v4371_v58  ;;  %v6296_v28 = vstv %s5161_s13 }
 0x3fa   : > { %6510 = vst [vmem:[#allocation103_spill] sm:$0xff] %v5151_v25  ;;  %1418 = vrot.lane.b32.xlu1 %v3211_v43, %s6416_s3  ;;  %v6291_v25 = vstv %s5147_s27  ;;  %v3292_v43 = vrot.slane %v2239_v2, 10 }
 0x3fb   : > { %2502 = vrot.lane.b32.xlu0 %v3316_v11, %s6413_s10  ;;  %v3251_v32 = vrot.slane %v1838_v50, 10  ;;  %v2787_v58 = vmul.f32 %v6291_v25, %v4952_v24  ;;  %v2849_v50 = vmul.f32 %v6296_v28, %v4470_v4  ;;  %v2533_v25 = vmul.f32 %v6297_v23, %v4916_v13  ;;  %v5217_v28 = vld [vmem:[#allocation2] sm:$0xcc] }
 0x3fc   : > { %v5169_v61 = vpop.permute.xlu1 %2225  ;;  %v6523_v23 = vstv %s4999_s6  ;;  %s6036_s6 = sld [smem:[#allocation10]] }
 0x3fd   : > { %v5167_v42 = vpop.permute.xlu0 %1691  ;;  %6514 = vst [vmem:[#allocation106_spill] sm:$0xff] %v5169_v61  ;;  %v3344_v2 = vrot.slane %v2787_v58, 10  ;;  %v3320_v58 = vrot.slane %v2533_v25, 10 }
 0x3fe   : > { %6513 = vst [vmem:[#allocation105_spill] sm:$0xff] %v5167_v42  ;;  %1806 = vrot.lane.b32.xlu1 %v3247_v7, %s6407_s14  ;;  %v6299_v42 = vstv %s5178_s21 }
 0x3ff   : > { %1968 = vrot.lane.b32.xlu0 %v3264_v47, %s6415_s26  ;;  %v1999_v4 = vmul.f32 %v3506_v33, %v6299_v42  ;;  %v6526_v42 = vstv %s5013_s16  ;;  %s6040_s16 = sld [smem:[#allocation10 + $0x1]] }
 0x400   : > { %v5184_v9 = vpop.permute.xlu1 %2773 }
 0x401   : > { %v5182_v11 = vpop.permute.xlu0 %2065  ;;  %6517 = vst [vmem:[#allocation108_spill] sm:$0xff] %v5184_v9  ;;  %v6520_v9 = vstv %s4985_s20  ;;  %v3268_v25 = vrot.slane %v1999_v4, 10  ;;  %v3508_v4 = vld [vmem:[#allocation2] sm:$0xcc]  ;;  %s6549_s20 = sld [smem:[#allocation43_spill]] }
 0x402   : > { %6516 = vst [vmem:[#allocation107_spill] sm:$0xff] %v5182_v11  ;;  %1846 = vrot.lane.b32.xlu1 %v3251_v32, %s6410_s7  ;;  %v2412_v61 = vmul.f32 %v6520_v9, %v4454_v17  ;;  %v1878_v9 = vmul.f32 %v5217_v28, %v6523_v23 }
 0x403   : > { %2248 = vrot.lane.b32.xlu0 %v3292_v43, %s6415_s26 }
 0x404   : > { %v5197_v7 = vpop.permute.xlu1 %2519 }
 0x405   : > { %v5195_v47 = vpop.permute.xlu0 %2359  ;;  %6519 = vst [vmem:[#allocation110_spill] sm:$0xff] %v5197_v7  ;;  %v3307_v7 = vrot.slane %v2412_v61, 10  ;;  %v3255_v61 = vrot.slane %v1878_v9, 10  ;;  %v6529_v9 = vstv %s4750_s2  ;;  %s5327_s2 = sld [smem:[#allocation8 + $0x31]] }
 0x406   : > { %6518 = vst [vmem:[#allocation109_spill] sm:$0xff] %v5195_v47  ;;  %2853 = vrot.lane.b32.xlu1 %v2849_v50, %s6416_s3  ;;  %v6303_v47 = vstv %s5191_s4 }
 0x407   : > { %2796 = vrot.lane.b32.xlu0 %v3344_v2, %s6413_s10  ;;  %v2279_v33 = vmul.f32 %v5108_v31, %v6303_v47  ;;  %v6530_v31 = vstv %s5027_s5  ;;  %v6555_v19 = vstv %s6549_s20  ;;  %s6698_s5 = sld [smem:[#allocation20_spill]] }
 0x408   : > { %v5213_v32 = vpop.permute.xlu1 %1985  ;;  %v2706_v47 = vmul.f32 %v6530_v31, %v4460_v44  ;;  %v1502_v44 = vadd.f32 %v4638_v51, %v4285_v8  ;;  %v6547_v8 = vstv %s4409_s9  ;;  %s6553_s9 = sld [smem:[#allocation53_spill]] }
 0x409   : > { %v5211_v43 = vpop.permute.xlu0 %2105  ;;  %6522 = vst [vmem:[#allocation112_spill] sm:$0xff] %v5213_v32  ;;  %v2158_v32 = vmul.f32 %v6526_v42, %v4438_v57 }
 0x40a   : > { %6521 = vst [vmem:[#allocation111_spill] sm:$0xff] %v5211_v43  ;;  %2420 = vrot.lane.b32.xlu1 %v3307_v7, %s6410_s7  ;;  %v6538_v43 = vstv %s4812_s8  ;;  %s5365_s8 = sld [smem:[#allocation8]] }
 0x40b   : > { %2542 = vrot.lane.b32.xlu0 %v3320_v58, %s6415_s26  ;;  %v3296_v58 = vrot.slane %v2279_v33, 10  ;;  %v6532_v33 = vstv %s4769_s0  ;;  %s5349_s0 = sld [smem:[#allocation8 + $0x5a]] }
 0x40c   : > { %v5227_v50 = vpop.permute.xlu1 %2265 }
 0x40d   : > { %v5225_v2 = vpop.permute.xlu0 %2653  ;;  %6525 = vst [vmem:[#allocation114_spill] sm:$0xff] %v5227_v50  ;;  %v3283_v50 = vrot.slane %v2158_v32, 10  ;;  %v1544_v32 = vmul.f32 %v3508_v4, %v6532_v33 }
 0x40e   : > { %6524 = vst [vmem:[#allocation113_spill] sm:$0xff] %v5225_v2  ;;  %1886 = vrot.lane.b32.xlu1 %v3255_v61, %s6412_s19  ;;  %v1504_v2 = vmul.f32 %v3508_v4, %v6529_v9  ;;  %v3335_v61 = vrot.slane %v2706_v47, 10  ;;  %v6536_v47 = vstv %s5055_s25  ;;  %s3365_s25 = sshll.u32 %s6698_s5, 11 }
 0x40f   : > { %2008 = vrot.lane.b32.xlu0 %v3268_v25, %s6416_s3  ;;  %v3223_v31 = vrot.slane %v1544_v32, 10  ;;  %v1918_v33 = vmul.f32 %v5217_v28, %v6536_v47  ;;  %v1624_v32 = vmul.f32 %v3508_v4, %v6538_v43 }
 0x410   : > { %v5239_v7 = vpop.permute.xlu1 %2813  ;;  %v3219_v25 = vrot.slane %v1504_v2, 10 }
 0x411   : > { %v5237_v23 = vpop.permute.xlu0 %2399  ;;  %6528 = vst [vmem:[#allocation116_spill] sm:$0xff] %v5239_v7  ;;  %v6533_v7 = vstv %s5041_s30  ;;  %v3231_v11 = vrot.slane %v1624_v32, 10  ;;  %v6543_v32 = vstv %s4848_s23  ;;  %s6561_s23 = sld [smem:[#allocation55_spill]]  ;;  %s6699_s30 = sld [smem:[#allocation25_spill]] }
 0x412   : > { %6527 = vst [vmem:[#allocation115_spill] sm:$0xff] %v5237_v23  ;;  %2166 = vrot.lane.b32.xlu1 %v3283_v50, %s6412_s19  ;;  %v2452_v9 = vmul.f32 %v6533_v7, %v4454_v17  ;;  %v1704_v59 = vmul.f32 %v3508_v4, %v6543_v32 }
 0x413   : > { %2288 = vrot.lane.b32.xlu0 %v3296_v58, %s6416_s3 }
 0x414   : > { %v5250_v42 = vpop.permute.xlu1 %2559  ;;  %v3311_v23 = vrot.slane %v2452_v9, 10  ;;  %v5276_v9 = vld [vmem:[#allocation2] sm:$0xcc] }
 0x415   : > { %v5248_v57 = vpop.permute.xlu0 %954  ;;  %6531 = vst [vmem:[#allocation117_spill] sm:$0xff] %v5250_v42  ;;  %v6535_v42 = vstv %s4791_s1  ;;  %s6558_s1 = sld [smem:[#allocation44_spill]] }
 0x416   : > { %2714 = vrot.lane.b32.xlu1 %v3335_v61, %s6410_s7  ;;  %v1584_v2 = vmul.f32 %v3508_v4, %v6535_v42  ;;  %v3259_v61 = vrot.slane %v1918_v33, 10  ;;  %v6539_v42 = vstv %s5070_s24  ;;  %v6541_v33 = vstv %s4830_s15  ;;  %s5369_s15 = sld [smem:[#allocation8 + $0x60]] }
 0x417   : > { %1512 = vrot.lane.b32.xlu0 %v3219_v25, %s6407_s14  ;;  %v2198_v47 = vmul.f32 %v5276_v9, %v6539_v42  ;;  %v1664_v43 = vmul.f32 %v3508_v4, %v6541_v33  ;;  %v6544_v33 = vstv %s5100_s29  ;;  %s6702_s24 = sshll.u32 %s6699_s30, 7 }
 0x418   : > { %v5261_v50 = vpop.permute.xlu1 %1514  ;;  %v3227_v25 = vrot.slane %v1584_v2, 10  ;;  %s6056_s28 = scalar_lea.vmem [#allocation11], %s6702_s24 }
 0x419   : > { %v5259_v58 = vpop.permute.xlu0 %991  ;;  %6534 = vst [vmem:[#allocation118_spill] sm:$0xff] %v5261_v50  ;;  %v3287_v2 = vrot.slane %v2198_v47, 10  ;;  %v3235_v42 = vrot.slane %v1664_v43, 10  ;;  %v5300_v47 = vld [vmem:[#allocation2] sm:$0xcc]  ;;  %v1523_v10 = vadd.f32 %v5261_v50, %v1502_v44  ;;  %v3239_v43 = vrot.slane %v1704_v59, 10 }
 0x41a   : > { %2460 = vrot.lane.b32.xlu1 %v3311_v23, %s6412_s19  ;;  %v2492_v12 = vmul.f32 %v5300_v47, %v6544_v33  ;;  %v6546_v33 = vstv %s5117_s12  ;;  %v6550_v44 = vstv %s4884_s18  ;;  %v6552_v50 = vstv %s5132_s22  ;;  %s3685_s18 = smov 122   ;;  %s3030_s29 = sshll.u32 %s6056_s28, 4  ;;  %s6082_s29 = int_to_ptr.vmem [resolvable:$true] %s3030_s29 }
 0x41b   : > { %1552 = vrot.lane.b32.xlu0 %v3223_v31, %s6410_s7  ;;  %v1958_v62 = vmul.f32 %v5217_v28, %v6546_v33  ;;  %v1542_v59 = vadd.f32 %v4650_v46, %v1523_v10  ;;  %s3589_s20 = scalar_lea.vmem %s6082_s29, 2048 }
 0x41c   : > { %v5272_v7 = vpop.permute.xlu1 %1554  ;;  %v3315_v32 = vrot.slane %v2492_v12, 10  ;;  %v2372_v12 = vmul.f32 %v5300_v47, %v6550_v44  ;;  %v3511_v44 = vld [vmem:[#allocation2 + $0x8] sm:$0x3]  ;;  %p3590_p12 = scmp.ne.s32.totalorder %s6082_s29, %s3589_s20 }
 0x41d   : > { %v5270_v17 = vpop.permute.xlu0 %1028  ;;  %6537 = vst [vmem:[#allocation119_spill] sm:$0xff] %v5272_v7 }
 0x41e   : > { %1926 = vrot.lane.b32.xlu1 %v3259_v61, %s6413_s10  ;;  %p3591_p0 = pnand %p3590_p12, %p3831_p9 }
 0x41f   : > { %1592 = vrot.lane.b32.xlu0 %v3227_v25, %s6412_s19 }
 0x420   : > { %v5285_v31 = vpop.permute.xlu1 %1594  ;;  %p3592_p3 = pneg %p3591_p0 }
 0x421   : > { %v5283_v23 = vpop.permute.xlu0 %1065  ;;  %6540 = vst [vmem:[#allocation120_spill] sm:$0xff] %v5285_v31 }
 0x422   : > { %2206 = vrot.lane.b32.xlu1 %v3287_v2, %s6413_s10 }
 0x423   : > { %1632 = vrot.lane.b32.xlu0 %v3231_v11, %s6413_s10  ;;  %v2078_v11 = vmul.f32 %v5276_v9, %v6545_v35 }
 0x424   : > { %v5296_v61 = vpop.permute.xlu1 %1634 }
 0x425   : > { %v5294_v25 = vpop.permute.xlu0 %1102 }
 0x426   : > { %2754 = vrot.lane.b32.xlu1 %v3339_v37, %s6412_s19  ;;  %s6548_s19 = sld [smem:[#allocation54_spill]]  ;;  %v1208_v37 = vadd.f32 %v4718_v52, %v4314_v0 }
 0x427   : > { %1672 = vrot.lane.b32.xlu0 %v3235_v42, %s6415_s26  ;;  %v2341_v42 = vmul.f32 %v6547_v8, %v4916_v13  ;;  %v3275_v8 = vrot.slane %v2078_v11, 10 }
 0x428   : > { %v5315_v4 = vpop.permute.xlu1 %1674 }
 0x429   : > { %v5313_v2 = vpop.permute.xlu0 %1139  ;;  %v3300_v51 = vrot.slane %v2341_v42, 10 }
 0x42a   : > { %2500 = vrot.lane.b32.xlu1 %v3315_v32, %s6413_s10  ;;  %v2238_v32 = vmul.f32 %v5276_v9, %v6552_v50  ;;  %v1563_v50 = vadd.f32 %v5272_v7, %v1542_v59  ;;  %v913_v7 = vstv %s5327_s2  ;;  %s3687_s2 = smov [#allocation11]  }
 0x42b   : > { %1712 = vrot.lane.b32.xlu0 %v3239_v43, %s6416_s3  ;;  %v3263_v43 = vrot.slane %v1958_v62, 10  ;;  %v2118_v62 = vmul.f32 %v5276_v9, %v6555_v19  ;;  %v6560_v19 = vstv %s6553_s9  ;;  %s3593_s9 = sshll.u32 %s3687_s2, 4  ;;  %s3594_s9 = int_to_ptr.vmem [resolvable:$false] %s3593_s9 }
 0x42c   : > { %v5335_v33 = vpop.permute.xlu1 %1714  ;;  %v6554_v10 = vstv %s6548_s19  ;;  %v2635_v49 = vmul.f32 %v6560_v19, %v4952_v24  ;;  %s3016_s19 = scalar_lea.sflag [#allocation5], %s6699_s30  ;;  %p3596_p2 = scmp.lt.s32.totalorder %s6082_s29, %s3594_s9 }
 0x42d   : > { %v5333_v35 = vpop.permute.xlu0 %1220  ;;  %v2334_v46 = vmul.f32 %v3511_v44, %v6554_v10  ;;  %v6559_v10 = vstv %s5147_s27  ;;  %s6715_s27 = sld [smem:[#allocation134_spill]] }
 0x42e   : > { %6551 = vst [vmem:[#allocation121_spill] sm:$0xff] %v5333_v35  ;;  %v1229_v0 = vadd.f32 %v5333_v35, %v1208_v37  ;;  %1966 = vrot.lane.b32.xlu1 %v3263_v43, %s6415_s26  ;;  %v3303_v37 = vrot.slane %v2372_v12, 10  ;;  %v5356_v43 = vld [vmem:[#allocation2] sm:$0xcc] }
 0x42f   : > { %2086 = vrot.lane.b32.xlu0 %v3275_v8, %s6407_s14  ;;  %v3291_v8 = vrot.slane %v2238_v32, 10  ;;  %v2351_v5 = vadd.f32 %v3300_v51, %v2334_v46  ;;  %v912_v32 = vld [vmem:[#allocation2] sm:$0xcc]  ;;  %v3279_v51 = vrot.slane %v2118_v62, 10  ;;  %v6562_v46 = vstv %s6558_s1 }
 0x430   : > { %v1248_v30 = vadd.f32 %v4730_v45, %v1229_v0  ;;  %v5354_v42 = vpop.permute.xlu1 %2088  ;;  %v2786_v0 = vmul.f32 %v5356_v43, %v6559_v10  ;;  %v2666_v10 = vmul.f32 %v5356_v43, %v6562_v46  ;;  %v914_v35 = vmul.f32 %v913_v7, %v912_v32 }
 0x431   : > { %v5352_v11 = vpop.permute.xlu0 %1260  ;;  %6557 = vst [vmem:[#allocation123_spill] sm:$0xff] %v5354_v42  ;;  %v2370_v12 = vadd.f32 %v4728_v39, %v2351_v5  ;;  %v3328_v39 = vrot.slane %v2635_v49, 10 }
 0x432   : > { %6556 = vst [vmem:[#allocation122_spill] sm:$0xff] %v5352_v11  ;;  %v1269_v59 = vadd.f32 %v5352_v11, %v1248_v30  ;;  %2246 = vrot.lane.b32.xlu1 %v3291_v8, %s6415_s26  ;;  %v1582_v30 = vadd.f32 %v4665_v38, %v1563_v50  ;;  %v3343_v42 = vrot.slane %v2786_v0, 10  ;;  %v6565_v11 = vstv %s5163_s11  ;;  %v3513_v50 = vld [vmem:[#allocation2 + $0x8] sm:$0x3]  ;;  %s6568_s11 = sld [smem:[#allocation42_spill]] }
 0x433   : > { %2380 = vrot.lane.b32.xlu0 %v3303_v37, %s6407_s14  ;;  %v2532_v5 = vmul.f32 %v5300_v47, %v6565_v11  ;;  %v6567_v38 = vstv %s5178_s21  ;;  %v2825_v11 = vstv %s5349_s0  ;;  %v3160_v45 = vrot.slane %v914_v35, 10  ;;  %s6080_s21 = scalar_lea.hbm %s6715_s27, %s3365_s25  ;;  %s3595_s0 = scalar_lea.vmem %s3594_s9, 4096 }
 0x434   : > { %v1288_v19 = vadd.f32 %v4744_v40, %v1269_v59  ;;  %v5380_v8 = vpop.permute.xlu1 %2382  ;;  %v6566_v59 = vstv %s6561_s23  ;;  %v1998_v0 = vmul.f32 %v5217_v28, %v6567_v38  ;;  %v1603_v49 = vadd.f32 %v5285_v31, %v1582_v30  ;;  %v908_v38 = vld [vmem:[#allocation2] sm:$0x33]  ;;  %p3597_p4 = scmp.lt.s32.totalorder %s3595_s0, %s3589_s20 }
 0x435   : > { %v5378_v37 = vpop.permute.xlu0 %1300  ;;  %6564 = vst [vmem:[#allocation125_spill] sm:$0xff] %v5380_v8  ;;  %v5386_v62 = vadd.f32 %v5380_v8, %v2370_v12  ;;  %v2628_v46 = vmul.f32 %v3513_v50, %v6566_v59  ;;  %v933_v40 = vrot.slane %v4797_v22, 4  ;;  %v909_v59 = vstv %s5365_s8 }
 0x436   : > { %6563 = vst [vmem:[#allocation124_spill] sm:$0xff] %v5378_v37  ;;  %2794 = vrot.lane.b32.xlu1 %v3343_v42, %s6413_s10  ;;  %v1309_v12 = vadd.f32 %v5378_v37, %v1288_v19  ;;  %v3331_v42 = vrot.slane %v2666_v10, 10  ;;  %v2571_v28 = vstv %s5369_s15  ;;  %v934_v30 = vrot.slane %v4640_v14, 4  ;;  %s3683_s10 = smov 124   ;;  %p3598_p6 = por %p3597_p4, %p3596_p2 }
 0x437   : > { %2126 = vrot.lane.b32.xlu0 %v3279_v51, %s6410_s7  ;;  %v3319_v51 = vrot.slane %v2532_v5, 10  ;;  %v2645_v8 = vadd.f32 %v3328_v39, %v2628_v46  ;;  %v2827_v39 = vmul.f32 %v2825_v11, %v4952_v24  ;;  %v1622_v5 = vadd.f32 %v4677_v27, %v1603_v49  ;;  %s3681_s7 = smov 126  }
 0x438   : > { %v5402_v32 = vpop.permute.xlu1 %2128  ;;  %v6570_v31 = vstv %s6568_s11  ;;  %v1328_v35 = vadd.f32 %v4762_v21, %v1309_v12  ;;  %v910_v14 = vmul.f32 %v909_v59, %v908_v38  ;;  %v2865_v49 = vstv %s5390_s17  ;;  %p3599_p8 = pnand %p3598_p6, %p3592_p3 }
 0x439   : > { %v5400_v7 = vpop.permute.xlu0 %1340  ;;  %6569 = vst [vmem:[#allocation126_spill] sm:$0xff] %v5402_v32  ;;  %v2664_v19 = vadd.f32 %v4760_v6, %v2645_v8  ;;  %v2556_v10 = vmul.f32 %v3511_v44, %v6570_v31  ;;  %v936_v8 = vsel %vm935_vm1, %v933_v40, %v934_v30  ;;  %v2573_v44 = vmul.f32 %v2571_v28, %v4916_v13 }
 0x43a   : > { %2540 = vrot.lane.b32.xlu1 %v3319_v51, %s6415_s26  ;;  %v6571_v51 = vstv %s5191_s4  ;;  %v919_v12 = vadd.f32 %v3160_v45, %v910_v14  ;;  %v3348_v6 = vrot.slane %v2827_v39, 10  ;;  %v938_v40 = vsel %vm937_vm2, %v4797_v22, %v936_v8 }
 0x43b   : > { %2674 = vrot.lane.b32.xlu0 %v3331_v42, %s6407_s14  ;;  %v3267_v42 = vrot.slane %v1998_v0, 10  ;;  %v2278_v37 = vmul.f32 %v5276_v9, %v6571_v51  ;;  %v973_v0 = vrot.slane %v4818_v26, 4  ;;  %v2826_v9 = vmul.f32 %v5356_v43, %v2825_v11  ;;  %s3684_s14 = smov 123  }
 0x43c   : > { %v5418_v32 = vpop.permute.xlu1 %2676  ;;  %v1643_v59 = vadd.f32 %v5296_v61, %v1622_v5  ;;  %v1349_v38 = vadd.f32 %v5400_v7, %v1328_v35  ;;  %v974_v13 = vrot.slane %v4652_v36, 4  ;;  %v957_v45 = vrot.slane %v5248_v57, 4 }
 0x43d   : > { %v5416_v46 = vpop.permute.xlu0 %1380  ;;  %v5425_v31 = vadd.f32 %v5418_v32, %v2664_v19  ;;  %v3324_v22 = vrot.slane %v2573_v44, 10  ;;  %v6572_v11 = vstv %s5161_s13  ;;  %v2572_v35 = vmul.f32 %v5300_v47, %v2571_v28  ;;  %s6716_s13 = smov %s6715_s27 }
 0x43e   : > { %2006 = vrot.lane.b32.xlu1 %v3267_v42, %s6416_s3  ;;  %v2850_v5 = vmul.f32 %v3513_v50, %v6572_v11  ;;  %v940_v42 = vadd.f32 %v938_v40, %v919_v12  ;;  %v975_v51 = vsel %vm935_vm1, %v973_v0, %v974_v13  ;;  %v1662_v57 = vadd.f32 %v4692_v15, %v1643_v59 }
 0x43f   : > { %2561 = vrot.lane.b32.xlu0 %v2556_v10, %s6416_s3  ;;  %v3295_v10 = vrot.slane %v2278_v37, 10  ;;  %v1010_v37 = vrot.slane %v4836_v41, 4  ;;  %v1368_v14 = vadd.f32 %v4781_v18, %v1349_v38  ;;  %v1011_v50 = vrot.slane %v4667_v48, 4 }
 0x440   : > { %v953_v19 = vpop.permute.xlu1 %952  ;;  %v994_v47 = vrot.slane %v5259_v58, 4  ;;  %v977_v0 = vsel %vm976_vm3, %v4818_v26, %v975_v51  ;;  %v2867_v40 = vmul.f32 %v2865_v49, %v4952_v24  ;;  %v2866_v59 = vmul.f32 %v5356_v43, %v2865_v49 }
 0x441   : > { %v5437_v30 = vpop.permute.xlu0 %1420  ;;  %v956_v39 = vrot.slane %v953_v19, 4  ;;  %v1047_v48 = vrot.slane %v4854_v3, 4  ;;  %v1389_v26 = vadd.f32 %v5416_v46, %v1368_v14  ;;  %v1048_v24 = vrot.slane %v4679_v63, 4 }
 0x442   : > { %2286 = vrot.lane.b32.xlu1 %v3295_v10, %s6416_s3  ;;  %v3347_v10 = vrot.slane %v2826_v9, 10  ;;  %v1012_v9 = vsel %vm935_vm1, %v1010_v37, %v1011_v50  ;;  %v1031_v43 = vrot.slane %v5270_v17, 4  ;;  %v1084_v51 = vrot.slane %v4872_v20, 4 }
 0x443   : > { %2836 = vrot.lane.b32.xlu0 %v3348_v6, %s6415_s26  ;;  %v958_v36 = vsel %vm935_vm1, %v956_v39, %v957_v45  ;;  %v3352_v37 = vrot.slane %v2867_v40, 10  ;;  %v2410_v17 = vadd.f32 %v4779_v56, %v5386_v62  ;;  %v1085_v14 = vrot.slane %v4694_v53, 4 }
 0x444   : > { %v959_v6 = vsel %vm937_vm2, %v953_v19, %v958_v36  ;;  %v990_v44 = vpop.permute.xlu1 %989  ;;  %v1683_v19 = vadd.f32 %v5315_v4, %v1662_v57  ;;  %v3351_v36 = vrot.slane %v2866_v59, 10  ;;  %v1049_v57 = vsel %vm935_vm1, %v1047_v48, %v1048_v24 }
 0x445   : > { %v5452_v8 = vpop.permute.xlu0 %1808  ;;  %v961_v28 = vadd.f32 %v959_v6, %v940_v42  ;;  %v993_v12 = vrot.slane %v990_v44, 4  ;;  %v1014_v42 = vsel %vm1013_vm4, %v4836_v41, %v1012_v9  ;;  %v1408_v6 = vadd.f32 %v4795_v34, %v1389_v26 }
 0x446   : > { %2834 = vrot.lane.b32.xlu1 %v3347_v10, %s6415_s26  ;;  %v1702_v41 = vadd.f32 %v4704_v55, %v1683_v19  ;;  %v1068_v50 = vrot.slane %v5283_v23, 4  ;;  %v1051_v62 = vsel %vm1050_vm5, %v4854_v3, %v1049_v57  ;;  %v1086_v53 = vsel %vm935_vm1, %v1084_v51, %v1085_v14  ;;  %s3682_s26 = smov 125  }
 0x447   : > { %2582 = vrot.lane.b32.xlu0 %v3324_v22, %s6416_s3  ;;  %v979_v38 = vadd.f32 %v977_v0, %v961_v28  ;;  %v995_v58 = vsel %vm935_vm1, %v993_v12, %v994_v47  ;;  %v3323_v22 = vrot.slane %v2572_v35, 10  ;;  %v1121_v0 = vrot.slane %v4890_v60, 4 }
 0x448   : > { %v996_v13 = vsel %vm976_vm3, %v990_v44, %v995_v58  ;;  %v1027_v39 = vpop.permute.xlu1 %1026  ;;  %v1201_v40 = vrot.slane %v4908_v16, 4  ;;  %v1122_v9 = vrot.slane %v4706_v1, 4  ;;  %v1723_v48 = vadd.f32 %v5335_v33, %v1702_v41  ;;  %v6574_v41 = vld [vmem:[#allocation65_spill] sm:$0xff] }
 0x449   : > { %v5468_v45 = vpop.permute.xlu0 %1848  ;;  %v998_v49 = vadd.f32 %v996_v13, %v979_v38  ;;  %v1030_v11 = vrot.slane %v1027_v39, 4  ;;  %v1429_v3 = vadd.f32 %v5437_v30, %v1408_v6  ;;  %v1202_v26 = vrot.slane %v4718_v52, 4 }
 0x44a   : > { %2580 = vrot.lane.b32.xlu1 %v3323_v22, %s6416_s3  ;;  %v1105_v13 = vrot.slane %v5294_v25, 4  ;;  %v1088_v24 = vsel %vm1087_vm6, %v4872_v20, %v1086_v53  ;;  %v1123_v1 = vsel %vm935_vm1, %v1121_v0, %v1122_v9  ;;  %v1142_v20 = vrot.slane %v5313_v2, 4 }
 0x44b   : > { %2855 = vrot.lane.b32.xlu0 %v2850_v5, %s6416_s3  ;;  %v1016_v35 = vadd.f32 %v1014_v42, %v998_v49  ;;  %v1032_v63 = vsel %vm935_vm1, %v1030_v11, %v1031_v43  ;;  %v1203_v43 = vsel %vm935_vm1, %v1201_v40, %v1202_v26  ;;  %v2704_v14 = vadd.f32 %v4888_v29, %v5425_v31  ;;  %v6578_v40 = vld [vmem:[#allocation76_spill] sm:$0xff] }
 0x44c   : > { %v1033_v5 = vsel %vm1013_vm4, %v1027_v39, %v1032_v63  ;;  %v1064_v10 = vpop.permute.xlu1 %1063  ;;  %v1204_v57 = vsel %vm937_vm2, %v4908_v16, %v1203_v43  ;;  %v1242_v6 = vrot.slane %v6574_v41, 4  ;;  %v1281_v31 = vrot.slane %v6578_v40, 4  ;;  %v6582_v43 = vld [vmem:[#allocation50_spill] sm:$0xff] }
 0x44d   : > { %v5485_v44 = vpop.permute.xlu0 %2422  ;;  %v1035_v47 = vadd.f32 %v1033_v5, %v1016_v35  ;;  %v1067_v12 = vrot.slane %v1064_v10, 4  ;;  %v1241_v35 = vrot.slane %v4928_v54, 4 }
 0x44e   : > { %v2431_v28 = vadd.f32 %v5485_v44, %v2410_v17  ;;  %2874 = vrot.lane.b32.xlu1 %v3351_v36, %s6416_s3  ;;  %v1125_v36 = vsel %vm1124_vm7, %v4890_v60, %v1123_v1 }
 0x44f   : > { %2876 = vrot.lane.b32.xlu0 %v3352_v37, %s6416_s3  ;;  %v1053_v59 = vadd.f32 %v1051_v62, %v1035_v47  ;;  %v1069_v23 = vsel %vm935_vm1, %v1067_v12, %v1068_v50  ;;  %s6573_s3 = smov 127   ;;  %v6575_v50 = vld [vmem:[#allocation121_spill] sm:$0xff]  ;;  %v6577_v62 = vld [vmem:[#allocation51_spill] sm:$0xff]  ;;  %v1243_v0 = vsel %vm935_vm1, %v1241_v35, %v1242_v6 }
 0x450   : > { %v1070_v38 = vsel %vm1050_vm5, %v1064_v10, %v1069_v23  ;;  %v1101_v19 = vpop.permute.xlu1 %1100  ;;  %v1223_v60 = vrot.slane %v6575_v50, 4  ;;  %v1207_v53 = vadd.f32 %v1204_v57, %v6577_v62  ;;  %v6579_v23 = vld [vmem:[#allocation73_spill] sm:$0xff]  ;;  %v6587_v62 = vld [vmem:[#allocation48_spill] sm:$0xff] }
 0x451   : > { %v5501_v58 = vpop.permute.xlu0 %1888  ;;  %v1072_v39 = vadd.f32 %v1070_v38, %v1053_v59  ;;  %v1104_v22 = vrot.slane %v1101_v19, 4  ;;  %v2450_v9 = vadd.f32 %v6579_v23, %v2431_v28 }
 0x452   : > { %1449 = vrot.lane.b32.xlu1 %v1429_v3, %s6573_s3 }
 0x453   : > { %1743 = vrot.lane.b32.xlu0 %v1723_v48, %s3681_s7  ;;  %v1090_v49 = vadd.f32 %v1088_v24, %v1072_v39  ;;  %v1106_v52 = vsel %vm935_vm1, %v1104_v22, %v1105_v13  ;;  %v6580_v48 = vld [vmem:[#allocation67_spill] sm:$0xff]  ;;  %v6581_v13 = vld [vmem:[#allocation122_spill] sm:$0xff] }
 0x454   : > { %v1107_v25 = vsel %vm1087_vm6, %v1101_v19, %v1106_v52  ;;  %v1138_v42 = vpop.permute.xlu1 %1137  ;;  %v1282_v3 = vrot.slane %v6580_v48, 4  ;;  %v1263_v39 = vrot.slane %v6581_v13, 4 }
 0x455   : > { %v5513_v11 = vpop.permute.xlu0 %2168  ;;  %v1109_v51 = vadd.f32 %v1107_v25, %v1090_v49  ;;  %v1141_v37 = vrot.slane %v1138_v42, 4  ;;  %v6583_v49 = vld [vmem:[#allocation69_spill] sm:$0xff]  ;;  %v1244_v25 = vsel %vm976_vm3, %v4928_v54, %v1243_v0 }
 0x456   : > { %v1796_v52 = vadd.f32 %v6583_v49, %v6582_v43  ;;  %v1283_v28 = vsel %vm935_vm1, %v1281_v31, %v1282_v3  ;;  %v1362_v31 = vrot.slane %v4781_v18, 4  ;;  %v1343_v3 = vrot.slane %v5400_v7, 4 }
 0x457   : > { %v1127_v63 = vadd.f32 %v1125_v36, %v1109_v51  ;;  %v1143_v17 = vsel %vm935_vm1, %v1141_v37, %v1142_v20  ;;  %v1322_v36 = vrot.slane %v4762_v21, 4 }
 0x458   : > { %v1144_v2 = vsel %vm1124_vm7, %v1138_v42, %v1143_v17  ;;  %v1219_v10 = vpop.permute.xlu1 %1218  ;;  %v6584_v42 = vld [vmem:[#allocation78_spill] sm:$0xff]  ;;  %v6585_v17 = vld [vmem:[#allocation124_spill] sm:$0xff]  ;;  %v1817_v41 = vadd.f32 %v5452_v8, %v1796_v52  ;;  %v6591_v52 = vld [vmem:[#allocation123_spill] sm:$0xff] }
 0x459   : > { %v5526_v5 = vpop.permute.xlu0 %2716  ;;  %v5529_v47 = vadd.f32 %v1144_v2, %v1127_v63  ;;  %v1222_v12 = vrot.slane %v1219_v10, 4  ;;  %v1321_v20 = vrot.slane %v6584_v42, 4  ;;  %v1284_v2 = vsel %vm1013_vm4, %v6578_v40, %v1283_v28  ;;  %v6589_v40 = vld [vmem:[#allocation70_spill] sm:$0xff] }
 0x45a   : > { %v2725_v16 = vadd.f32 %v5526_v5, %v2704_v14  ;;  %v1303_v14 = vrot.slane %v6585_v17, 4 }
 0x45b   : > { %6576 = vst [vmem:[#allocation65_spill] sm:$0xff] %v5529_v47  ;;  %v1224_v59 = vsel %vm935_vm1, %v1222_v12, %v1223_v60  ;;  %v1323_v60 = vsel %vm935_vm1, %v1321_v20, %v1322_v36  ;;  %v1402_v36 = vrot.slane %v4795_v34, 4 }
 0x45c   : > { %v1225_v38 = vsel %vm937_vm2, %v1219_v10, %v1224_v59  ;;  %v1259_v26 = vpop.permute.xlu1 %1258  ;;  %v6586_v10 = vld [vmem:[#allocation80_spill] sm:$0xff] }
 0x45d   : > { %v5539_v19 = vpop.permute.xlu0 %2462  ;;  %v1228_v22 = vadd.f32 %v1225_v38, %v1207_v53  ;;  %v1262_v1 = vrot.slane %v1259_v26, 4  ;;  %v1361_v50 = vrot.slane %v6586_v10, 4  ;;  %v6588_v53 = vld [vmem:[#allocation63_spill] sm:$0xff]  ;;  %v1836_v38 = vadd.f32 %v6589_v40, %v1817_v41 }
 0x45e   : > { %v2471_v24 = vadd.f32 %v5539_v19, %v2450_v9  ;;  %v2076_v0 = vadd.f32 %v6588_v53, %v6587_v62 }
 0x45f   : > { %v1247_v51 = vadd.f32 %v1244_v25, %v1228_v22  ;;  %v1264_v37 = vsel %vm935_vm1, %v1262_v1, %v1263_v39  ;;  %v1324_v39 = vsel %vm1050_vm5, %v6584_v42, %v1323_v60  ;;  %v1363_v22 = vsel %vm935_vm1, %v1361_v50, %v1362_v31  ;;  %v6590_v1 = vld [vmem:[#allocation82_spill] sm:$0xff]  ;;  %v6592_v25 = vld [vmem:[#allocation84_spill] sm:$0xff] }
 0x460   : > { %v1265_v57 = vsel %vm976_vm3, %v1259_v26, %v1264_v37  ;;  %v1299_v63 = vpop.permute.xlu1 %1298  ;;  %v1401_v43 = vrot.slane %v6590_v1, 4  ;;  %v2097_v18 = vadd.f32 %v6591_v52, %v2076_v0  ;;  %v1789_v28 = vrot.slane %v6592_v25, 4  ;;  %v6593_v37 = vld [vmem:[#allocation77_spill] sm:$0xff]  ;;  %v6595_v50 = vld [vmem:[#allocation66_spill] sm:$0xff] }
 0x461   : > { %v5552_v35 = vpop.permute.xlu0 %1928  ;;  %v1268_v6 = vadd.f32 %v1265_v57, %v1247_v51  ;;  %v1302_v54 = vrot.slane %v1299_v63, 4  ;;  %v2744_v7 = vadd.f32 %v6593_v37, %v2725_v16  ;;  %v1790_v57 = vrot.slane %v6583_v49, 4  ;;  %v6597_v0 = vld [vmem:[#allocation126_spill] sm:$0xff] }
 0x462   : > { %v1857_v41 = vadd.f32 %v5468_v45, %v1836_v38  ;;  %v1364_v16 = vsel %vm1087_vm6, %v6586_v10, %v1363_v22  ;;  %v1403_v34 = vsel %vm935_vm1, %v1401_v43, %v1402_v36  ;;  %v2116_v49 = vadd.f32 %v6595_v50, %v2097_v18  ;;  %v6599_v38 = vld [vmem:[#allocation71_spill] sm:$0xff]  ;;  %v6601_v18 = vld [vmem:[#allocation86_spill] sm:$0xff] }
 0x463   : > { %v1287_v12 = vadd.f32 %v1284_v2, %v1268_v6  ;;  %v1304_v21 = vsel %vm935_vm1, %v1302_v54, %v1303_v14  ;;  %v1404_v43 = vsel %vm1124_vm7, %v6590_v1, %v1403_v34  ;;  %v6602_v1 = vld [vmem:[#allocation72_spill] sm:$0xff] }
 0x464   : > { %v1305_v59 = vsel %vm1013_vm4, %v1299_v63, %v1304_v21  ;;  %v1339_v48 = vpop.permute.xlu1 %1338  ;;  %v1383_v63 = vrot.slane %v5416_v46, 4  ;;  %v1791_v46 = vsel %vm935_vm1, %v1789_v28, %v1790_v57  ;;  %v6596_v21 = vld [vmem:[#allocation79_spill] sm:$0xff]  ;;  %v2137_v31 = vadd.f32 %v6597_v0, %v2116_v49  ;;  %v6605_v49 = vld [vmem:[#allocation74_spill] sm:$0xff] }
 0x465   : > { %v5565_v9 = vpop.permute.xlu0 %2208  ;;  %v1308_v26 = vadd.f32 %v1305_v59, %v1287_v12  ;;  %v1342_v13 = vrot.slane %v1339_v48, 4  ;;  %v2490_v62 = vadd.f32 %v6596_v21, %v2471_v24  ;;  %v1423_v59 = vrot.slane %v5437_v30, 4 }
 0x466   : > { %v1792_v24 = vsel %vm937_vm2, %v6592_v25, %v1791_v46  ;;  %v1829_v30 = vrot.slane %v6601_v18, 4 }
 0x467   : > { %v1327_v20 = vadd.f32 %v1324_v39, %v1308_v26  ;;  %v1344_v51 = vsel %vm935_vm1, %v1342_v13, %v1343_v3  ;;  %v1876_v26 = vadd.f32 %v6599_v38, %v1857_v41 }
 0x468   : > { %v1345_v42 = vsel %vm1050_vm5, %v1339_v48, %v1344_v51  ;;  %v1379_v14 = vpop.permute.xlu1 %1378 }
 0x469   : > { %v5581_v17 = vpop.permute.xlu0 %2756  ;;  %v1348_v6 = vadd.f32 %v1345_v42, %v1327_v20  ;;  %v1382_v2 = vrot.slane %v1379_v14, 4  ;;  %v1897_v28 = vadd.f32 %v5501_v58, %v1876_v26  ;;  %v1811_v42 = vrot.slane %v5452_v8, 4  ;;  %v6607_v26 = vld [vmem:[#allocation75_spill] sm:$0xff] }
 0x46a   : > { %6594 = vst [vmem:[#allocation121_spill] sm:$0xff] %v5581_v17  ;;  %v2765_v54 = vadd.f32 %v5581_v17, %v2744_v7  ;;  %v1830_v7 = vrot.slane %v6589_v40, 4 }
 0x46b   : > { %v1367_v60 = vadd.f32 %v1364_v16, %v1348_v6  ;;  %v1384_v12 = vsel %vm935_vm1, %v1382_v2, %v1383_v63  ;;  %v6604_v6 = vld [vmem:[#allocation52_spill] sm:$0xff]  ;;  %v1916_v40 = vadd.f32 %v6605_v49, %v1897_v28 }
 0x46c   : > { %v1385_v48 = vsel %vm1087_vm6, %v1379_v14, %v1384_v12  ;;  %v1419_v10 = vpop.permute.xlu1 %1418  ;;  %v2156_v14 = vadd.f32 %v6602_v1, %v2137_v31  ;;  %v1795_v2 = vadd.f32 %v1792_v24, %v6604_v6  ;;  %v1831_v16 = vsel %vm935_vm1, %v1829_v30, %v1830_v7  ;;  %v6608_v24 = vld [vmem:[#allocation85_spill] sm:$0xff] }
 0x46d   : > { %v5595_v3 = vpop.permute.xlu0 %2502  ;;  %v1388_v13 = vadd.f32 %v1385_v48, %v1367_v60  ;;  %v1422_v22 = vrot.slane %v1419_v10, 4  ;;  %v1937_v31 = vadd.f32 %v5552_v35, %v1916_v40  ;;  %v2784_v30 = vadd.f32 %v6608_v24, %v2765_v54  ;;  %v6611_v7 = vld [vmem:[#allocation81_spill] sm:$0xff] }
 0x46e   : > { %6598 = vst [vmem:[#allocation51_spill] sm:$0xff] %v5595_v3  ;;  %v5599_v39 = vadd.f32 %v5595_v3, %v2490_v62  ;;  %v2177_v34 = vadd.f32 %v5513_v11, %v2156_v14  ;;  %v1851_v62 = vrot.slane %v5468_v45, 4  ;;  %v6621_v40 = vld [vmem:[#allocation89_spill] sm:$0xff] }
 0x46f   : > { %v1407_v20 = vadd.f32 %v1404_v43, %v1388_v13  ;;  %v1424_v51 = vsel %vm935_vm1, %v1422_v22, %v1423_v59  ;;  %v6639_v3 = vld [vmem:[#allocation93_spill] sm:$0xff] }
 0x470   : > { %6600 = vst [vmem:[#allocation76_spill] sm:$0xff] %v5599_v39  ;;  %v1425_v36 = vsel %vm1124_vm7, %v1419_v10, %v1424_v51  ;;  %v1807_v63 = vpop.permute.xlu1 %1806  ;;  %v1832_v10 = vsel %vm976_vm3, %v6601_v18, %v1831_v16  ;;  %v2196_v13 = vadd.f32 %v6607_v26, %v2177_v34  ;;  %v6616_v34 = vld [vmem:[#allocation62_spill] sm:$0xff]  ;;  %v6622_v16 = vld [vmem:[#allocation95_spill] sm:$0xff] }
 0x471   : > { %v5610_v57 = vpop.permute.xlu0 %1968  ;;  %v5614_v41 = vadd.f32 %v1425_v36, %v1407_v20  ;;  %v1810_v25 = vrot.slane %v1807_v63, 4  ;;  %v1956_v36 = vadd.f32 %v6611_v7, %v1937_v31 }
 0x472   : > { %v2217_v45 = vadd.f32 %v5565_v9, %v2196_v13 }
 0x473   : > { %6603 = vst [vmem:[#allocation73_spill] sm:$0xff] %v5614_v41  ;;  %v1812_v46 = vsel %vm935_vm1, %v1810_v25, %v1811_v42  ;;  %v6613_v42 = vld [vmem:[#allocation60_spill] sm:$0xff]  ;;  %v1977_v54 = vadd.f32 %v5610_v57, %v1956_v36 }
 0x474   : > { %v1813_v60 = vsel %vm937_vm2, %v1807_v63, %v1812_v46  ;;  %v1847_v8 = vpop.permute.xlu1 %1846  ;;  %v1496_v14 = vrot.slane %v6613_v42, 4  ;;  %v6614_v25 = vld [vmem:[#allocation88_spill] sm:$0xff]  ;;  %v6624_v42 = vld [vmem:[#allocation90_spill] sm:$0xff] }
 0x475   : > { %v5622_v12 = vpop.permute.xlu0 %2248  ;;  %v1816_v59 = vadd.f32 %v1813_v60, %v1795_v2  ;;  %v1850_v48 = vrot.slane %v1847_v8, 4  ;;  %v1869_v6 = vrot.slane %v6614_v25, 4  ;;  %v6615_v2 = vld [vmem:[#allocation61_spill] sm:$0xff]  ;;  %v2150_v60 = vrot.slane %v6602_v1, 4 }
 0x476   : > { %6606 = vst [vmem:[#allocation67_spill] sm:$0xff] %v5622_v12  ;;  %v1891_v1 = vrot.slane %v5501_v58, 4  ;;  %v6627_v58 = vld [vmem:[#allocation91_spill] sm:$0xff] }
 0x477   : > { %v1835_v22 = vadd.f32 %v1832_v10, %v1816_v59  ;;  %v1852_v43 = vsel %vm935_vm1, %v1850_v48, %v1851_v62  ;;  %v1870_v48 = vrot.slane %v6599_v38, 4  ;;  %v6618_v10 = vld [vmem:[#allocation83_spill] sm:$0xff]  ;;  %v1996_v59 = vadd.f32 %v6621_v40, %v1977_v54 }
 0x478   : > { %v1853_v28 = vsel %vm976_vm3, %v1847_v8, %v1852_v43  ;;  %v5634_v51 = vpop.permute.xlu1 %2853  ;;  %v2236_v13 = vadd.f32 %v6618_v10, %v2217_v45  ;;  %v2698_v38 = vrot.slane %v4888_v29, 4  ;;  %v2444_v45 = vrot.slane %v6579_v23, 4  ;;  %v6625_v23 = vld [vmem:[#allocation92_spill] sm:$0xff] }
 0x479   : > { %v5632_v20 = vpop.permute.xlu0 %2796  ;;  %6610 = vst [vmem:[#allocation50_spill] sm:$0xff] %v5634_v51  ;;  %v1856_v63 = vadd.f32 %v1853_v28, %v1835_v22  ;;  %v6619_v22 = vld [vmem:[#allocation64_spill] sm:$0xff]  ;;  %v1871_v46 = vsel %vm935_vm1, %v1869_v6, %v1870_v48  ;;  %v1910_v43 = vrot.slane %v6605_v49, 4  ;;  %v2190_v54 = vrot.slane %v6607_v26, 4  ;;  %v6626_v49 = vld [vmem:[#allocation94_spill] sm:$0xff] }
 0x47a   : > { %6609 = vst [vmem:[#allocation122_spill] sm:$0xff] %v5632_v20  ;;  %v5639_v18 = vadd.f32 %v5632_v20, %v2784_v30  ;;  %v6620_v28 = vld [vmem:[#allocation68_spill] sm:$0xff]  ;;  %v2257_v31 = vadd.f32 %v5622_v12, %v2236_v13  ;;  %v1495_v30 = vrot.slane %v6622_v16, 4  ;;  %v1872_v29 = vsel %vm1013_vm4, %v6614_v25, %v1871_v46 }
 0x47b   : > { %v2697_v13 = vrot.slane %v6625_v23, 4  ;;  %v2443_v41 = vrot.slane %v6626_v49, 4  ;;  %v2738_v51 = vrot.slane %v6593_v37, 4  ;;  %v6631_v37 = vld [vmem:[#allocation98_spill] sm:$0xff] }
 0x47c   : > { %6612 = vst [vmem:[#allocation69_spill] sm:$0xff] %v5639_v18  ;;  %v5650_v62 = vpop.permute.xlu1 %2420  ;;  %v2149_v18 = vrot.slane %v6624_v42, 4  ;;  %v1497_v25 = vsel %vm935_vm1, %v1495_v30, %v1496_v14  ;;  %v6629_v30 = vld [vmem:[#allocation96_spill] sm:$0xff]  ;;  %v2189_v26 = vrot.slane %v6631_v37, 4 }
 0x47d   : > { %v5648_v8 = vpop.permute.xlu0 %2542  ;;  %v2445_v14 = vsel %vm935_vm1, %v2443_v41, %v2444_v45  ;;  %v6635_v45 = vld [vmem:[#allocation100_spill] sm:$0xff] }
 0x47e   : > { %6617 = vst [vmem:[#allocation78_spill] sm:$0xff] %v5648_v8  ;;  %v1875_v8 = vadd.f32 %v1872_v29, %v1856_v63  ;;  %v2151_v63 = vsel %vm935_vm1, %v2149_v18, %v2150_v60  ;;  %v6632_v18 = vld [vmem:[#allocation99_spill] sm:$0xff] }
 0x47f   : > { %v1575_v60 = vrot.slane %v6632_v18, 4  ;;  %v5709_v41 = vsel %vm1013_vm4, %v6624_v42, %v2151_v63  ;;  %v5723_v42 = vsel %vm1013_vm4, %v6626_v49, %v2445_v14  ;;  %v6641_v63 = vld [vmem:[#allocation56_spill] sm:$0xff]  ;;  %v6644_v49 = vld [vmem:[#allocation101_spill] sm:$0xff] }
 0x480   : > { %v1887_v36 = vpop.permute.xlu1 %1886  ;;  %6634 = vst [vmem:[#allocation48_spill] sm:$0xff] %v5709_v41  ;;  %6640 = vst [vmem:[#allocation82_spill] sm:$0xff] %v5723_v42  ;;  %v1615_v14 = vrot.slane %v6644_v49, 4  ;;  %v6645_v42 = vld [vmem:[#allocation102_spill] sm:$0xff] }
 0x481   : > { %v5668_v47 = vpop.permute.xlu0 %2008  ;;  %v1890_v48 = vrot.slane %v1887_v36, 4 }
 0x482   : > { %6623 = vst [vmem:[#allocation124_spill] sm:$0xff] %v5668_v47  ;;  %v2017_v6 = vadd.f32 %v5668_v47, %v1996_v59  ;;  %v2276_v59 = vadd.f32 %v6627_v58, %v2257_v31  ;;  %v2484_v47 = vrot.slane %v6596_v21, 4 }
 0x483   : > { %v1892_v20 = vsel %vm935_vm1, %v1890_v48, %v1891_v1  ;;  %v6630_v48 = vld [vmem:[#allocation97_spill] sm:$0xff] }
 0x484   : > { %2025 = vrot.lane.b32.xlu1 %v2017_v6, %s3682_s26  ;;  %v1893_v46 = vsel %vm1013_vm4, %v1887_v36, %v1892_v20  ;;  %v5688_v39 = vpop.permute.xlu1 %2166  ;;  %v2699_v6 = vsel %vm935_vm1, %v2697_v13, %v2698_v38  ;;  %v1909_v20 = vrot.slane %v6629_v30, 4  ;;  %v1498_v36 = vsel %vm937_vm2, %v6622_v16, %v1497_v25 }
 0x485   : > { %v5686_v12 = vpop.permute.xlu0 %2288  ;;  %v5692_v1 = vadd.f32 %v1893_v46, %v1875_v8  ;;  %v1535_v29 = vrot.slane %v6630_v48, 4  ;;  %v6633_v8 = vld [vmem:[#allocation87_spill] sm:$0xff]  ;;  %v2737_v13 = vrot.slane %v6635_v45, 4  ;;  %v5717_v21 = vsel %vm976_vm3, %v6625_v23, %v2699_v6 }
 0x486   : > { %6628 = vst [vmem:[#allocation80_spill] sm:$0xff] %v5686_v12  ;;  %v2297_v31 = vadd.f32 %v5686_v12, %v2276_v59  ;;  %6637 = vst [vmem:[#allocation70_spill] sm:$0xff] %v5717_v21  ;;  %v1501_v41 = vadd.f32 %v1498_v36, %v6641_v63  ;;  %v1911_v17 = vsel %vm935_vm1, %v1909_v20, %v1910_v43  ;;  %v6643_v6 = vrot.slane %v6616_v34, 4  ;;  %v6650_v63 = vld [vmem:[#allocation120_spill] sm:$0xff] }
 0x487   : > { %v2191_v23 = vsel %vm935_vm1, %v2189_v26, %v2190_v54  ;;  %v2739_v21 = vsel %vm935_vm1, %v2737_v13, %v2738_v51  ;;  %v2483_v36 = vrot.slane %v6645_v42, 4  ;;  %v1912_v54 = vsel %vm1050_vm5, %v6629_v30, %v1911_v17  ;;  %v6646_v26 = vld [vmem:[#allocation119_spill] sm:$0xff] }
 0x488   : > { %2317 = vrot.lane.b32.xlu0 %v2297_v31, %s3683_s10  ;;  %v5712_v25 = vpop.permute.xlu1 %2714  ;;  %v6638_v31 = vld [vmem:[#allocation118_spill] sm:$0xff]  ;;  %v1557_v34 = vrot.slane %v6646_v26, 4  ;;  %v5748_v51 = vsel %vm1050_vm5, %v6631_v37, %v2191_v23  ;;  %v5756_v17 = vsel %vm1013_vm4, %v6635_v45, %v2739_v21  ;;  %v1597_v23 = vrot.slane %v6650_v63, 4 }
 0x489   : > { %v1513_v16 = vpop.permute.xlu0 %1512  ;;  %6636 = vst [vmem:[#allocation63_spill] sm:$0xff] %v5712_v25  ;;  %v1517_v12 = vrot.slane %v6638_v31, 4  ;;  %v6642_v25 = vrot.slane %v6615_v2, 4  ;;  %v1577_v31 = vsel %vm935_vm1, %v1575_v60, %v6643_v6  ;;  %v2485_v37 = vsel %vm935_vm1, %v2483_v36, %v2484_v47  ;;  %v6653_v47 = vld [vmem:[#allocation107_spill] sm:$0xff] }
 0x48a   : > { %v1516_v59 = vrot.slane %v1513_v16, 4  ;;  %v2069_v36 = vrot.slane %v6653_v47, 4 }
 0x48b   : > { %v1537_v46 = vsel %vm935_vm1, %v1535_v29, %v6642_v25  ;;  %v1578_v25 = vsel %vm1013_vm4, %v6632_v18, %v1577_v31  ;;  %v1931_v18 = vrot.slane %v5552_v35, 4  ;;  %v1915_v35 = vadd.f32 %v1912_v54, %v5692_v1 }
 0x48c   : > { %v1518_v38 = vsel %vm935_vm1, %v1516_v59, %v1517_v12  ;;  %v5739_v2 = vpop.permute.xlu1 %2460  ;;  %v1538_v12 = vsel %vm976_vm3, %v6630_v48, %v1537_v46  ;;  %v6647_v59 = vld [vmem:[#allocation103_spill] sm:$0xff]  ;;  %v6649_v48 = vrot.slane %v4677_v27, 4  ;;  %v6652_v27 = vrot.slane %v6611_v7, 4 }
 0x48d   : > { %v1519_v43 = vsel %vm937_vm2, %v1513_v16, %v1518_v38  ;;  %v1553_v20 = vpop.permute.xlu0 %1552  ;;  %v1655_v13 = vrot.slane %v6647_v59, 4  ;;  %v6648_v38 = vld [vmem:[#allocation104_spill] sm:$0xff]  ;;  %v5790_v54 = vsel %vm1050_vm5, %v6645_v42, %v2485_v37 }
 0x48e   : > { %v1522_v29 = vadd.f32 %v1519_v43, %v1501_v41  ;;  %v1556_v60 = vrot.slane %v1553_v20, 4  ;;  %v1949_v16 = vrot.slane %v6648_v38, 4  ;;  %v1617_v46 = vsel %vm935_vm1, %v1615_v14, %v6649_v48  ;;  %v6655_v48 = vld [vmem:[#allocation105_spill] sm:$0xff] }
 0x48f   : > { %v1695_v63 = vrot.slane %v6655_v48, 4  ;;  %v1618_v1 = vsel %vm1050_vm5, %v6644_v49, %v1617_v46  ;;  %v6661_v46 = vrot.slane %v4704_v55, 4  ;;  %v6663_v55 = vrot.slane %v6608_v24, 4 }
 0x490   : > { %v1541_v30 = vadd.f32 %v1538_v12, %v1522_v29  ;;  %v1558_v41 = vsel %vm935_vm1, %v1556_v60, %v1557_v34  ;;  %v1927_v26 = vpop.permute.xlu1 %1926  ;;  %v6651_v29 = vrot.slane %v4692_v15, 4  ;;  %v1951_v14 = vsel %vm935_vm1, %v1949_v16, %v6652_v27  ;;  %v6654_v60 = vld [vmem:[#allocation109_spill] sm:$0xff]  ;;  %v6656_v15 = vld [vmem:[#allocation106_spill] sm:$0xff] }
 0x491   : > { %v1559_v6 = vsel %vm976_vm3, %v1553_v20, %v1558_v41  ;;  %v1593_v43 = vpop.permute.xlu0 %1592  ;;  %v1930_v45 = vrot.slane %v1927_v26, 4  ;;  %v2363_v12 = vrot.slane %v6654_v60, 4  ;;  %v1637_v27 = vrot.slane %v5296_v61, 4 }
 0x492   : > { %v1562_v31 = vadd.f32 %v1559_v6, %v1541_v30  ;;  %v1596_v21 = vrot.slane %v1593_v43, 4  ;;  %v1657_v34 = vsel %vm935_vm1, %v1655_v13, %v6651_v29  ;;  %v2229_v6 = vrot.slane %v6656_v15, 4 }
 0x493   : > { %v1932_v30 = vsel %vm935_vm1, %v1930_v45, %v1931_v18  ;;  %v6657_v18 = vld [vmem:[#allocation108_spill] sm:$0xff]  ;;  %v6659_v45 = vrot.slane %v6588_v53, 4  ;;  %v6660_v61 = vrot.slane %v6619_v22, 4  ;;  %v1658_v49 = vsel %vm1087_vm6, %v6647_v59, %v1657_v34 }
 0x494   : > { %v1581_v20 = vadd.f32 %v1578_v25, %v1562_v31  ;;  %v1598_v41 = vsel %vm935_vm1, %v1596_v21, %v1597_v23  ;;  %v1933_v7 = vsel %vm1050_vm5, %v1927_v26, %v1932_v30  ;;  %v5781_v29 = vpop.permute.xlu1 %2206  ;;  %v6658_v21 = vld [vmem:[#allocation110_spill] sm:$0xff]  ;;  %v1952_v42 = vsel %vm1087_vm6, %v6648_v38, %v1951_v14 }
 0x495   : > { %v1599_v13 = vsel %vm1013_vm4, %v1593_v43, %v1598_v41  ;;  %v1633_v16 = vpop.permute.xlu0 %1632  ;;  %v5784_v31 = vadd.f32 %v1933_v7, %v1915_v35  ;;  %v2777_v43 = vrot.slane %v6657_v18, 4  ;;  %v2523_v26 = vrot.slane %v6658_v21, 4 }
 0x496   : > { %v1602_v25 = vadd.f32 %v1599_v13, %v1581_v20  ;;  %v1636_v23 = vrot.slane %v1633_v16, 4  ;;  %v2071_v41 = vsel %vm935_vm1, %v2069_v36, %v6659_v45  ;;  %v2365_v20 = vsel %vm935_vm1, %v2363_v12, %v6660_v61 }
 0x497   : > { %v1697_v37 = vsel %vm935_vm1, %v1695_v63, %v6661_v46  ;;  %v6662_v22 = vrot.slane %v6618_v10, 4  ;;  %v1677_v7 = vrot.slane %v5315_v4, 4  ;;  %v2072_v38 = vsel %vm937_vm2, %v6653_v47, %v2071_v41  ;;  %v6669_v46 = vld [vmem:[#allocation58_spill] sm:$0xff] }
 0x498   : > { %v1621_v35 = vadd.f32 %v1618_v1, %v1602_v25  ;;  %v1638_v30 = vsel %vm935_vm1, %v1636_v23, %v1637_v27  ;;  %v5809_v13 = vpop.permute.xlu1 %2754  ;;  %v2779_v34 = vsel %vm935_vm1, %v2777_v43, %v6663_v55  ;;  %v2366_v14 = vsel %vm937_vm2, %v6654_v60, %v2365_v20  ;;  %v6666_v25 = vld [vmem:[#allocation113_spill] sm:$0xff]  ;;  %v6667_v43 = vld [vmem:[#allocation112_spill] sm:$0xff]  ;;  %v6674_v55 = vld [vmem:[#allocation115_spill] sm:$0xff] }
 0x499   : > { %v1639_v53 = vsel %vm1050_vm5, %v1633_v16, %v1638_v30  ;;  %v1673_v36 = vpop.permute.xlu0 %1672  ;;  %v2231_v12 = vsel %vm935_vm1, %v2229_v6, %v6662_v22  ;;  %v6664_v63 = vrot.slane %v6633_v8, 4  ;;  %v6665_v16 = vld [vmem:[#allocation111_spill] sm:$0xff]  ;;  %v2657_v4 = vrot.slane %v6666_v25, 4 }
 0x49a   : > { %v1642_v27 = vadd.f32 %v1639_v53, %v1621_v35  ;;  %v1676_v59 = vrot.slane %v1673_v36, 4  ;;  %v2109_v6 = vrot.slane %v6665_v16, 4  ;;  %v1698_v47 = vsel %vm1124_vm7, %v6655_v48, %v1697_v37  ;;  %v6668_v48 = vld [vmem:[#allocation57_spill] sm:$0xff]  ;;  %v6670_v53 = vld [vmem:[#allocation114_spill] sm:$0xff] }
 0x49b   : > { %v2525_v10 = vsel %vm935_vm1, %v2523_v26, %v6664_v63  ;;  %v5832_v24 = vsel %vm1087_vm6, %v6656_v15, %v2231_v12  ;;  %v1989_v60 = vrot.slane %v6667_v43, 4  ;;  %v5840_v61 = vsel %vm1050_vm5, %v6657_v18, %v2779_v34 }
 0x49c   : > { %v1661_v23 = vadd.f32 %v1658_v49, %v1642_v27  ;;  %v1678_v1 = vsel %vm935_vm1, %v1676_v59, %v1677_v7  ;;  %v5836_v26 = vpop.permute.xlu1 %2500  ;;  %v1717_v20 = vrot.slane %v5335_v33, 4  ;;  %v2075_v49 = vadd.f32 %v2072_v38, %v6668_v48 }
 0x49d   : > { %v1679_v45 = vsel %vm1087_vm6, %v1673_v36, %v1678_v1  ;;  %v1713_v41 = vpop.permute.xlu0 %1712  ;;  %v2369_v15 = vadd.f32 %v2366_v14, %v6669_v46  ;;  %v5847_v37 = vsel %vm1087_vm6, %v6658_v21, %v2525_v10  ;;  %v2269_v36 = vrot.slane %v6670_v53, 4 }
 0x49e   : > { %v1682_v35 = vadd.f32 %v1679_v45, %v1661_v23  ;;  %v1716_v30 = vrot.slane %v1713_v41, 4  ;;  %v6671_v22 = vrot.slane %v6595_v50, 4  ;;  %v6672_v18 = vrot.slane %v6620_v28, 4 }
 0x49f   : > { %v6673_v59 = vrot.slane %v6621_v40, 4  ;;  %v2403_v21 = vrot.slane %v6674_v55, 4  ;;  %v2091_v34 = vrot.slane %v6591_v52, 4  ;;  %v1971_v10 = vrot.slane %v5610_v57, 4 }
 0x4a0   : > { %v2111_v12 = vsel %vm935_vm1, %v2109_v6, %v6671_v22  ;;  %v2659_v33 = vsel %vm935_vm1, %v2657_v4, %v6672_v18  ;;  %v1701_v7 = vadd.f32 %v1698_v47, %v1682_v35  ;;  %v1718_v27 = vsel %vm935_vm1, %v1716_v30, %v1717_v20  ;;  %v1967_v63 = vpop.permute.xlu1 %1966  ;;  %v6676_v47 = vld [vmem:[#allocation116_spill] sm:$0xff]  ;;  %v6679_v18 = vld [vmem:[#allocation59_spill] sm:$0xff] }
 0x4a1   : > { %v1991_v38 = vsel %vm935_vm1, %v1989_v60, %v6673_v59  ;;  %v1719_v14 = vsel %vm1124_vm7, %v1713_v41, %v1718_v27  ;;  %v2087_v50 = vpop.permute.xlu0 %2086  ;;  %v1970_v4 = vrot.slane %v1967_v63, 4  ;;  %v2112_v23 = vsel %vm976_vm3, %v6665_v16, %v2111_v12 }
 0x4a2   : > { %v5864_v28 = vadd.f32 %v1719_v14, %v1701_v7  ;;  %v2090_v6 = vrot.slane %v2087_v50, 4  ;;  %v2660_v40 = vsel %vm937_vm2, %v6666_v25, %v2659_v33  ;;  %v6675_v1 = vrot.slane %v6627_v58, 4  ;;  %v6678_v58 = vld [vmem:[#allocation125_spill] sm:$0xff] }
 0x4a3   : > { %v2817_v60 = vrot.slane %v6676_v47, 4  ;;  %v2424_v45 = vrot.slane %v5650_v62, 4  ;;  %v1955_v41 = vadd.f32 %v1952_v42, %v5784_v31  ;;  %v1972_v20 = vsel %vm935_vm1, %v1970_v4, %v1971_v10 }
 0x4a4   : > { %v2271_v52 = vsel %vm935_vm1, %v2269_v36, %v6675_v1  ;;  %v2092_v57 = vsel %vm935_vm1, %v2090_v6, %v2091_v34  ;;  %1739 = vrot.lane.b32.xlu0 %v5864_v28, %s3681_s7  ;;  %v6677_v16 = vrot.slane %v4779_v56, 4  ;;  %v2385_v35 = vrot.slane %v6678_v58, 4  ;;  %v5886_v36 = vpop.permute.xlu1 %2246 }
 0x4a5   : > { %v2093_v30 = vsel %vm937_vm2, %v2087_v50, %v2092_v57  ;;  %v1973_v48 = vsel %vm1087_vm6, %v1967_v63, %v1972_v20  ;;  %v2381_v46 = vpop.permute.xlu0 %2380  ;;  %v2425_v31 = vrot.slane %v5485_v44, 4  ;;  %v5893_v56 = vsel %vm1124_vm7, %v6667_v43, %v1991_v38 }
 0x4a6   : > { %v2405_v25 = vsel %vm935_vm1, %v2403_v21, %v6677_v16  ;;  %v2096_v42 = vadd.f32 %v2093_v30, %v2075_v49  ;;  %v5889_v22 = vadd.f32 %v1973_v48, %v1955_v41  ;;  %v2384_v12 = vrot.slane %v2381_v46, 4  ;;  %v6682_v16 = vld [vmem:[#allocation121_spill] sm:$0xff]  ;;  %v6683_v30 = vld [vmem:[#allocation51_spill] sm:$0xff] }
 0x4a7   : > { %v2663_v33 = vadd.f32 %v2660_v40, %v6679_v18  ;;  %v5898_v7 = vsel %vm1124_vm7, %v6670_v53, %v2271_v52  ;;  %v6680_v27 = vrot.slane %v6639_v3, 4  ;;  %v2406_v44 = vsel %vm976_vm3, %v6674_v55, %v2405_v25  ;;  %v6685_v18 = vld [vmem:[#allocation82_spill] sm:$0xff] }
 0x4a8   : > { %v2426_v49 = vsel %vm935_vm1, %v2424_v45, %v2425_v31  ;;  %v2170_v21 = vrot.slane %v5688_v39, 4  ;;  %v2386_v43 = vsel %vm935_vm1, %v2384_v12, %v2385_v35  ;;  %v2131_v38 = vrot.slane %v6597_v0, 4  ;;  %v5914_v63 = vpop.permute.xlu1 %2794  ;;  %v6681_v0 = vld [vmem:[#allocation63_spill] sm:$0xff] }
 0x4a9   : > { %v5903_v59 = vsel %vm935_vm1, %v2817_v60, %v6680_v27  ;;  %v2679_v34 = vrot.slane %v5418_v32, 4  ;;  %v2464_v53 = vrot.slane %v5739_v2, 4  ;;  %v2387_v14 = vsel %vm937_vm2, %v2381_v46, %v2386_v43  ;;  %v2127_v50 = vpop.permute.xlu0 %2126 }
 0x4aa   : > { %v2171_v10 = vrot.slane %v5513_v11, 4  ;;  %v2719_v55 = vrot.slane %v5526_v5, 4  ;;  %v2390_v6 = vadd.f32 %v2387_v14, %v2369_v15  ;;  %v2130_v4 = vrot.slane %v2127_v50, 4 }
 0x4ab   : > { %v2465_v40 = vrot.slane %v5539_v19, 4  ;;  %v2211_v1 = vrot.slane %v5565_v9, 4  ;;  %v2427_v32 = vsel %vm976_vm3, %v5650_v62, %v2426_v49  ;;  %v2718_v52 = vrot.slane %v6681_v0, 4 }
 0x4ac   : > { %v2172_v60 = vsel %vm935_vm1, %v2170_v21, %v2171_v10  ;;  %v2409_v45 = vadd.f32 %v2406_v44, %v2390_v6  ;;  %v2115_v57 = vadd.f32 %v2112_v23, %v2096_v42  ;;  %v2132_v41 = vsel %vm935_vm1, %v2130_v4, %v2131_v38  ;;  %v2541_v20 = vpop.permute.xlu1 %2540  ;;  %v6684_v23 = vld [vmem:[#allocation76_spill] sm:$0xff]  ;;  %v6687_v6 = vld [vmem:[#allocation67_spill] sm:$0xff] }
 0x4ad   : > { %v2466_v11 = vsel %vm935_vm1, %v2464_v53, %v2465_v40  ;;  %v2210_v5 = vrot.slane %v5781_v29, 4  ;;  %v2504_v15 = vrot.slane %v5836_v26, 4  ;;  %v2133_v19 = vsel %vm976_vm3, %v2127_v50, %v2132_v41  ;;  %v2675_v9 = vpop.permute.xlu0 %2674  ;;  %v6686_v44 = vld [vmem:[#allocation48_spill] sm:$0xff]  ;;  %v6688_v40 = vld [vmem:[#allocation122_spill] sm:$0xff] }
 0x4ae   : > { %v2759_v62 = vrot.slane %v6682_v16, 4  ;;  %v2430_v25 = vadd.f32 %v2427_v32, %v2409_v45  ;;  %v2136_v58 = vadd.f32 %v2133_v19, %v2115_v57  ;;  %v2678_v35 = vrot.slane %v2675_v9, 4  ;;  %v6690_v57 = vld [vmem:[#allocation70_spill] sm:$0xff] }
 0x4af   : > { %v2505_v48 = vrot.slane %v6683_v30, 4  ;;  %v2530_v46 = vadd.f32 %v6633_v8, %v6684_v23  ;;  %v2173_v31 = vsel %vm1013_vm4, %v5688_v39, %v2172_v60  ;;  %v2720_v42 = vsel %vm935_vm1, %v2718_v52, %v2719_v55 }
 0x4b0   : > { %v2467_v12 = vsel %vm1013_vm4, %v5739_v2, %v2466_v11  ;;  %v2449_v27 = vadd.f32 %v6685_v18, %v2430_v25  ;;  %v2155_v49 = vadd.f32 %v6686_v44, %v2136_v58  ;;  %v2680_v21 = vsel %vm935_vm1, %v2678_v35, %v2679_v34  ;;  %v2007_v14 = vpop.permute.xlu1 %2006  ;;  %v6689_v34 = vld [vmem:[#allocation78_spill] sm:$0xff]  ;;  %v6691_v35 = vld [vmem:[#allocation124_spill] sm:$0xff] }
 0x4b1   : > { %v2212_v43 = vsel %vm935_vm1, %v2210_v5, %v2211_v1  ;;  %v2758_v38 = vrot.slane %v5809_v13, 4  ;;  %v2506_v8 = vsel %vm935_vm1, %v2504_v15, %v2505_v48  ;;  %v2681_v53 = vsel %vm937_vm2, %v2675_v9, %v2680_v21  ;;  %v5945_v39 = vpop.permute.xlu0 %2561 }
 0x4b2   : > { %v2176_v50 = vadd.f32 %v2173_v31, %v2155_v49  ;;  %v2684_v10 = vadd.f32 %v2681_v53, %v2663_v33  ;;  %v2470_v2 = vadd.f32 %v2467_v12, %v2449_v27  ;;  %v2544_v55 = vrot.slane %v2541_v20, 4  ;;  %v6692_v31 = vld [vmem:[#allocation80_spill] sm:$0xff] }
 0x4b3   : > { %v2251_v4 = vrot.slane %v6687_v6, 4  ;;  %v2799_v32 = vrot.slane %v6688_v40, 4  ;;  %v2545_v52 = vrot.slane %v6689_v34, 4  ;;  %v2250_v1 = vrot.slane %v5886_v36, 4 }
 0x4b4   : > { %v2551_v60 = vadd.f32 %v6689_v34, %v2530_v46  ;;  %v2195_v45 = vadd.f32 %v5748_v51, %v2176_v50  ;;  %v2703_v41 = vadd.f32 %v6690_v57, %v2684_v10  ;;  %v2489_v11 = vadd.f32 %v5790_v54, %v2470_v2  ;;  %v2287_v16 = vpop.permute.xlu1 %2286  ;;  %v6693_v10 = vld [vmem:[#allocation117_spill] sm:$0xff] }
 0x4b5   : > { %v2721_v33 = vsel %vm976_vm3, %v6681_v0, %v2720_v42  ;;  %v2213_v5 = vsel %vm1050_vm5, %v5781_v29, %v2212_v43  ;;  %v2760_v15 = vsel %vm935_vm1, %v2758_v38, %v2759_v62  ;;  %v2507_v19 = vsel %vm1050_vm5, %v5836_v26, %v2506_v8  ;;  %v5962_v9 = vpop.permute.xlu0 %2836  ;;  %v6694_v2 = vld [vmem:[#allocation50_spill] sm:$0xff] }
 0x4b6   : > { %v2798_v51 = vrot.slane %v5914_v63, 4  ;;  %v2724_v25 = vadd.f32 %v2721_v33, %v2703_v41  ;;  %v2510_v58 = vadd.f32 %v2507_v19, %v2489_v11  ;;  %v2546_v54 = vsel %vm935_vm1, %v2544_v55, %v2545_v52 }
 0x4b7   : > { %v2011_v30 = vrot.slane %v6691_v35, 4  ;;  %v2252_v0 = vsel %vm935_vm1, %v2250_v1, %v2251_v4  ;;  %v2216_v48 = vadd.f32 %v2213_v5, %v2195_v45  ;;  %v2290_v29 = vrot.slane %v2287_v16, 4  ;;  %v6695_v5 = vld [vmem:[#allocation73_spill] sm:$0xff] }
 0x4b8   : > { %v2743_v62 = vadd.f32 %v5756_v17, %v2724_v25  ;;  %v2529_v23 = vadd.f32 %v5847_v37, %v2510_v58  ;;  %v2570_v26 = vadd.f32 %v5945_v39, %v2551_v60  ;;  %v2010_v46 = vrot.slane %v2007_v14, 4  ;;  %v2835_v49 = vpop.permute.xlu1 %2834 }
 0x4b9   : > { %v2291_v42 = vrot.slane %v6692_v31, 4  ;;  %v2761_v12 = vsel %vm1013_vm4, %v5809_v13, %v2760_v15  ;;  %v2547_v18 = vsel %vm1087_vm6, %v2541_v20, %v2546_v54  ;;  %v2235_v27 = vadd.f32 %v5832_v24, %v2216_v48  ;;  %v2583_v44 = vpop.permute.xlu0 %2582 }
 0x4ba   : > { %v2253_v21 = vsel %vm1087_vm6, %v5886_v36, %v2252_v0  ;;  %v2800_v17 = vsel %vm935_vm1, %v2798_v51, %v2799_v32  ;;  %v2550_v37 = vadd.f32 %v2547_v18, %v2529_v23  ;;  %v2591_v43 = vadd.f32 %v2583_v44, %v2570_v26 }
 0x4bb   : > { %v2256_v38 = vadd.f32 %v2253_v21, %v2235_v27  ;;  %v2292_v8 = vsel %vm935_vm1, %v2290_v29, %v2291_v42  ;;  %v2764_v53 = vadd.f32 %v2761_v12, %v2743_v62  ;;  %v2838_v50 = vrot.slane %v2835_v49, 4  ;;  %v6696_v42 = vld [vmem:[#allocation69_spill] sm:$0xff] }
 0x4bc   : > { %v2563_v13 = vrot.slane %v6693_v10, 4  ;;  %v2857_v20 = vrot.slane %v6694_v2, 4  ;;  %v2564_v24 = vrot.slane %v5945_v39, 4  ;;  %v2012_v55 = vsel %vm935_vm1, %v2010_v46, %v2011_v30  ;;  %2611 = vrot.lane.b32.xlu1 %v2591_v43, %s3684_s14  ;;  %v2581_v34 = vpop.permute.xlu1 %2580 }
 0x4bd   : > { %v2801_v36 = vsel %vm1050_vm5, %v5914_v63, %v2800_v17  ;;  %v2839_v6 = vrot.slane %v5962_v9, 4  ;;  %v2275_v4 = vadd.f32 %v5898_v7, %v2256_v38  ;;  %v2783_v40 = vadd.f32 %v5840_v61, %v2764_v53  ;;  %v2856_v32 = vpop.permute.xlu0 %2855 }
 0x4be   : > { %v2293_v52 = vsel %vm1124_vm7, %v2287_v16, %v2292_v8  ;;  %v2585_v1 = vrot.slane %v2583_v44, 4  ;;  %v2858_v39 = vrot.slane %v2856_v32, 4  ;;  %v2584_v60 = vrot.slane %v2581_v34, 4 }
 0x4bf   : > { %v2013_v45 = vsel %vm1124_vm7, %v2007_v14, %v2012_v55  ;;  %v2296_v57 = vadd.f32 %v2293_v52, %v2275_v4  ;;  %v2804_v41 = vadd.f32 %v2801_v36, %v2783_v40  ;;  %v2840_v11 = vsel %vm935_vm1, %v2838_v50, %v2839_v6  ;;  %v6697_v36 = vld [vmem:[#allocation65_spill] sm:$0xff] }
 0x4c0   : > { %v2820_v63 = vsel %vm1087_vm6, %v6676_v47, %v5903_v59  ;;  %v2565_v7 = vsel %vm935_vm1, %v2563_v13, %v2564_v24  ;;  %v1995_v61 = vadd.f32 %v5893_v56, %v5889_v22  ;;  %v2586_v33 = vsel %vm935_vm1, %v2584_v60, %v2585_v1  ;;  %1445 = vrot.lane.b32.xlu1 %v6695_v5, %s6573_s3  ;;  %v2875_v16 = vpop.permute.xlu1 %2874 }
 0x4c1   : > { %v2823_v15 = vadd.f32 %v2820_v63, %v2804_v41  ;;  %v2859_v14 = vsel %vm935_vm1, %v2857_v20, %v2858_v39  ;;  %2313 = vrot.lane.b32.xlu0 %v2296_v57, %s3683_s10  ;;  %v2877_v19 = vpop.permute.xlu0 %2876  ;;  %v2841_v47 = vsel %vm1087_vm6, %v2835_v49, %v2840_v11  ;;  %v2878_v25 = vrot.slane %v2875_v16, 4 }
 0x4c2   : > { %v2016_v51 = vadd.f32 %v2013_v45, %v1995_v61  ;;  %v2879_v59 = vrot.slane %v2877_v19, 4  ;;  %v2566_v22 = vsel %vm1124_vm7, %v6693_v10, %v2565_v7  ;;  %v2587_v56 = vsel %vm1124_vm7, %v2581_v34, %v2586_v33 }
 0x4c3   : > { %v2844_v58 = vadd.f32 %v2841_v47, %v2823_v15  ;;  %v2569_v54 = vadd.f32 %v2566_v22, %v2550_v37  ;;  %v2860_v35 = vsel %vm1124_vm7, %v6694_v2, %v2859_v14  ;;  %v1738_v23 = vcombine.high %v5864_v28, %v5864_v28 }
 0x4c4   : > { %v2880_v30 = vsel %vm935_vm1, %v2878_v25, %v2879_v59  ;;  %2021 = vrot.lane.b32.xlu1 %v2016_v51, %s3682_s26  ;;  %v1444_v26 = vcombine.high %v6695_v5, %v6695_v5  ;;  %v2312_v46 = vcombine.high %v2296_v57, %v2296_v57  ;;  %v2020_v31 = vcombine.high %v2016_v51, %v2016_v51  ;;  %v1450_v21 = vpop.permute.xlu1 %1449 }
 0x4c5   : > { %v2863_v0 = vadd.f32 %v2860_v35, %v2844_v58  ;;  %v2881_v48 = vsel %vm1124_vm7, %v2875_v16, %v2880_v30  ;;  %v2590_v29 = vadd.f32 %v2587_v56, %v2569_v54  ;;  %v2824_v12 = vadd.f32 %v6639_v3, %v6696_v42  ;;  %v1744_v38 = vpop.permute.xlu0 %1743 }
 0x4c6   : > { %v879_v17 = vlaneseq  ;;  %v1160_v6 = vcombine.high %v6697_v36, %v6697_v36  ;;  %vm2319_vm3 = vcmask 1014784   ;;  %vm2907_vm4 = vcmask 998400  }
 0x4c7   : > { %v2884_v62 = vadd.f32 %v2881_v48, %v2863_v0  ;;  %v2845_v27 = vadd.f32 %v5962_v9, %v2824_v12  ;;  %v2606_v28 = vcombine.high %v2590_v29, %v2590_v29  ;;  %vm2613_vm6 = vcmask 1006592  }
 0x4c8   : > { %2607 = vrot.lane.b32.xlu1 %v2590_v29, %s3684_s14  ;;  %v880_v43 = vand.u32 127, %v879_v17 }
 0x4c9   : > { %2901 = vrot.lane.b32.xlu0 %v2884_v62, %s3685_s18  ;;  %v2900_v18 = vcombine.high %v2884_v62, %v2884_v62  ;;  %v2864_v44 = vadd.f32 %v2856_v32, %v2845_v27 }
 0x4ca   : > { %v881_v3 = vadd.s32 128, %v880_v43  ;;  %v886_v50 = vand.u32 15, %v880_v43  ;;  %v2917_v43 = vstv %s6036_s6 }
 0x4cb   : > { %v2885_v49 = vadd.f32 %v2877_v19, %v2864_v44 }
 0x4cc   : > { %1741 = vrot.lane.b32.xlu1 %v1738_v23, %s3681_s7  ;;  %v893_v9 = vand.u32 15, %v881_v3  ;;  %v1147_v2 = vadd.s32 4294967293, %v886_v50  ;;  %v1430_v40 = vadd.s32 4294967294, %v886_v50  ;;  %v1724_v34 = vadd.s32 4294967295, %v886_v50 }
 0x4cd   : > { %1447 = vrot.lane.b32.xlu0 %v1444_v26, %s6573_s3  ;;  %v2298_v39 = vadd.s32 1, %v886_v50  ;;  %v2592_v14 = vadd.s32 2, %v886_v50  ;;  %v2886_v59 = vadd.s32 3, %v886_v50 }
 0x4ce   : > { %v1148_v24 = vadd.s32 4294967293, %v893_v9  ;;  %vm1149_vm8 = vcmp.ge.s32.totalorder %v1147_v2, 0  ;;  %v1431_v32 = vadd.s32 4294967294, %v893_v9  ;;  %v1725_v1 = vadd.s32 4294967295, %v893_v9 }
 0x4cf   : > { %v2299_v60 = vadd.s32 1, %v893_v9  ;;  %v1162_v45 = vsel %vm1149_vm8, %v6697_v36, 0.0  ;;  %vm1432_vm12 = vcmp.ge.s32.totalorder %v1430_v40, 0  ;;  %vm1726_vm14 = vcmp.ge.s32.totalorder %v1724_v34, 0 }
 0x4d0   : > { %2315 = vrot.lane.b32.xlu1 %v2312_v46, %s3683_s10  ;;  %vm1150_vm9 = vcmp.ge.s32.totalorder %v1148_v24, 0  ;;  %vm1433_vm13 = vcmp.ge.s32.totalorder %v1431_v32, 0  ;;  %vm1727_vm0 = vcmp.ge.s32.totalorder %v1725_v1, 0  ;;  %vm2302_vm1 = vcmp.lt.s32.totalorder %v2298_v39, 16 }
 0x4d1   : > { %2023 = vrot.lane.b32.xlu0 %v2020_v31, %s3682_s26  ;;  %v1163_v57 = vsel %vm1150_vm9, %v1160_v6, 0.0  ;;  %vm2303_vm2 = vcmp.lt.s32.totalorder %v2299_v60, 16  ;;  %v2593_v19 = vadd.s32 2, %v893_v9  ;;  %vm2596_vm5 = vcmp.lt.s32.totalorder %v2592_v14, 16 }
 0x4d2   : > { %v2887_v26 = vadd.s32 3, %v893_v9  ;;  %vm2890_vm8 = vcmp.lt.s32.totalorder %v2886_v59, 16  ;;  %v2921_v9 = vstv %s6040_s16  ;;  %v3686_v39 = vmov 1966171168  }
 0x4d3   : > { %vm2597_vm7 = vcmp.lt.s32.totalorder %v2593_v19, 16  ;;  %v2942_v60 = vunpack.c.l.s4 %v3686_v39 }
 0x4d4   : > { %2903 = vrot.lane.b32.xlu1 %v2900_v18, %s3685_s18  ;;  %vm2891_vm9 = vcmp.lt.s32.totalorder %v2887_v26, 16 }
 0x4d5   : > { %2609 = vrot.lane.b32.xlu0 %v2606_v28, %s3684_s14 }
 0x4d9   : > { %2905 = vrot.lane.b32.xlu0 %v2885_v49, %s3685_s18 }
 0x4f6   : > { %v2026_v37 = vpop.permute.xlu1 %2025 }
 0x4fa   : > { %v2318_v53 = vpop.permute.xlu0 %2317 }
 0x516   : > { %v1740_v13 = vpop.permute.xlu0 %1739 }
 0x52e   : > { %v6027_v8 = vpop.permute.xlu1 %2611 }
 0x532   : > { %v1446_v10 = vpop.permute.xlu1 %1445 }
 0x533   : > { %v2314_v55 = vpop.permute.xlu0 %2313 }
 0x536   : > { %v2022_v20 = vpop.permute.xlu1 %2021 }
 0x53a   : > { %v2608_v4 = vpop.permute.xlu1 %2607 }
 0x53b   : > { %v2902_v52 = vpop.permute.xlu0 %2901 }
 0x53e   : > { %v1742_v41 = vpop.permute.xlu1 %1741 }
 0x53f   : > { %v1448_v11 = vpop.permute.xlu0 %1447  ;;  %v1746_v61 = vsel %vm1745_vm11, %v1740_v13, %v1742_v41  ;;  %v1747_v33 = vsel %vm1745_vm11, %v1742_v41, %v1744_v38 }
 0x540   : > { %v1452_v63 = vsel %vm1451_vm10, %v1446_v10, %v1448_v11  ;;  %v1453_v7 = vsel %vm1451_vm10, %v1448_v11, %v1450_v21  ;;  %v1750_v25 = vsel %vm1726_vm14, %v1746_v61, 0.0  ;;  %v1751_v58 = vsel %vm1727_vm0, %v1747_v33, 0.0 }
 0x541   : > { %v1456_v5 = vsel %vm1432_vm12, %v1452_v63, 0.0  ;;  %v1457_v15 = vsel %vm1433_vm13, %v1453_v7, 0.0 }
 0x542   : > { %v1458_v16 = vadd.f32 %v1456_v5, %v1162_v45  ;;  %v1459_v51 = vadd.f32 %v1457_v15, %v1163_v57  ;;  %v2316_v47 = vpop.permute.xlu1 %2315  ;;  %v2945_v45 = vshrl.u32 %v879_v17, 7  ;;  %v2943_v57 = vunpack.c.0.s8 %v2942_v60  ;;  %v6701_v17 = vld [vmem:[#allocation29_spill] sm:$0xff] }
 0x543   : > { %v2024_v22 = vpop.permute.xlu0 %2023  ;;  %v2320_v56 = vsel %vm2319_vm3, %v2314_v55, %v2316_v47  ;;  %v2321_v54 = vsel %vm2319_vm3, %v2316_v47, %v2318_v53 }
 0x544   : > { %v1752_v35 = vadd.f32 %v1750_v25, %v1458_v16  ;;  %v1753_v30 = vadd.f32 %v1751_v58, %v1459_v51  ;;  %v2028_v0 = vsel %vm2027_vm15, %v2022_v20, %v2024_v22  ;;  %v2029_v48 = vsel %vm2027_vm15, %v2024_v22, %v2026_v37  ;;  %v6700_v25 = vld [vmem:[#allocation28_spill] sm:$0xff] }
 0x545   : > { %v2324_v46 = vsel %vm2302_vm1, %v2320_v56, 0.0  ;;  %v2325_v31 = vsel %vm2303_vm2, %v2321_v54, 0.0  ;;  %v2946_v11 = vsub.s32 %v2943_v57, %v2945_v45  ;;  %v2965_v61 = vsub.s32 0, %v2945_v45  ;;  %v6703_v56 = vld [vmem:[#allocation26_spill] sm:$0xff] }
 0x546   : > { %v2032_v29 = vadd.f32 %v2028_v0, %v1752_v35  ;;  %v2033_v62 = vadd.f32 %v2029_v48, %v1753_v30  ;;  %v2904_v23 = vpop.permute.xlu1 %2903  ;;  %v2969_v33 = vsub.s32 1, %v2945_v45  ;;  %v6704_v35 = vld [vmem:[#allocation27_spill] sm:$0xff]  ;;  %v6705_v0 = vld [vmem:[#allocation30_spill] sm:$0xff] }
 0x547   : > { %v2610_v42 = vpop.permute.xlu0 %2609  ;;  %v2908_v12 = vsel %vm2907_vm4, %v2902_v52, %v2904_v23 }
 0x548   : > { %v2326_v18 = vadd.f32 %v2324_v46, %v2032_v29  ;;  %v2327_v27 = vadd.f32 %v2325_v31, %v2033_v62  ;;  %v2614_v28 = vsel %vm2613_vm6, %v2608_v4, %v2610_v42  ;;  %v2615_v44 = vsel %vm2613_vm6, %v2610_v42, %v6027_v8  ;;  %v6706_v29 = vld [vmem:[#allocation31_spill] sm:$0xff]  ;;  %v6708_v46 = vld [vmem:[#allocation33_spill] sm:$0xff]  ;;  %v6709_v42 = vld [vmem:[#allocation34_spill] sm:$0xff] }
 0x549   : > { %v2618_v49 = vsel %vm2596_vm5, %v2614_v28, 0.0  ;;  %v2619_v21 = vsel %vm2597_vm7, %v2615_v44, 0.0  ;;  %v2912_v38 = vsel %vm2890_vm8, %v2908_v12, 0.0  ;;  %v6711_v28 = vld [vmem:[#allocation36_spill] sm:$0xff] }
 0x54a   : > { %v2620_v37 = vadd.f32 %v2618_v49, %v2326_v18  ;;  %v2621_v53 = vadd.f32 %v2619_v21, %v2327_v27  ;;  %v6710_v18 = vld [vmem:[#allocation35_spill] sm:$0xff]  ;;  %v6712_v49 = vld [vmem:[#allocation37_spill] sm:$0xff] }
 0x54b   : > { %v2906_v3 = vpop.permute.xlu0 %2905 }
 0x54c   : > { %v2914_v50 = vadd.f32 %v2912_v38, %v2620_v37  ;;  %v2909_v10 = vsel %vm2907_vm4, %v2904_v23, %v2906_v3  ;;  %v6707_v23 = vld [vmem:[#allocation32_spill] sm:$0xff]  ;;  %v6713_v37 = vld [vmem:[#allocation38_spill] sm:$0xff]  ;;  %v6714_v38 = vld [vmem:[#allocation39_spill] sm:$0xff] }
 0x54d   : > { %v2913_v13 = vsel %vm2891_vm9, %v2909_v10, 0.0  ;;  %v6719_v10 = vld [vmem:[#allocation41_spill] sm:$0xff] }
 0x54e   : > { %v2918_v2 = vmul.f32 %v2917_v43, %v2914_v50  ;;  %v2915_v20 = vadd.f32 %v2913_v13, %v2621_v53  ;;  %v6717_v53 = vld [vmem:[#allocation40_spill] sm:$0xff] }
 0x550   : > { %v2922_v24 = vadd.f32 %v2921_v9, %v2918_v2  ;;  %v2919_v55 = vmul.f32 %v2917_v43, %v2915_v20 }
 0x552   : > { %v2924_v36 = vsub.f32 0.0, %v2922_v24  ;;  %v2923_v8 = vadd.f32 %v2921_v9, %v2919_v55 }
 0x554   : > { %v3354_v6 = vmul.f32 -1.442695, %v2924_v36  ;;  %v2925_v4 = vsub.f32 0.0, %v2923_v8 }
 0x556   : > { %3497 = vpow2.f32 %v3354_v6  ;;  %v3355_v40 = vmul.f32 -1.442695, %v2925_v4 }
 0x558   : > { %3499 = vpow2.f32 %v3355_v40 }
 0x560   : > { %v3498_v32 = vpop.eup %3497 }
 0x561   : > { %v2932_v34 = vadd.f32 1.0, %v3498_v32 }
 0x562   : > { %v3500_v52 = vpop.eup %3499 }
 0x563   : > { %v2933_v1 = vadd.f32 1.0, %v3500_v52  ;;  %3501 = vrcp.f32 %v2932_v34 }
 0x565   : > { %3503 = vrcp.f32 %v2933_v1 }
 0x56d   : > { %v3502_v41 = vpop.eup %3501 }
 0x56f   : > { %v3504_v63 = vpop.eup %3503 }
 0x570   : > { %v2940_v7 = vcombine.low %v3502_v41, %v3504_v63 }
 0x572   : > { %v2947_v5 = vrot.slane %v2940_v7, %v2946_v11 }
 0x574   : > { %v2948_v15 = vcombine.high %v2947_v5, %v2947_v5  ;;  %v2955_v14 = vrot.slane %v2947_v5, %v2946_v11 }
 0x576   : > { %v2962_v19 = vrot.slane %v2948_v15, %v2946_v11  ;;  %v2966_v16 = vrot.slane %v2955_v14, %v2965_v61  ;;  %v2970_v51 = vrot.slane %v2955_v14, %v2969_v33 }
 0x578   : > { %v2974_v47 = vrot.slane %v2962_v19, %v2965_v61  ;;  %v2978_v59 = vrot.slane %v2962_v19, %v2969_v33  ;;  %v2983_v58 = vmul.f32 %v2966_v16, %v6700_v25  ;;  %v2984_v22 = vmul.f32 %v2970_v51, %v6701_v17 }
 0x579   : > { %v2985_v54 = vmul.f32 %v2966_v16, %v6703_v56  ;;  %v2986_v30 = vmul.f32 %v2970_v51, %v6704_v35  ;;  %v2987_v48 = vmul.f32 %v2966_v16, %v6705_v0  ;;  %v2988_v62 = vmul.f32 %v2970_v51, %v6706_v29 }
 0x57a   : > { %v2989_v26 = vmul.f32 %v2966_v16, %v6707_v23  ;;  %v2990_v31 = vmul.f32 %v2970_v51, %v6708_v46  ;;  %v2991_v12 = vmul.f32 %v2974_v47, %v6709_v42  ;;  %v2992_v27 = vmul.f32 %v2978_v59, %v6710_v18  ;;  %2999 = vst [vmem:[%s6056_s28] sm:$0xff] %v2983_v58 }
 0x57b   : > { %3000 = vst [vmem:[%s6056_s28 + $0x8] sm:$0xff] %v2984_v22  ;;  %v2993_v44 = vmul.f32 %v2974_v47, %v6711_v28  ;;  %v2994_v21 = vmul.f32 %v2978_v59, %v6712_v49  ;;  %v2995_v43 = vmul.f32 %v2974_v47, %v6713_v37  ;;  %v2996_v3 = vmul.f32 %v2978_v59, %v6714_v38 }
 0x57c   : > { %3001 = vst [vmem:[%s6056_s28 + $0x10] sm:$0xff] %v2985_v54  ;;  %3002 = vst [vmem:[%s6056_s28 + $0x18] sm:$0xff] %v2986_v30  ;;  %v2997_v50 = vmul.f32 %v2974_v47, %v6717_v53  ;;  %v2998_v9 = vmul.f32 %v2978_v59, %v6719_v10 }
 0x57d   : > { %3003 = vst [vmem:[%s6056_s28 + $0x20] sm:$0xff] %v2987_v48  ;;  %3004 = vst [vmem:[%s6056_s28 + $0x28] sm:$0xff] %v2988_v62 }
 0x57e   : > { %3005 = vst [vmem:[%s6056_s28 + $0x30] sm:$0xff] %v2989_v26  ;;  %3006 = vst [vmem:[%s6056_s28 + $0x38] sm:$0xff] %v2990_v31 }
 0x57f   : > { %3007 = vst [vmem:[%s6056_s28 + $0x40] sm:$0xff] %v2991_v12  ;;  %3008 = vst [vmem:[%s6056_s28 + $0x48] sm:$0xff] %v2992_v27 }
 0x580   : > { %3009 = vst [vmem:[%s6056_s28 + $0x50] sm:$0xff] %v2993_v44  ;;  %3010 = vst [vmem:[%s6056_s28 + $0x58] sm:$0xff] %v2994_v21 }
 0x581   : > { %3011 = vst [vmem:[%s6056_s28 + $0x60] sm:$0xff] %v2995_v43  ;;  %3012 = vst [vmem:[%s6056_s28 + $0x68] sm:$0xff] %v2996_v3 }
 0x582   : > { %3013 = vst [vmem:[%s6056_s28 + $0x70] sm:$0xff] %v2997_v50  ;;  %3014 = vst [vmem:[%s6056_s28 + $0x78] sm:$0xff] %v2998_v9 }
 0x583   : > { %3602 = shalt.err (!%p3599_p8)
}
 0x584   : > { %s3603_s1 = scalar_lea.hbm %s6080_s21, 2048  ;;  %s3607_s23 = scalar_lea.hbm %s6716_s13, 4096 }
 0x585   : > { %p3604_p1 = scmp.ne.s32.totalorder %s6080_s21, %s3603_s1  ;;  %p3608_p13 = scmp.lt.u32.totalorder %s6080_s21, %s6716_s13 }
 0x586   : > { %p3609_p7 = scmp.lt.u32.totalorder %s3607_s23, %s3603_s1  ;;  %p3611_p12 = scmp.lt.u32.totalorder %s3603_s1, %s6080_s21 }
 0x587   : > { %p3605_p5 = pnand %p3604_p1, %p3831_p9 }
 0x588   : > { %p3610_p10 = por %p3609_p7, %p3608_p13 }
 0x589   : > { %p3606_p11 = pneg %p3605_p5 }
 0x58a   : > { %p3612_p0 = por %p3611_p12, %p3610_p10 }
 0x58c   : > { %p3613_p3 = pnand %p3612_p0, %p3606_p11 }
 0x58e   : > { %3616 = shalt.err (!%p3613_p3)
}
 0x58f   : > { %s3688_s3 = smov 256   ;;  %s3689_s7 = smov 16  }
 0x590   : > { %3380 = dma.vmem_to_hbm [thread:$0]  (%p3831_p9), %s6082_s29, 2048, %s6080_s21, %s3016_s19, %s3688_s3, %s3688_s3, %s3689_s7  }
 0x591 PF: > { %s6720_s26 = sld [smem:[#allocation16_spill]]  ;;  %s6721_s10 = sld [smem:[#allocation21_spill]] }
 0x592   : > { %s6722_s14 = sld [smem:[#allocation19_spill]] }
 0x597   : > { %s3045_s18 = sand.u32 1, %s6720_s26   ;;  %p6723_p2 = scmp.ne.s32.totalorder %s6721_s10, 0 }
 0x598   : > { %p6724_p4 = scmp.ge.s32.totalorder %s6722_s14, 2  ;;  %s3046_s6 = scalar_lea.sflag [#allocation5], %s3045_s18 }
 0x59a   : > { %p3397_p6 = pnand %p6724_p4, %p6723_p2 }
 0x59c   : > { %3646 = dma.done.wait (!%p3397_p6), %s3046_s6, 2048  }
 0x59d   : > { %3648 = vsyncadd (!%p3397_p6), %s3046_s6, 4294965248  ;;  %s6725_s27 = sld [smem:[#allocation22_spill]]  ;;  %s6726_s24 = sld [smem:[#allocation17_spill]] }
 0x59e   : > { %s6727_s25 = sld [smem:[#allocation18_spill]]  ;;  %s6728_s26 = sld [smem:[#allocation23_spill]] }
 0x5a3   : > { %p22_p8 = scmp.ge.s32.totalorder %s6725_s27, 4  }
 0x5a5   :  { %24 = sbr.rel (!%p22_p8) target bundleno = 16 (0x10), region = 106 }
 0x5ac   :  { %3051 = vsyncpa [#allocation4], 1 }
 0x5ad   :  { %3053 = vsyncpa [#allocation4 + $0x1], 1 }
 0x5ae   :  { %3054 = vsyncpa [#allocation5], 1 }
 0x5af   :  { %3056 = vsyncpa [#allocation5 + $0x1], 1 }
 0x5b0   :  { %3057 = vsyncpa [#allocation6], 1 }
 0x5b1   :  { %3059 = vsyncpa [#allocation6 + $0x1], 1 }
 0x5b2   :  { %3060 = vsyncpa [#allocation9], 1 }

</bundles_post_ra>
